<compile_context>
chip_gen: v6e
topology: v6e:2x2x1
jax: 0.10.0
libtpu: 0.0.40
codegen_flags: <defaults>
</compile_context>

<pallas_src>
import jax
import jax.numpy as jnp
from jax.experimental import pallas as pl
from jax.experimental.pallas import tpu as pltpu

NZ = 128
H1, H2, H3 = 256, 512, 1024
OUT = 784
OUT_PAD = 896          # 7 * 128: lane-dense stores, MXU-aligned N
LEAK = 0.2


def _leaky_relu(x, slope=LEAK):
    return jnp.where(x > 0, x, slope * x)


def generator_kernel(x_ref,
                     w1_ref, b1_ref,
                     w2_ref, b2_ref,
                     w3_ref, b3_ref,
                     w4_ref, b4_ref,
                     o_ref):
    # Hidden layers: bf16 in/out of the MXU with f32 accumulation; bias +
    # LeakyReLU stay in bf16 so the next matmul consumes the result directly.
    h = jnp.dot(x_ref[...], w1_ref[...], preferred_element_type=jnp.float32)
    h = _leaky_relu(h.astype(jnp.bfloat16) + b1_ref[...])

    h = jnp.dot(h, w2_ref[...], preferred_element_type=jnp.float32)
    h = _leaky_relu(h.astype(jnp.bfloat16) + b2_ref[...])

    h = jnp.dot(h, w3_ref[...], preferred_element_type=jnp.float32)
    h = _leaky_relu(h.astype(jnp.bfloat16) + b3_ref[...])

    # Final layer: bias + tanh in f32 on the accumulator (safe on every chip),
    # bf16 store to halve the dominant output HBM traffic.
    h = jnp.dot(h, w4_ref[...], preferred_element_type=jnp.float32)
    o_ref[...] = jnp.tanh(h + b4_ref[...].astype(jnp.float32)).astype(jnp.bfloat16)


def _vmem_capacity_bytes():
    try:
        return int(pltpu.get_tpu_info().vmem_capacity_bytes)
    except Exception:
        return 64 << 20   # conservative fallback (v7x per-core VMEM)


def _tile_and_grid(B, cap):
    """Pick batch tile tb (multiple of 8, <= cap) minimizing padded rows, with
    an even number of grid steps when B is large (v7x two-TC balance)."""
    n = -(-B // cap)
    if n > 1 and (n % 2):
        n += 1
    tb = -(-B // n)
    tb = ((tb + 7) // 8) * 8
    b_pad = ((B + tb - 1) // tb) * tb
    return tb, b_pad


def generator_forward(x, params):
    """x: (B, nz) float32. Returns (B, 1, 28, 28) float32."""
    w1, b1, w2, b2, w3, b3, w4, b4 = params
    B = x.shape[0]

    vmem_cap = _vmem_capacity_bytes()
    big_vmem = vmem_cap >= (100 << 20)          # v5e/v6e: 128 MiB; v7x: 64 MiB
    tile_cap = 1024 if big_vmem else 512
    vmem_limit = (64 << 20) if big_vmem else (32 << 20)

    tb, b_pad = _tile_and_grid(B, tile_cap)

    xb = x.astype(jnp.bfloat16)
    if b_pad != B:
        xb = jnp.pad(xb, ((0, b_pad - B), (0, 0)))

    # Weights / biases: constant block index -> stay VMEM-resident across the
    # batch grid (Pallas skips the re-DMA when the block index is unchanged).
    resident = lambda shape: pl.BlockSpec(shape, lambda i: (0, 0))

    out = pl.pallas_call(
        generator_kernel,
        out_shape=jax.ShapeDtypeStruct((b_pad, OUT_PAD), jnp.bfloat16),
        grid=(b_pad // tb,),
        in_specs=[
            pl.BlockSpec((tb, NZ), lambda i: (i, 0)),
            resident((NZ, H1)), resident((1, H1)),
            resident((H1, H2)), resident((1, H2)),
            resident((H2, H3)), resident((1, H3)),
            resident((H3, OUT_PAD)), resident((1, OUT_PAD)),
        ],
        out_specs=pl.BlockSpec((tb, OUT_PAD), lambda i: (i, 0)),
        compiler_params=pltpu.CompilerParams(
            dimension_semantics=("parallel",),
            vmem_limit_bytes=vmem_limit,
        ),
    )(xb, w1, b1, w2, b2, w3, b3, w4, b4)

    return out[:B, :OUT].astype(jnp.float32).reshape(-1, 1, 28, 28)


def init_params(key):
    """Deterministic init mimicking nn.Linear's uniform(-1/sqrt(fan_in), +).

    Weights/biases stored as bf16, weights as (in_features, out_features).
    Layer 4 is zero-padded 784 -> 896 columns.
    """
    dims = [(NZ, H1), (H1, H2), (H2, H3), (H3, OUT)]
    params = []
    for i, (fan_in, fan_out) in enumerate(dims):
        kw, kb = jax.random.split(jax.random.fold_in(key, i))
        bound = 1.0 / jnp.sqrt(fan_in)
        w = jax.random.uniform(kw, (fan_in, fan_out), jnp.float32, -bound, bound)
        b = jax.random.uniform(kb, (1, fan_out), jnp.float32, -bound, bound)
        if fan_out == OUT:
            w = jnp.pad(w, ((0, 0), (0, OUT_PAD - OUT)))
            b = jnp.pad(b, ((0, 0), (0, OUT_PAD - OUT)))
        params += [w.astype(jnp.bfloat16), b.astype(jnp.bfloat16)]
    return tuple(params)


def reference_forward(x, params):
    """Pure-JAX reference mirroring the kernel's bf16 / f32-accum math."""
    w1, b1, w2, b2, w3, b3, w4, b4 = params
    h = x.astype(jnp.bfloat16)

    def hidden(h, w, b):
        a = jnp.dot(h, w, preferred_element_type=jnp.float32)
        return _leaky_relu(a.astype(jnp.bfloat16) + b)

    h = hidden(h, w1, b1)
    h = hidden(h, w2, b2)
    h = hidden(h, w3, b3)
    a = jnp.dot(h, w4, preferred_element_type=jnp.float32)
    o = jnp.tanh(a + b4.astype(jnp.float32)).astype(jnp.bfloat16)
    return o[:, :OUT].astype(jnp.float32).reshape(-1, 1, 28, 28)


if __name__ == "__main__":
    key = jax.random.PRNGKey(0)
    k_x, k_p = jax.random.split(key)

    B = 8
    x = jax.random.normal(k_x, (B, NZ), dtype=jnp.float32)
    params = init_params(k_p)

    out = generator_forward(x, params)
    out = jax.block_until_ready(out)

    assert out.shape == (B, 1, 28, 28), out.shape

    ref = reference_forward(x, params)
    assert jnp.allclose(out, ref, atol=2e-2, rtol=2e-2), "mismatch vs reference"

    print("KERNEL_OK")
</pallas_src>

<mosaic_0001>
module attributes {stable_mosaic.version = 11 : i64} {
  func.func @generator_kernel(%arg0: i32, %arg1: memref<8x128xbf16, #tpu.memory_space<vmem>>, %arg2: memref<128x256xbf16, #tpu.memory_space<vmem>>, %arg3: memref<1x256xbf16, #tpu.memory_space<vmem>>, %arg4: memref<256x512xbf16, #tpu.memory_space<vmem>>, %arg5: memref<1x512xbf16, #tpu.memory_space<vmem>>, %arg6: memref<512x1024xbf16, #tpu.memory_space<vmem>>, %arg7: memref<1x1024xbf16, #tpu.memory_space<vmem>>, %arg8: memref<1024x896xbf16, #tpu.memory_space<vmem>>, %arg9: memref<1x896xbf16, #tpu.memory_space<vmem>>, %arg10: memref<8x896xbf16, #tpu.memory_space<vmem>>) attributes {dimension_semantics = [#tpu.dimension_semantics<parallel>], iteration_bounds = array<i64: 1>, scalar_prefetch = 0 : i64, scratch_operands = 0 : i64, tpu.core_type = #tpu.core_type<tc>, window_params = [{transform_indices = @transform_0, window_bounds = array<i64: 8, 128>}, {pipeline_mode = #tpu.pipeline_mode<synchronous>, transform_indices = @transform_1, window_bounds = array<i64: 128, 256>}, {pipeline_mode = #tpu.pipeline_mode<synchronous>, transform_indices = @transform_2, window_bounds = array<i64: 1, 256>}, {pipeline_mode = #tpu.pipeline_mode<synchronous>, transform_indices = @transform_3, window_bounds = array<i64: 256, 512>}, {pipeline_mode = #tpu.pipeline_mode<synchronous>, transform_indices = @transform_4, window_bounds = array<i64: 1, 512>}, {pipeline_mode = #tpu.pipeline_mode<synchronous>, transform_indices = @transform_5, window_bounds = array<i64: 512, 1024>}, {pipeline_mode = #tpu.pipeline_mode<synchronous>, transform_indices = @transform_6, window_bounds = array<i64: 1, 1024>}, {pipeline_mode = #tpu.pipeline_mode<synchronous>, transform_indices = @transform_7, window_bounds = array<i64: 1024, 896>}, {pipeline_mode = #tpu.pipeline_mode<synchronous>, transform_indices = @transform_8, window_bounds = array<i64: 1, 896>}, {transform_indices = @transform_9, window_bounds = array<i64: 8, 896>}]} {
    %c0 = arith.constant 0 : index
    %c0_0 = arith.constant 0 : index
    %0 = vector.load %arg1[%c0, %c0_0] : memref<8x128xbf16, #tpu.memory_space<vmem>>, vector<8x128xbf16>
    %c0_1 = arith.constant 0 : index
    %c0_2 = arith.constant 0 : index
    %1 = vector.load %arg2[%c0_1, %c0_2] : memref<128x256xbf16, #tpu.memory_space<vmem>>, vector<128x256xbf16>
    %cst = arith.constant dense<0.000000e+00> : vector<8x256xf32>
    %2 = tpu.matmul %0, %1, %cst {dimension_numbers = #tpu.dot_dimension_numbers<[1], [0], [0], [1], [0, 0, 1, 1], [], []>} : vector<8x128xbf16>, vector<128x256xbf16>, vector<8x256xf32> -> vector<8x256xf32>
    %3 = arith.truncf %2 : vector<8x256xf32> to vector<8x256xbf16>
    %c0_3 = arith.constant 0 : index
    %c0_4 = arith.constant 0 : index
    %4 = vector.load %arg3[%c0_3, %c0_4] : memref<1x256xbf16, #tpu.memory_space<vmem>>, vector<1x256xbf16>
    %5 = vector.broadcast %4 : vector<1x256xbf16> to vector<8x256xbf16>
    %6 = arith.addf %3, %5 : vector<8x256xbf16>
    %cst_5 = arith.constant 0.000000e+00 : bf16
    %7 = vector.broadcast %cst_5 : bf16 to vector<8x256xbf16>
    %8 = arith.cmpf ogt, %6, %7 : vector<8x256xbf16>
    %cst_6 = arith.constant 2.001950e-01 : bf16
    %9 = vector.broadcast %cst_6 : bf16 to vector<8x256xbf16>
    %10 = arith.mulf %9, %6 : vector<8x256xbf16>
    %11 = arith.select %8, %6, %10 : vector<8x256xi1>, vector<8x256xbf16>
    %c0_7 = arith.constant 0 : index
    %c0_8 = arith.constant 0 : index
    %12 = vector.load %arg4[%c0_7, %c0_8] : memref<256x512xbf16, #tpu.memory_space<vmem>>, vector<256x512xbf16>
    %cst_9 = arith.constant dense<0.000000e+00> : vector<8x512xf32>
    %13 = tpu.matmul %11, %12, %cst_9 {dimension_numbers = #tpu.dot_dimension_numbers<[1], [0], [0], [1], [0, 0, 1, 1], [], []>} : vector<8x256xbf16>, vector<256x512xbf16>, vector<8x512xf32> -> vector<8x512xf32>
    %14 = arith.truncf %13 : vector<8x512xf32> to vector<8x512xbf16>
    %c0_10 = arith.constant 0 : index
    %c0_11 = arith.constant 0 : index
    %15 = vector.load %arg5[%c0_10, %c0_11] : memref<1x512xbf16, #tpu.memory_space<vmem>>, vector<1x512xbf16>
    %16 = vector.broadcast %15 : vector<1x512xbf16> to vector<8x512xbf16>
    %17 = arith.addf %14, %16 : vector<8x512xbf16>
    %cst_12 = arith.constant 0.000000e+00 : bf16
    %18 = vector.broadcast %cst_12 : bf16 to vector<8x512xbf16>
    %19 = arith.cmpf ogt, %17, %18 : vector<8x512xbf16>
    %cst_13 = arith.constant 2.001950e-01 : bf16
    %20 = vector.broadcast %cst_13 : bf16 to vector<8x512xbf16>
    %21 = arith.mulf %20, %17 : vector<8x512xbf16>
    %22 = arith.select %19, %17, %21 : vector<8x512xi1>, vector<8x512xbf16>
    %c0_14 = arith.constant 0 : index
    %c0_15 = arith.constant 0 : index
    %23 = vector.load %arg6[%c0_14, %c0_15] : memref<512x1024xbf16, #tpu.memory_space<vmem>>, vector<512x1024xbf16>
    %cst_16 = arith.constant dense<0.000000e+00> : vector<8x1024xf32>
    %24 = tpu.matmul %22, %23, %cst_16 {dimension_numbers = #tpu.dot_dimension_numbers<[1], [0], [0], [1], [0, 0, 1, 1], [], []>} : vector<8x512xbf16>, vector<512x1024xbf16>, vector<8x1024xf32> -> vector<8x1024xf32>
    %25 = arith.truncf %24 : vector<8x1024xf32> to vector<8x1024xbf16>
    %c0_17 = arith.constant 0 : index
    %c0_18 = arith.constant 0 : index
    %26 = vector.load %arg7[%c0_17, %c0_18] : memref<1x1024xbf16, #tpu.memory_space<vmem>>, vector<1x1024xbf16>
    %27 = vector.broadcast %26 : vector<1x1024xbf16> to vector<8x1024xbf16>
    %28 = arith.addf %25, %27 : vector<8x1024xbf16>
    %cst_19 = arith.constant 0.000000e+00 : bf16
    %29 = vector.broadcast %cst_19 : bf16 to vector<8x1024xbf16>
    %30 = arith.cmpf ogt, %28, %29 : vector<8x1024xbf16>
    %cst_20 = arith.constant 2.001950e-01 : bf16
    %31 = vector.broadcast %cst_20 : bf16 to vector<8x1024xbf16>
    %32 = arith.mulf %31, %28 : vector<8x1024xbf16>
    %33 = arith.select %30, %28, %32 : vector<8x1024xi1>, vector<8x1024xbf16>
    %c0_21 = arith.constant 0 : index
    %c0_22 = arith.constant 0 : index
    %34 = vector.load %arg8[%c0_21, %c0_22] : memref<1024x896xbf16, #tpu.memory_space<vmem>>, vector<1024x896xbf16>
    %cst_23 = arith.constant dense<0.000000e+00> : vector<8x896xf32>
    %35 = tpu.matmul %33, %34, %cst_23 {dimension_numbers = #tpu.dot_dimension_numbers<[1], [0], [0], [1], [0, 0, 1, 1], [], []>} : vector<8x1024xbf16>, vector<1024x896xbf16>, vector<8x896xf32> -> vector<8x896xf32>
    %c0_24 = arith.constant 0 : index
    %c0_25 = arith.constant 0 : index
    %36 = vector.load %arg9[%c0_24, %c0_25] : memref<1x896xbf16, #tpu.memory_space<vmem>>, vector<1x896xbf16>
    %37 = arith.extf %36 : vector<1x896xbf16> to vector<1x896xf32>
    %38 = vector.broadcast %37 : vector<1x896xf32> to vector<8x896xf32>
    %39 = arith.addf %35, %38 : vector<8x896xf32>
    %40 = math.tanh %39 : vector<8x896xf32>
    %41 = arith.truncf %40 : vector<8x896xf32> to vector<8x896xbf16>
    %c0_26 = arith.constant 0 : index
    %c0_27 = arith.constant 0 : index
    %42 = vector.load %arg10[%c0_26, %c0_27] : memref<8x896xbf16, #tpu.memory_space<vmem>>, vector<8x896xbf16>
    tpu.vector_store %arg10[%c0_26, %c0_27], %41 {strides = array<i32>} : memref<8x896xbf16, #tpu.memory_space<vmem>>, vector<8x896xbf16>,
    return
  }
  func.func @transform_0(%arg0: i32) -> (i32, i32) {
    %c0_i32 = arith.constant 0 : i32
    %c0_i32_0 = arith.constant 0 : i32
    return %arg0, %c0_i32 : i32, i32
  }
  func.func @transform_1(%arg0: i32) -> (i32, i32) {
    %c0_i32 = arith.constant 0 : i32
    %c0_i32_0 = arith.constant 0 : i32
    %c0_i32_1 = arith.constant 0 : i32
    return %c0_i32, %c0_i32_0 : i32, i32
  }
  func.func @transform_2(%arg0: i32) -> (i32, i32) {
    %c0_i32 = arith.constant 0 : i32
    %c0_i32_0 = arith.constant 0 : i32
    %c0_i32_1 = arith.constant 0 : i32
    return %c0_i32, %c0_i32_0 : i32, i32
  }
  func.func @transform_3(%arg0: i32) -> (i32, i32) {
    %c0_i32 = arith.constant 0 : i32
    %c0_i32_0 = arith.constant 0 : i32
    %c0_i32_1 = arith.constant 0 : i32
    return %c0_i32, %c0_i32_0 : i32, i32
  }
  func.func @transform_4(%arg0: i32) -> (i32, i32) {
    %c0_i32 = arith.constant 0 : i32
    %c0_i32_0 = arith.constant 0 : i32
    %c0_i32_1 = arith.constant 0 : i32
    return %c0_i32, %c0_i32_0 : i32, i32
  }
  func.func @transform_5(%arg0: i32) -> (i32, i32) {
    %c0_i32 = arith.constant 0 : i32
    %c0_i32_0 = arith.constant 0 : i32
    %c0_i32_1 = arith.constant 0 : i32
    return %c0_i32, %c0_i32_0 : i32, i32
  }
  func.func @transform_6(%arg0: i32) -> (i32, i32) {
    %c0_i32 = arith.constant 0 : i32
    %c0_i32_0 = arith.constant 0 : i32
    %c0_i32_1 = arith.constant 0 : i32
    return %c0_i32, %c0_i32_0 : i32, i32
  }
  func.func @transform_7(%arg0: i32) -> (i32, i32) {
    %c0_i32 = arith.constant 0 : i32
    %c0_i32_0 = arith.constant 0 : i32
    %c0_i32_1 = arith.constant 0 : i32
    return %c0_i32, %c0_i32_0 : i32, i32
  }
  func.func @transform_8(%arg0: i32) -> (i32, i32) {
    %c0_i32 = arith.constant 0 : i32
    %c0_i32_0 = arith.constant 0 : i32
    %c0_i32_1 = arith.constant 0 : i32
    return %c0_i32, %c0_i32_0 : i32, i32
  }
  func.func @transform_9(%arg0: i32) -> (i32, i32) {
    %c0_i32 = arith.constant 0 : i32
    %c0_i32_0 = arith.constant 0 : i32
    return %arg0, %c0_i32 : i32, i32
  }
}

</mosaic_0001>

<bundles_post_ra>
// kernel: tpu_custom_call.1
= control target key start
LH: loop header
LB: loop body
LE: loop exit
PB: predicated region body
PF: predicated region fallthrough
CT: control target
= control target key end

     0   :  { %14 = vsyncpa [#allocation3], 0  ;;  %s8676_s0 = inlined_call_operand.hbm [shape: bf16[8,128], index: 0, kind: input, shape index: {}]   ;;  %s8677_s1 = inlined_call_operand.hbm [shape: bf16[128,256], index: 1, kind: input, shape index: {}]   ;;  %s8678_s2 = inlined_call_operand.hbm [shape: bf16[1,256], index: 2, kind: input, shape index: {}]   ;;  %s8679_s3 = inlined_call_operand.hbm [shape: bf16[256,512], index: 3, kind: input, shape index: {}]   ;;  %s8680_s4 = inlined_call_operand.hbm [shape: bf16[1,512], index: 4, kind: input, shape index: {}]   ;;  %s8681_s5 = inlined_call_operand.hbm [shape: bf16[512,1024], index: 5, kind: input, shape index: {}]   ;;  %s8682_s6 = inlined_call_operand.hbm [shape: bf16[1,1024], index: 6, kind: input, shape index: {}]   ;;  %s8683_s7 = inlined_call_operand.hbm [shape: bf16[1024,896], index: 7, kind: input, shape index: {}]   ;;  %s8684_s8 = inlined_call_operand.hbm [shape: bf16[1,896], index: 8, kind: input, shape index: {}]   ;;  %s8685_s9 = inlined_call_operand.hbm [shape: bf16[8,896], index: 9, kind: output, shape index: {}]  }
   0x1   :  { %15 = vsyncpa [#allocation6], 0 }
   0x2   :  { %16 = vsyncpa [#allocation9], 0 }
   0x3   :  { %17 = vsyncpa [#allocation12], 0 }
   0x4   :  { %18 = vsyncpa [#allocation15], 0 }
   0x5   :  { %19 = vsyncpa [#allocation4], 0  ;;  %s8369_s30 = smov [#allocation5]  }
   0x6   :  { %s35_s10 = sshll.u32 %s8369_s30, 4  ;;  %s36_s10 = int_to_ptr.vmem [resolvable:$true] %s35_s10 }
   0x7   :  { %s8165_s11 = scalar_lea.vmem %s36_s10, 2048  ;;  %p8170_p1 = scmp.lt.s32.totalorder %s36_s10, %s36_s10 }
   0x8   :  { %p8166_p0 = scmp.ne.s32.totalorder %s36_s10, %s8165_s11  ;;  %p8171_p2 = scmp.lt.s32.totalorder %s8165_s11, %s8165_s11 }
   0xa   :  { %p8172_p3 = por %p8171_p2, %p8170_p1 }
   0xc   :  { %p8173_p4 = pnand %p8172_p3, %p8166_p0 }
   0xe   :  { %8176 = shalt.err (!%p8173_p4)
}
   0xf   :  { %s8370_s12 = smov 128   ;;  %s8371_s13 = smov 8  }
  0x10   :  { %41 = dma.hbm_to_vmem [thread:$0]  %s8677_s1, 2048, %s36_s10, [#allocation6], %s8370_s12, %s8370_s12, %s8371_s13  }
  0x11   :  { %s8372_s16 = smov [#allocation8]  }
  0x12   :  { %s57_s17 = sshll.u32 %s8372_s16, 4  ;;  %s58_s17 = int_to_ptr.vmem [resolvable:$true] %s57_s17 }
  0x13   :  { %s8185_s18 = scalar_lea.vmem %s58_s17, 8192  ;;  %p8190_p6 = scmp.lt.s32.totalorder %s58_s17, %s58_s17 }
  0x14   :  { %p8186_p5 = scmp.ne.s32.totalorder %s58_s17, %s8185_s18  ;;  %p8191_p7 = scmp.lt.s32.totalorder %s8185_s18, %s8185_s18 }
  0x16   :  { %p8192_p8 = por %p8191_p7, %p8190_p6 }
  0x18   :  { %p8193_p9 = pnand %p8192_p8, %p8186_p5 }
  0x1a   :  { %8196 = shalt.err (!%p8193_p9)
}
  0x1b   :  { %s8373_s19 = smov 256   ;;  %s8374_s20 = smov 16  }
  0x1c   :  { %63 = dma.hbm_to_vmem [thread:$0]  %s8679_s3, 8192, %s58_s17, [#allocation9], %s8373_s19, %s8373_s19, %s8374_s20  }
  0x1d   :  { %s8375_s23 = smov [#allocation11]  }
  0x1e   :  { %s79_s24 = sshll.u32 %s8375_s23, 4  ;;  %s80_s24 = int_to_ptr.vmem [resolvable:$true] %s79_s24 }
  0x1f   :  { %s8205_s1 = scalar_lea.vmem %s80_s24, 32768  ;;  %p8210_p11 = scmp.lt.s32.totalorder %s80_s24, %s80_s24 }
  0x20   :  { %p8206_p10 = scmp.ne.s32.totalorder %s80_s24, %s8205_s1  ;;  %p8211_p12 = scmp.lt.s32.totalorder %s8205_s1, %s8205_s1 }
  0x22   :  { %p8212_p13 = por %p8211_p12, %p8210_p11 }
  0x24   :  { %p8213_p0 = pnand %p8212_p13, %p8206_p10 }
  0x26   :  { %8216 = shalt.err (!%p8213_p0)
}
  0x27   :  { %s8376_s25 = smov 512   ;;  %s8377_s26 = smov 32  }
  0x28   :  { %85 = dma.hbm_to_vmem [thread:$0]  %s8681_s5, 32768, %s80_s24, [#allocation12], %s8376_s25, %s8376_s25, %s8377_s26  }
  0x29   :  { %s8378_s29 = smov [#allocation14]  }
  0x2a   :  { %s101_s30 = sshll.u32 %s8378_s29, 4  ;;  %s102_s30 = int_to_ptr.vmem [resolvable:$true] %s101_s30 }
  0x2b   :  { %s8225_s3 = scalar_lea.vmem %s102_s30, 57344  ;;  %p8230_p2 = scmp.lt.s32.totalorder %s102_s30, %s102_s30 }
  0x2c   :  { %p8226_p1 = scmp.ne.s32.totalorder %s102_s30, %s8225_s3  ;;  %p8231_p3 = scmp.lt.s32.totalorder %s8225_s3, %s8225_s3 }
  0x2e   :  { %p8232_p4 = por %p8231_p3, %p8230_p2 }
  0x30   :  { %p8233_p5 = pnand %p8232_p4, %p8226_p1 }
  0x32   :  { %8236 = shalt.err (!%p8233_p5)
}
  0x33   :  { %s8379_s10 = smov 448   ;;  %s8380_s11 = smov 28  }
  0x34   :  { %107 = dma.hbm_to_vmem [thread:$0]  %s8683_s7, 57344, %s102_s30, [#allocation15], %s8379_s10, %s8379_s10, %s8380_s11  }
  0x35   :  { %s8381_s14 = smov [#allocation2]   ;;  %s8382_s16 = smov [#allocation7]  }
  0x36   :  { %s26_s15 = sshll.u32 %s8381_s14, 4  ;;  %s48_s5 = sshll.u32 %s8382_s16, 4  ;;  %s27_s15 = int_to_ptr.vmem [resolvable:$true] %s26_s15  ;;  %s49_s5 = int_to_ptr.vmem [resolvable:$true] %s48_s5 }
  0x37   :  { %s8245_s17 = scalar_lea.vmem %s27_s15, 64  ;;  %p8250_p7 = scmp.lt.s32.totalorder %s27_s15, %s27_s15 }
  0x38   :  { %p8246_p6 = scmp.ne.s32.totalorder %s27_s15, %s8245_s17  ;;  %p8251_p8 = scmp.lt.s32.totalorder %s8245_s17, %s8245_s17 }
  0x3a   :  { %p8252_p9 = por %p8251_p8, %p8250_p7 }
  0x3c   :  { %p8253_p10 = pnand %p8252_p9, %p8246_p6 }
  0x3e   :  { %8256 = shalt.err (!%p8253_p10)
}
  0x3f   :  { %29 = dma.hbm_to_vmem [thread:$0]  %s8676_s0, 64, %s27_s15, [#allocation3]  }
  0x40   :  { %s8265_s20 = scalar_lea.vmem %s49_s5, 32  ;;  %p8270_p12 = scmp.lt.s32.totalorder %s49_s5, %s49_s5 }
  0x41   :  { %p8266_p11 = scmp.ne.s32.totalorder %s49_s5, %s8265_s20  ;;  %p8271_p13 = scmp.lt.s32.totalorder %s8265_s20, %s8265_s20 }
  0x43   :  { %p8272_p0 = por %p8271_p13, %p8270_p12 }
  0x45   :  { %p8273_p1 = pnand %p8272_p0, %p8266_p11 }
  0x47   :  { %8276 = shalt.err (!%p8273_p1)
}
  0x48   :  { %51 = dma.hbm_to_vmem [thread:$0]  %s8678_s2, 32, %s49_s5, [#allocation6]  }
  0x49   :  { %s8383_s22 = smov [#allocation10]   ;;  %s8384_s24 = smov [#allocation13]  }
  0x4a   :  { %s70_s23 = sshll.u32 %s8383_s22, 4  ;;  %s92_s1 = sshll.u32 %s8384_s24, 4  ;;  %s71_s23 = int_to_ptr.vmem [resolvable:$true] %s70_s23  ;;  %s93_s1 = int_to_ptr.vmem [resolvable:$true] %s92_s1 }
  0x4b   :  { %s8285_s25 = scalar_lea.vmem %s71_s23, 64  ;;  %p8290_p3 = scmp.lt.s32.totalorder %s71_s23, %s71_s23 }
  0x4c   :  { %p8286_p2 = scmp.ne.s32.totalorder %s71_s23, %s8285_s25  ;;  %p8291_p4 = scmp.lt.s32.totalorder %s8285_s25, %s8285_s25 }
  0x4e   :  { %p8292_p5 = por %p8291_p4, %p8290_p3 }
  0x50   :  { %p8293_p6 = pnand %p8292_p5, %p8286_p2 }
  0x52   :  { %8296 = shalt.err (!%p8293_p6)
}
  0x53   :  { %73 = dma.hbm_to_vmem [thread:$0]  %s8680_s4, 64, %s71_s23, [#allocation9]  }
  0x54   :  { %s8305_s27 = scalar_lea.vmem %s93_s1, 128  ;;  %p8310_p8 = scmp.lt.s32.totalorder %s93_s1, %s93_s1 }
  0x55   :  { %p8306_p7 = scmp.ne.s32.totalorder %s93_s1, %s8305_s27  ;;  %p8311_p9 = scmp.lt.s32.totalorder %s8305_s27, %s8305_s27 }
  0x57   :  { %p8312_p10 = por %p8311_p9, %p8310_p8 }
  0x59   :  { %p8313_p11 = pnand %p8312_p10, %p8306_p7 }
  0x5b   :  { %8316 = shalt.err (!%p8313_p11)
}
  0x5c   :  { %95 = dma.hbm_to_vmem [thread:$0]  %s8682_s6, 128, %s93_s1, [#allocation12]  }
  0x5d   :  { %s8385_s29 = smov [#allocation16]  }
  0x5e   :  { %s114_s30 = sshll.u32 %s8385_s29, 4  ;;  %s115_s30 = int_to_ptr.vmem [resolvable:$true] %s114_s30 }
  0x5f   :  { %s8325_s3 = scalar_lea.vmem %s115_s30, 112  ;;  %s8329_s10 = scalar_lea.vmem %s115_s30, 128 }
  0x60   :  { %p8326_p12 = scmp.ne.s32.totalorder %s115_s30, %s8325_s3  ;;  %p8330_p13 = scmp.lt.s32.totalorder %s115_s30, %s115_s30 }
  0x61   :  { %p8331_p0 = scmp.lt.s32.totalorder %s8329_s10, %s8325_s3 }
  0x63   :  { %p8332_p1 = por %p8331_p0, %p8330_p13 }
  0x65   :  { %p8333_p2 = pnand %p8332_p1, %p8326_p12 }
  0x67   :  { %8336 = shalt.err (!%p8333_p2)
}
  0x68   :  { %117 = dma.hbm_to_vmem [thread:$0]  %s8684_s8, 112, %s115_s30, [#allocation15]  }
  0x69   :  { %8357 = dma.done.wait [#allocation3], 64  }
  0x6a   :  { %8358 = vsyncadd [#allocation3], 4294967232 }
  0x6b   :  { %8359 = dma.done.wait [#allocation6], 2080  }
  0x6c   :  { %8360 = vsyncadd [#allocation6], 4294965216 }
  0x6d   :  { %8361 = dma.done.wait [#allocation9], 8256  }
  0x6e   :  { %8362 = vsyncadd [#allocation9], 4294959040 }
  0x6f   :  { %8363 = dma.done.wait [#allocation12], 32896  }
  0x70   :  { %8364 = vsyncadd [#allocation12], 4294934400 }
  0x71   :  { %8365 = dma.done.wait [#allocation15], 57456  }
  0x72   :  { %8366 = vsyncadd [#allocation15], 4294909840  ;;  %v8386_v0 = vmov 0   ;;  %v7381_v1 = vld [vmem:[#allocation5 + $0x74] ss:$8 sps:$4 sm:$0xff]   ;;  %s8388_s6 = smov [#allocation17]  }
  0x73   :  { %276 = vmatprep.mubr.bf16.mxu0 %v8386_v0  ;;  %v7383_v2 = vld [vmem:[#allocation5 + $0x70] ss:$8 sps:$4 sm:$0xff]   ;;  %244 = vmatprep.subr.bf16.mxu0 %v7381_v1  ;;  %v7384_v3 = vld [vmem:[#allocation5 + $0x64] ss:$8 sps:$4 sm:$0xff]   ;;  %v7386_v4 = vld [vmem:[#allocation5 + $0x60] ss:$8 sps:$4 sm:$0xff]  }
  0x74   :  { %245 = vmatpush1.bf16.msra.mxu0 %v7383_v2  ;;  %v7387_v5 = vld [vmem:[#allocation5 + $0x54] ss:$8 sps:$4 sm:$0xff]   ;;  %v7389_v6 = vld [vmem:[#allocation5 + $0x50] ss:$8 sps:$4 sm:$0xff]   ;;  %v7390_v7 = vld [vmem:[#allocation5 + $0x44] ss:$8 sps:$4 sm:$0xff]  }
  0x75   :  { %246 = vmatprep.subr.bf16.mxu0 %v7384_v3  ;;  %v7392_v8 = vld [vmem:[#allocation5 + $0x40] ss:$8 sps:$4 sm:$0xff]   ;;  %v7393_v10 = vld [vmem:[#allocation5 + $0x34] ss:$8 sps:$4 sm:$0xff]   ;;  %v7395_v13 = vld [vmem:[#allocation5 + $0x30] ss:$8 sps:$4 sm:$0xff]  }
  0x76   :  { %v7405_v9 = vld [vmem:[#allocation8 + $0xe4] ss:$16 sps:$4 sm:$0xff]   ;;  %v7410_v11 = vld [vmem:[#allocation8 + $0xe0] ss:$16 sps:$4 sm:$0xff]   ;;  %v7409_v26 = vld [vmem:[#allocation8 + $0xec] ss:$16 sps:$4 sm:$0xff]  }
  0x77   :  { %717 = vmatprep.subr.bf16.mxu1 %v7405_v9  ;;  %v7411_v12 = vld [vmem:[#allocation8 + $0xc4] ss:$16 sps:$4 sm:$0xff]   ;;  %v7416_v15 = vld [vmem:[#allocation8 + $0xc0] ss:$16 sps:$4 sm:$0xff]   ;;  %v147_v29 = vld [vmem:[#allocation2] sm:$0xf] }
  0x78   :  { %247 = vmatpush1.bf16.msra.mxu0 %v7386_v4  ;;  %v7396_v14 = vld [vmem:[#allocation5 + $0x24] ss:$8 sps:$4 sm:$0xff]   ;;  %718 = vmatpush1.bf16.msra.mxu1 %v7410_v11  ;;  %v7398_v17 = vld [vmem:[#allocation5 + $0x20] ss:$8 sps:$4 sm:$0xff]   ;;  %v7399_v18 = vld [vmem:[#allocation5 + $0x14] ss:$8 sps:$4 sm:$0xff]  }
  0x79   :  { %248 = vmatprep.subr.bf16.mxu0 %v7387_v5  ;;  %719 = vmatprep.subr.bf16.mxu1 %v7411_v12  ;;  %v7417_v16 = vld [vmem:[#allocation8 + $0xa4] ss:$16 sps:$4 sm:$0xff]   ;;  %v7422_v19 = vld [vmem:[#allocation8 + $0xa0] ss:$16 sps:$4 sm:$0xff]   ;;  %v7407_v30 = vld [vmem:[#allocation8 + $0xe8] ss:$16 sps:$4 sm:$0xff]  }
  0x7a   :  { %v7423_v20 = vld [vmem:[#allocation8 + $0x84] ss:$16 sps:$4 sm:$0xff]   ;;  %v7428_v23 = vld [vmem:[#allocation8 + $0x80] ss:$16 sps:$4 sm:$0xff]   ;;  %v7415_v31 = vld [vmem:[#allocation8 + $0xcc] ss:$16 sps:$4 sm:$0xff]  }
  0x7b   :  { %v7401_v21 = vld [vmem:[#allocation5 + $0x10] ss:$8 sps:$4 sm:$0xff]   ;;  %v7402_v22 = vld [vmem:[#allocation5 + $0x4] ss:$8 sps:$4 sm:$0xff]   ;;  %v7404_v25 = vld [vmem:[#allocation5] ss:$8 sps:$4 sm:$0xff]  }
  0x7c   :  { %249 = vmatpush1.bf16.msra.mxu0 %v7389_v6  ;;  %720 = vmatpush1.bf16.msra.mxu1 %v7416_v15  ;;  %v7429_v24 = vld [vmem:[#allocation8 + $0x64] ss:$16 sps:$4 sm:$0xff]   ;;  %v7434_v27 = vld [vmem:[#allocation8 + $0x60] ss:$16 sps:$4 sm:$0xff]   ;;  %v7413_v34 = vld [vmem:[#allocation8 + $0xc8] ss:$16 sps:$4 sm:$0xff]  }
  0x7d   :  { %250 = vmatprep.subr.bf16.mxu0 %v7390_v7  ;;  %721 = vmatprep.subr.bf16.mxu1 %v7417_v16  ;;  %v7435_v28 = vld [vmem:[#allocation8 + $0x44] ss:$16 sps:$4 sm:$0xff]   ;;  %v7440_v32 = vld [vmem:[#allocation8 + $0x40] ss:$16 sps:$4 sm:$0xff]   ;;  %v7421_v35 = vld [vmem:[#allocation8 + $0xac] ss:$16 sps:$4 sm:$0xff]  }
  0x7e   :  { %v7441_v33 = vld [vmem:[#allocation8 + $0x24] ss:$16 sps:$4 sm:$0xff]   ;;  %v7446_v36 = vld [vmem:[#allocation8 + $0x20] ss:$16 sps:$4 sm:$0xff]   ;;  %v7419_v38 = vld [vmem:[#allocation8 + $0xa8] ss:$16 sps:$4 sm:$0xff]  }
  0x7f   :  { %v7447_v37 = vld [vmem:[#allocation8 + $0x4] ss:$16 sps:$4 sm:$0xff]   ;;  %v7427_v39 = vld [vmem:[#allocation8 + $0x8c] ss:$16 sps:$4 sm:$0xff]   ;;  %v7452_v40 = vld [vmem:[#allocation8] ss:$16 sps:$4 sm:$0xff]  }
  0x80   :  { %251 = vmatpush1.bf16.msra.mxu0 %v7392_v8  ;;  %722 = vmatpush1.bf16.msra.mxu1 %v7422_v19  ;;  %v7453_v41 = vld [vmem:[#allocation8 + $0x1e4] ss:$16 sps:$4 sm:$0xff]   ;;  %v7425_v42 = vld [vmem:[#allocation8 + $0x88] ss:$16 sps:$4 sm:$0xff]   ;;  %v7433_v43 = vld [vmem:[#allocation8 + $0x6c] ss:$16 sps:$4 sm:$0xff]  }
  0x81   :  { %252 = vmatprep.subr.bf16.mxu0 %v7393_v10  ;;  %723 = vmatprep.subr.bf16.mxu1 %v7423_v20  ;;  %v7458_v44 = vld [vmem:[#allocation8 + $0x1e0] ss:$16 sps:$4 sm:$0xff]   ;;  %v7459_v45 = vld [vmem:[#allocation8 + $0x1c4] ss:$16 sps:$4 sm:$0xff]   ;;  %v7431_v46 = vld [vmem:[#allocation8 + $0x68] ss:$16 sps:$4 sm:$0xff]  }
  0x82   :  { %v7439_v47 = vld [vmem:[#allocation8 + $0x4c] ss:$16 sps:$4 sm:$0xff]   ;;  %v7464_v48 = vld [vmem:[#allocation8 + $0x1c0] ss:$16 sps:$4 sm:$0xff]   ;;  %v7465_v49 = vld [vmem:[#allocation8 + $0x1a4] ss:$16 sps:$4 sm:$0xff]  }
  0x83   :  { %v7437_v50 = vld [vmem:[#allocation8 + $0x48] ss:$16 sps:$4 sm:$0xff]   ;;  %v7470_v51 = vld [vmem:[#allocation8 + $0x1a0] ss:$16 sps:$4 sm:$0xff]   ;;  %v7445_v52 = vld [vmem:[#allocation8 + $0x2c] ss:$16 sps:$4 sm:$0xff]  }
  0x84   :  { %253 = vmatpush1.bf16.msra.mxu0 %v7395_v13  ;;  %724 = vmatpush1.bf16.msra.mxu1 %v7428_v23  ;;  %v7471_v53 = vld [vmem:[#allocation8 + $0x184] ss:$16 sps:$4 sm:$0xff]   ;;  %v7443_v54 = vld [vmem:[#allocation8 + $0x28] ss:$16 sps:$4 sm:$0xff]   ;;  %v7476_v55 = vld [vmem:[#allocation8 + $0x180] ss:$16 sps:$4 sm:$0xff]  }
  0x85   :  { %254 = vmatprep.subr.bf16.mxu0 %v7396_v14  ;;  %725 = vmatprep.subr.bf16.mxu1 %v7429_v24  ;;  %v7451_v56 = vld [vmem:[#allocation8 + $0xc] ss:$16 sps:$4 sm:$0xff]   ;;  %v7477_v57 = vld [vmem:[#allocation8 + $0x164] ss:$16 sps:$4 sm:$0xff]   ;;  %v7449_v58 = vld [vmem:[#allocation8 + $0x8] ss:$16 sps:$4 sm:$0xff]  }
  0x86   :  { %v7482_v59 = vld [vmem:[#allocation8 + $0x160] ss:$16 sps:$4 sm:$0xff]   ;;  %v7457_v60 = vld [vmem:[#allocation8 + $0x1ec] ss:$16 sps:$4 sm:$0xff]   ;;  %v7483_v61 = vld [vmem:[#allocation8 + $0x144] ss:$16 sps:$4 sm:$0xff]  }
  0x87   :  { %v7455_v62 = vld [vmem:[#allocation8 + $0x1e8] ss:$16 sps:$4 sm:$0xff]   ;;  %v7463_v63 = vld [vmem:[#allocation8 + $0x1cc] ss:$16 sps:$4 sm:$0xff]   ;;  %v7488_v9 = vld [vmem:[#allocation8 + $0x140] ss:$16 sps:$4 sm:$0xff]  }
  0x88   :  { %255 = vmatpush1.bf16.msra.mxu0 %v7398_v17  ;;  %726 = vmatpush1.bf16.msra.mxu1 %v7434_v27  ;;  %v7461_v0 = vld [vmem:[#allocation8 + $0x1c8] ss:$16 sps:$4 sm:$0xff]   ;;  %v7469_v1 = vld [vmem:[#allocation8 + $0x1ac] ss:$16 sps:$4 sm:$0xff]   ;;  %v7489_v10 = vld [vmem:[#allocation8 + $0x124] ss:$16 sps:$4 sm:$0xff]  }
  0x89   :  { %256 = vmatprep.subr.bf16.mxu0 %v7399_v18  ;;  %727 = vmatprep.subr.bf16.mxu1 %v7435_v28  ;;  %v7467_v2 = vld [vmem:[#allocation8 + $0x1a8] ss:$16 sps:$4 sm:$0xff]   ;;  %v7475_v3 = vld [vmem:[#allocation8 + $0x18c] ss:$16 sps:$4 sm:$0xff]   ;;  %v7494_v13 = vld [vmem:[#allocation8 + $0x120] ss:$16 sps:$4 sm:$0xff]  }
  0x8a   :  { %v7473_v4 = vld [vmem:[#allocation8 + $0x188] ss:$16 sps:$4 sm:$0xff]   ;;  %v7481_v5 = vld [vmem:[#allocation8 + $0x16c] ss:$16 sps:$4 sm:$0xff]   ;;  %v7495_v14 = vld [vmem:[#allocation8 + $0x104] ss:$16 sps:$4 sm:$0xff]  }
  0x8b   :  { %v7479_v6 = vld [vmem:[#allocation8 + $0x168] ss:$16 sps:$4 sm:$0xff]   ;;  %v7487_v7 = vld [vmem:[#allocation8 + $0x14c] ss:$16 sps:$4 sm:$0xff]   ;;  %v7500_v17 = vld [vmem:[#allocation8 + $0x100] ss:$16 sps:$4 sm:$0xff]  }
  0x8c   :  { %257 = vmatpush1.bf16.msra.mxu0 %v7401_v21  ;;  %728 = vmatpush1.bf16.msra.mxu1 %v7440_v32  ;;  %v7485_v8 = vld [vmem:[#allocation8 + $0x148] ss:$16 sps:$4 sm:$0xff]   ;;  %v7493_v11 = vld [vmem:[#allocation8 + $0x12c] ss:$16 sps:$4 sm:$0xff]   ;;  %v8387_v27 = vmov 1966171168  }
  0x8d   :  { %258 = vmatprep.subr.bf16.mxu0 %v7402_v22  ;;  %729 = vmatprep.subr.bf16.mxu1 %v7441_v33  ;;  %v7491_v12 = vld [vmem:[#allocation8 + $0x128] ss:$16 sps:$4 sm:$0xff]   ;;  %v7499_v15 = vld [vmem:[#allocation8 + $0x10c] ss:$16 sps:$4 sm:$0xff]   ;;  %v298_v28 = vunpack.c.l.s4 %v8387_v27  ;;  %s6466_s8 = sshll.u32 %s8388_s6, 4  ;;  %s6467_s8 = int_to_ptr.vmem [resolvable:$true] %s6466_s8 }
  0x8e   :  { %v7497_v16 = vld [vmem:[#allocation8 + $0x108] ss:$16 sps:$4 sm:$0xff]   ;;  %s8337_s12 = scalar_lea.vmem %s6467_s8, 448  ;;  %p8342_p4 = scmp.lt.s32.totalorder %s6467_s8, %s6467_s8 }
  0x8f   :  { %v929_v18 = vld [vmem:[#allocation11 + $0x1c0] sm:$0xff]  ;;  %p8338_p3 = scmp.ne.s32.totalorder %s6467_s8, %s8337_s12  ;;  %p8343_p5 = scmp.lt.s32.totalorder %s8337_s12, %s8337_s12 }
  0x90   :  { %259 = vmatpush1.bf16.msra.mxu0 %v7404_v25  ;;  %730 = vmatpush1.bf16.msra.mxu1 %v7446_v36  ;;  %v933_v19 = vld [vmem:[#allocation11 + $0x1e0] sm:$0xff] }
  0x91   :  { %758 = vmatprep.subr.bf16.mxu0 %v7409_v26  ;;  %731 = vmatprep.subr.bf16.mxu1 %v7447_v37  ;;  %v1057_v20 = vld [vmem:[#allocation11 + $0x5c0] sm:$0xff]  ;;  %v6617_v21 = vcombine.low %v929_v18, %v933_v19  ;;  %v6618_v22 = vcombine.high %v929_v18, %v933_v19  ;;  %v300_v26 = vlaneseq  ;;  %p8344_p6 = por %p8343_p5, %p8342_p4 }
  0x92   :  { %v1061_v23 = vld [vmem:[#allocation11 + $0x5e0] sm:$0xff] }
  0x93   :  { %277 = vmatmul.mubr.bf16.vlgmr.msra.gmra.mxu0 %v147_v29  ;;  %v6745_v24 = vcombine.low %v1057_v20, %v1061_v23  ;;  %v6746_v25 = vcombine.high %v1057_v20, %v1061_v23  ;;  %v8466_v29 = vshrl.u32 %v300_v26, 7  ;;  %v889_v19 = vld [vmem:[#allocation11 + $0x80] sm:$0xff]  ;;  %p8345_p7 = pnand %p8344_p6, %p8338_p3 }
  0x94   :  { %759 = vmatpush1.bf16.msra.mxu0 %v7407_v30  ;;  %732 = vmatpush1.bf16.msra.mxu1 %v7452_v40  ;;  %v299_v30 = vunpack.c.0.s8 %v298_v28  ;;  %v893_v20 = vld [vmem:[#allocation11 + $0xa0] sm:$0xff] }
  0x95   :  { %760 = vmatprep.subr.bf16.mxu0 %v7415_v31  ;;  %733 = vmatprep.subr.bf16.mxu1 %v7453_v41  ;;  %v6495_v31 = vld.sshfl [vmem:[#allocation7] sm:$0x11 pattern:$0x75316420]  ;;  %v8474_v36 = vsub.s32 0, %v8466_v29  ;;  %v881_v27 = vld [vmem:[#allocation11 + $0x40] sm:$0xff] }
  0x96   :  { %v8469_v32 = vsub.s32 %v299_v30, %v8466_v29  ;;  %v296_v33 = vcombine.high %v6495_v31, %v6495_v31  ;;  %v885_v28 = vld [vmem:[#allocation11 + $0x60] sm:$0xff] }
  0x97   :  { %v1009_v30 = vld [vmem:[#allocation11 + $0x440] sm:$0xff] }
  0x98   :  { %761 = vmatpush1.bf16.msra.mxu0 %v7413_v34  ;;  %734 = vmatpush2.bf16.msra.mxu1 %v7458_v44  ;;  %v303_v34 = vrot.slane %v6495_v31, %v8469_v32  ;;  %v1013_v31 = vld [vmem:[#allocation11 + $0x460] sm:$0xff] }
  0x99   :  { %762 = vmatprep.subr.bf16.mxu0 %v7421_v35  ;;  %735 = vmatprep.subr.bf16.mxu1 %v7459_v45  ;;  %v310_v35 = vrot.slane %v296_v33, %v8469_v32  ;;  %v6577_v33 = vcombine.low %v889_v19, %v893_v20 }
  0x9a   :  { %v312_v37 = vpack.i.b16 %v303_v34, %v303_v34 }
  0x9c   :  { %763 = vmatpush1.bf16.msra.mxu0 %v7419_v38  ;;  %736 = vmatpush2.bf16.msra.mxu1 %v7464_v48  ;;  %v319_v38 = vpack.i.b16 %v310_v35, %v310_v35  ;;  %v925_v48 = vld [vmem:[#allocation11 + $0x1a0] sm:$0xff]  ;;  %v6570_v35 = vcombine.high %v881_v27, %v885_v28 }
  0x9d   :  { %764 = vmatprep.subr.bf16.mxu0 %v7427_v39  ;;  %737 = vmatprep.subr.bf16.mxu1 %v7465_v49  ;;  %v317_v39 = vrot.slane %v312_v37, %v8474_v36  ;;  %v6698_v37 = vcombine.high %v1009_v30, %v1013_v31 }
  0xa0   :  { %765 = vmatpush1.bf16.msra.mxu0 %v7425_v42  ;;  %738 = vmatpush2.bf16.msra.mxu1 %v7470_v51  ;;  %v324_v42 = vrot.slane %v319_v38, %v8474_v36  ;;  %v1049_v51 = vld [vmem:[#allocation11 + $0x580] sm:$0xff] }
  0xa1   :  { %766 = vmatprep.subr.bf16.mxu0 %v7433_v43  ;;  %739 = vmatprep.subr.bf16.mxu1 %v7471_v53  ;;  %v873_v38 = vld [vmem:[#allocation11] sm:$0xff] }
  0xa4   :  { %767 = vmatpush1.bf16.msra.mxu0 %v7431_v46  ;;  %740 = vmatpush2.bf16.msra.mxu1 %v7476_v55  ;;  %v913_v55 = vld [vmem:[#allocation11 + $0x140] sm:$0xff] }
  0xa5   :  { %768 = vmatprep.subr.bf16.mxu0 %v7439_v47  ;;  %741 = vmatprep.subr.bf16.mxu1 %v7477_v57  ;;  %v921_v47 = vld [vmem:[#allocation11 + $0x180] sm:$0xff] }
  0xa6   :  { %v1041_v57 = vld [vmem:[#allocation11 + $0x540] sm:$0xff] }
  0xa8   :  { %769 = vmatpush1.bf16.msra.mxu0 %v7437_v50  ;;  %742 = vmatpush2.bf16.msra.mxu1 %v7482_v59 }
  0xa9   :  { %770 = vmatprep.subr.bf16.mxu0 %v7445_v52  ;;  %743 = vmatprep.subr.bf16.mxu1 %v7483_v61  ;;  %v1053_v52 = vld [vmem:[#allocation11 + $0x5a0] sm:$0xff] }
  0xaa   :  { %v6738_v61 = vcombine.high %v1049_v51, %v1053_v52 }
  0xac   :  { %771 = vmatpush1.bf16.msra.mxu0 %v7443_v54  ;;  %744 = vmatpush2.bf16.msra.mxu1 %v7488_v9  ;;  %v897_v9 = vld [vmem:[#allocation11 + $0xc0] sm:$0xff] }
  0xad   :  { %772 = vmatprep.subr.bf16.mxu0 %v7451_v56  ;;  %745 = vmatprep.subr.bf16.mxu1 %v7489_v10  ;;  %v917_v56 = vld [vmem:[#allocation11 + $0x160] sm:$0xff] }
  0xae   :  { %v901_v10 = vld [vmem:[#allocation11 + $0xe0] sm:$0xff] }
  0xaf   :  { %v6585_v23 = vcombine.low %v897_v9, %v901_v10 }
  0xb0   :  { %773 = vmatpush1.bf16.msra.mxu0 %v7449_v58  ;;  %746 = vmatpush2.bf16.msra.mxu1 %v7494_v13  ;;  %v1045_v58 = vld [vmem:[#allocation11 + $0x560] sm:$0xff] }
  0xb1   :  { %774 = vmatprep.subr.bf16.mxu0 %v7457_v60  ;;  %747 = vmatprep.subr.bf16.mxu1 %v7495_v14  ;;  %v6610_v60 = vcombine.high %v921_v47, %v925_v48  ;;  %v1029_v14 = vld [vmem:[#allocation11 + $0x4e0] sm:$0xff] }
  0xb4   :  { %775 = vmatpush2.bf16.msra.mxu0 %v7455_v62  ;;  %748 = vmatpush2.bf16.msra.mxu1 %v7500_v17  ;;  %v6586_v17 = vcombine.high %v897_v9, %v901_v10  ;;  %v1101_v9 = vld [vmem:[#allocation11 + $0x720] sm:$0xff] }
  0xb5   :  { %776 = vmatprep.subr.bf16.mxu0 %v7463_v63  ;;  %2409 = vmatprep.subr.bf16.mxu1 %v6618_v22  ;;  %v6609_v63 = vcombine.low %v921_v47, %v925_v48  ;;  %v1021_v22 = vld [vmem:[#allocation11 + $0x4a0] sm:$0xff] }
  0xb6   :  { %v997_v47 = vld [vmem:[#allocation11 + $0x3e0] sm:$0xff] }
  0xb7   :  { %v1121_v48 = vld [vmem:[#allocation11 + $0x7c0] sm:$0xff] }
  0xb8   :  { %777 = vmatpush2.bf16.msra.mxu0 %v7461_v0  ;;  %v6737_v0 = vcombine.low %v1049_v51, %v1053_v52 }
  0xb9   :  { %778 = vmatprep.subr.bf16.mxu0 %v7469_v1  ;;  %v905_v1 = vld [vmem:[#allocation11 + $0x100] sm:$0xff] }
  0xbc   :  { %779 = vmatpush2.bf16.msra.mxu0 %v7467_v2  ;;  %v909_v2 = vld [vmem:[#allocation11 + $0x120] sm:$0xff] }
  0xbd   :  { %780 = vmatprep.subr.bf16.mxu0 %v7475_v3  ;;  %v1033_v3 = vld [vmem:[#allocation11 + $0x500] sm:$0xff] }
  0xc0   :  { %781 = vmatpush2.bf16.msra.mxu0 %v7473_v4  ;;  %v1037_v4 = vld [vmem:[#allocation11 + $0x520] sm:$0xff] }
  0xc1   :  { %782 = vmatprep.subr.bf16.mxu0 %v7481_v5  ;;  %v6602_v5 = vcombine.high %v913_v55, %v917_v56  ;;  %v6722_v13 = vcombine.high %v1033_v3, %v1037_v4 }
  0xc4   :  { %783 = vmatpush2.bf16.msra.mxu0 %v7479_v6  ;;  %v6730_v6 = vcombine.high %v1041_v57, %v1045_v58 }
  0xc5   :  { %784 = vmatprep.subr.bf16.mxu0 %v7487_v7  ;;  %v6601_v7 = vcombine.low %v913_v55, %v917_v56  ;;  %v989_v55 = vld [vmem:[#allocation11 + $0x3a0] sm:$0xff] }
  0xc6   :  { %v1113_v56 = vld [vmem:[#allocation11 + $0x780] sm:$0xff] }
  0xc8   :  { %785 = vmatpush2.bf16.msra.mxu0 %v7485_v8  ;;  %v6729_v8 = vcombine.low %v1041_v57, %v1045_v58  ;;  %v1117_v57 = vld [vmem:[#allocation11 + $0x7a0] sm:$0xff] }
  0xc9   :  { %786 = vmatprep.subr.bf16.mxu0 %v7493_v11  ;;  %v1025_v11 = vld [vmem:[#allocation11 + $0x4c0] sm:$0xff] }
  0xca   :  { %v6714_v18 = vcombine.high %v1025_v11, %v1029_v14 }
  0xcc   :  { %787 = vmatpush2.bf16.msra.mxu0 %v7491_v12  ;;  %v6594_v12 = vcombine.high %v905_v1, %v909_v2 }
  0xcd   :  { %788 = vmatprep.subr.bf16.mxu0 %v7499_v15  ;;  %v6593_v15 = vcombine.low %v905_v1, %v909_v2  ;;  %v1109_v1 = vld [vmem:[#allocation11 + $0x760] sm:$0xff] }
  0xd0   :  { %789 = vmatpush2.bf16.msra.mxu0 %v7497_v16  ;;  %v6721_v16 = vcombine.low %v1033_v3, %v1037_v4  ;;  %v6801_v3 = vcombine.low %v1113_v56, %v1117_v57 }
  0xd1   :  { %2450 = vmatprep.subr.bf16.mxu0 %v6746_v25  ;;  %v6578_v25 = vcombine.high %v889_v19, %v893_v20 }
 0x153   :  { %v278_v40 = vpop.f32.mrf.mxu0 }
 0x154   :  { %v285_v41 = vpack.c.bf16 %v278_v40, %v278_v40  ;;  %v1001_v40 = vld [vmem:[#allocation11 + $0x400] sm:$0xff] }
 0x155   :  { %v280_v43 = vpop.f32.mrf.mxu0 }
 0x156   :  { %v325_v44 = vadd.bf16 %v317_v39, %v285_v41  ;;  %v286_v45 = vpack.c.bf16 %v280_v43, %v280_v43  ;;  %v877_v39 = vld [vmem:[#allocation11 + $0x20] sm:$0xff]  ;;  %v6697_v43 = vcombine.low %v1009_v30, %v1013_v31 }
 0x157   :  { %v282_v46 = vpop.f32.mrf.mxu0  ;;  %v1005_v41 = vld [vmem:[#allocation11 + $0x420] sm:$0xff] }
 0x158   :  { %v326_v49 = vadd.bf16 %v324_v42, %v286_v45  ;;  %v329_v50 = vmul.bf16 1045249613, %v325_v44  ;;  %vm327_vm1 = vcmp.gt.bf16.partialorder %v325_v44, 0  ;;  %v6569_v42 = vcombine.low %v881_v27, %v885_v28  ;;  %v993_v46 = vld [vmem:[#allocation11 + $0x3c0] sm:$0xff] }
 0x159   :  { %v283_v53 = vpop.f32.mrf.mxu0  ;;  %v6690_v45 = vcombine.high %v1001_v40, %v1005_v41  ;;  %v6689_v51 = vcombine.low %v1001_v40, %v1005_v41  ;;  %v6682_v52 = vcombine.high %v993_v46, %v997_v47  ;;  %v6681_v58 = vcombine.low %v993_v46, %v997_v47  ;;  %v1069_v47 = vld [vmem:[#allocation11 + $0x620] sm:$0xff] }
 0x15a   :  { %vm328_vm0 = vcmp.gt.bf16.partialorder %v326_v49, 0  ;;  %v330_v54 = vmul.bf16 1045249613, %v326_v49  ;;  %v331_v62 = vsel %vm327_vm1, %v325_v44, %v329_v50  ;;  %v6562_v44 = vcombine.high %v873_v38, %v877_v39 }
 0x15b   :  { %v6561_v50 = vcombine.low %v873_v38, %v877_v39  ;;  %v1077_v39 = vld [vmem:[#allocation11 + $0x660] sm:$0xff] }
 0x15c   :  { %v332_v59 = vsel %vm328_vm0, %v326_v49, %v330_v54  ;;  %v1125_v49 = vld [vmem:[#allocation11 + $0x7e0] sm:$0xff] }
 0x15d   :  { %749 = vmatprep.mubr.bf16.mxu1 %v332_v59  ;;  %790 = vmatprep.mubr.bf16.mxu0 %v332_v59  ;;  %v6810_v53 = vcombine.high %v1121_v48, %v1125_v49  ;;  %v985_v54 = vld [vmem:[#allocation11 + $0x380] sm:$0xff]  ;;  %v6809_v59 = vcombine.low %v1121_v48, %v1125_v49 }
 0x15e   :  { %750 = vmatmul.mubr.bf16.vlgmr.msra.gmra.mxu1 %v331_v62  ;;  %791 = vmatmul.mubr.bf16.vlgmr.msra.gmra.mxu0 %v331_v62  ;;  %v977_v62 = vld [vmem:[#allocation11 + $0x340] sm:$0xff]  ;;  %v6673_v2 = vcombine.low %v985_v54, %v989_v55 }
 0x15f   :  { %2410 = vmatpush1.bf16.msra.mxu1 %v6617_v21  ;;  %2451 = vmatpush1.bf16.msra.mxu0 %v6745_v24  ;;  %v1017_v21 = vld [vmem:[#allocation11 + $0x480] sm:$0xff]  ;;  %v6713_v24 = vcombine.low %v1025_v11, %v1029_v14 }
 0x160   :  { %2411 = vmatprep.subr.bf16.mxu1 %v6610_v60  ;;  %2452 = vmatprep.subr.bf16.mxu0 %v6738_v61  ;;  %v6706_v26 = vcombine.high %v1017_v21, %v1021_v22  ;;  %v6705_v34 = vcombine.low %v1017_v21, %v1021_v22  ;;  %v6674_v60 = vcombine.high %v985_v54, %v989_v55  ;;  %v961_v14 = vld [vmem:[#allocation11 + $0x2c0] sm:$0xff]  ;;  %v8486_v55 = vld [vmem:[#allocation11 + $0x5e8] sm:$0xff] }
 0x161   :  { %v6802_v61 = vcombine.high %v1113_v56, %v1117_v57  ;;  %v953_v22 = vld [vmem:[#allocation11 + $0x280] sm:$0xff] }
 0x163   :  { %2412 = vmatpush1.bf16.msra.mxu1 %v6609_v63  ;;  %2453 = vmatpush1.bf16.msra.mxu0 %v6737_v0  ;;  %v981_v63 = vld [vmem:[#allocation11 + $0x360] sm:$0xff] }
 0x164   :  { %2413 = vmatprep.subr.bf16.mxu1 %v6602_v5  ;;  %2454 = vmatprep.subr.bf16.mxu0 %v6730_v6  ;;  %v1105_v0 = vld [vmem:[#allocation11 + $0x740] sm:$0xff]  ;;  %v6666_v4 = vcombine.high %v977_v62, %v981_v63  ;;  %v6665_v10 = vcombine.low %v977_v62, %v981_v63 }
 0x165   :  { %v6794_v5 = vcombine.high %v1105_v0, %v1109_v1  ;;  %v969_v6 = vld [vmem:[#allocation11 + $0x300] sm:$0xff]  ;;  %v6793_v11 = vcombine.low %v1105_v0, %v1109_v1 }
 0x167   :  { %2414 = vmatpush1.bf16.msra.mxu1 %v6601_v7  ;;  %2455 = vmatpush1.bf16.msra.mxu0 %v6729_v8  ;;  %v973_v7 = vld [vmem:[#allocation11 + $0x320] sm:$0xff] }
 0x168   :  { %2415 = vmatprep.subr.bf16.mxu1 %v6594_v12  ;;  %2456 = vmatprep.subr.bf16.mxu0 %v6722_v13  ;;  %v1097_v8 = vld [vmem:[#allocation11 + $0x700] sm:$0xff]  ;;  %v6658_v12 = vcombine.high %v969_v6, %v973_v7 }
 0x169   :  { %v6786_v13 = vcombine.high %v1097_v8, %v1101_v9  ;;  %v6785_v19 = vcombine.low %v1097_v8, %v1101_v9 }
 0x16b   :  { %2416 = vmatpush1.bf16.msra.mxu1 %v6593_v15  ;;  %2457 = vmatpush1.bf16.msra.mxu0 %v6721_v16  ;;  %v965_v15 = vld [vmem:[#allocation11 + $0x2e0] sm:$0xff] }
 0x16c   :  { %2417 = vmatprep.subr.bf16.mxu1 %v6586_v17  ;;  %2458 = vmatprep.subr.bf16.mxu0 %v6714_v18  ;;  %v1089_v16 = vld [vmem:[#allocation11 + $0x6c0] sm:$0xff]  ;;  %v6657_v18 = vcombine.low %v969_v6, %v973_v7  ;;  %v6650_v20 = vcombine.high %v961_v14, %v965_v15 }
 0x16d   :  { %v1093_v17 = vld [vmem:[#allocation11 + $0x6e0] sm:$0xff] }
 0x16e   :  { %v6778_v21 = vcombine.high %v1089_v16, %v1093_v17  ;;  %v6777_v27 = vcombine.low %v1089_v16, %v1093_v17 }
 0x16f   :  { %2418 = vmatpush1.bf16.msra.mxu1 %v6585_v23  ;;  %2459 = vmatpush1.bf16.msra.mxu0 %v6713_v24  ;;  %v957_v23 = vld [vmem:[#allocation11 + $0x2a0] sm:$0xff] }
 0x170   :  { %2419 = vmatprep.subr.bf16.mxu1 %v6578_v25  ;;  %2460 = vmatprep.subr.bf16.mxu0 %v6706_v26  ;;  %v1081_v24 = vld [vmem:[#allocation11 + $0x680] sm:$0xff]  ;;  %v6649_v26 = vcombine.low %v961_v14, %v965_v15  ;;  %v6642_v28 = vcombine.high %v953_v22, %v957_v23  ;;  %v6641_v31 = vcombine.low %v953_v22, %v957_v23 }
 0x171   :  { %v1085_v25 = vld [vmem:[#allocation11 + $0x6a0] sm:$0xff] }
 0x172   :  { %v6770_v30 = vcombine.high %v1081_v24, %v1085_v25 }
 0x173   :  { %2420 = vmatpush1.bf16.msra.mxu1 %v6577_v33  ;;  %2461 = vmatpush1.bf16.msra.mxu0 %v6705_v34  ;;  %v6769_v33 = vcombine.low %v1081_v24, %v1085_v25  ;;  %v945_v34 = vld [vmem:[#allocation11 + $0x240] sm:$0xff]  ;;  %v926_v24 = vld [vmem:[#allocation11 + $0x1a8] sm:$0xff] }
 0x174   :  { %2421 = vmatprep.subr.bf16.mxu1 %v6570_v35  ;;  %2462 = vmatprep.subr.bf16.mxu0 %v6698_v37  ;;  %v949_v35 = vld [vmem:[#allocation11 + $0x260] sm:$0xff]  ;;  %v1050_v25 = vld [vmem:[#allocation11 + $0x588] sm:$0xff] }
 0x175   :  { %v1073_v37 = vld [vmem:[#allocation11 + $0x640] sm:$0xff]  ;;  %v6634_v38 = vcombine.high %v945_v34, %v949_v35  ;;  %v6633_v40 = vcombine.low %v945_v34, %v949_v35 }
 0x176   :  { %v6761_v41 = vcombine.low %v1073_v37, %v1077_v39 }
 0x177   :  { %2422 = vmatpush1.bf16.msra.mxu1 %v6569_v42  ;;  %2463 = vmatpush1.bf16.msra.mxu0 %v6697_v43  ;;  %v6762_v42 = vcombine.high %v1073_v37, %v1077_v39  ;;  %v937_v43 = vld [vmem:[#allocation11 + $0x200] sm:$0xff]  ;;  %v914_v39 = vld [vmem:[#allocation11 + $0x148] sm:$0xff] }
 0x178   :  { %2423 = vmatprep.subr.bf16.mxu1 %v6562_v44  ;;  %2464 = vmatprep.subr.bf16.mxu0 %v6690_v45  ;;  %v941_v44 = vld [vmem:[#allocation11 + $0x220] sm:$0xff] }
 0x179   :  { %v1065_v45 = vld [vmem:[#allocation11 + $0x600] sm:$0xff]  ;;  %v6626_v46 = vcombine.high %v937_v43, %v941_v44  ;;  %v6625_v48 = vcombine.low %v937_v43, %v941_v44  ;;  %v918_v43 = vld [vmem:[#allocation11 + $0x168] sm:$0xff] }
 0x17a   :  { %v6753_v49 = vcombine.low %v1065_v45, %v1069_v47  ;;  %v1042_v44 = vld [vmem:[#allocation11 + $0x548] sm:$0xff] }
 0x17b   :  { %2424 = vmatpush1.bf16.msra.mxu1 %v6561_v50  ;;  %2465 = vmatpush1.bf16.msra.mxu0 %v6689_v51  ;;  %v6754_v50 = vcombine.high %v1065_v45, %v1069_v47  ;;  %v8478_v51 = vld [vmem:[#allocation11 + $0x1c8] sm:$0xff] }
 0x17c   :  { %2425 = vmatprep.subr.bf16.mxu1 %v6682_v52  ;;  %2466 = vmatprep.subr.bf16.mxu0 %v6810_v53  ;;  %v8480_v52 = vld [vmem:[#allocation11 + $0x1e8] sm:$0xff] }
 0x17d   :  { %v8482_v53 = vld [vmem:[#allocation11 + $0x5c8] sm:$0xff]  ;;  %v6620_v54 = vcombine.high %v8478_v51, %v8480_v52  ;;  %v6619_v56 = vcombine.low %v8478_v51, %v8480_v52 }
 0x17e   :  { %v6747_v57 = vcombine.low %v8482_v53, %v8486_v55  ;;  %v1046_v45 = vld [vmem:[#allocation11 + $0x568] sm:$0xff] }
 0x17f   :  { %2426 = vmatpush2.bf16.msra.mxu1 %v6681_v58  ;;  %2467 = vmatpush2.bf16.msra.mxu0 %v6809_v59  ;;  %v6748_v58 = vcombine.high %v8482_v53, %v8486_v55  ;;  %v6560_v59 = vld.sshfl [vmem:[#allocation10] sm:$0x33 pattern:$0x75316420]  ;;  %v910_v51 = vld [vmem:[#allocation11 + $0x128] sm:$0xff]  ;;  %v6731_v55 = vcombine.low %v1042_v44, %v1046_v45 }
 0x180   :  { %2427 = vmatprep.subr.bf16.mxu1 %v6674_v60  ;;  %2468 = vmatprep.subr.bf16.mxu0 %v6802_v61  ;;  %v812_v60 = vcombine.high %v6560_v59, %v6560_v59  ;;  %v819_v61 = vrot.slane %v6560_v59, %v8469_v32  ;;  %v1034_v52 = vld [vmem:[#allocation11 + $0x508] sm:$0xff] }
 0x181   :  { %v1038_v53 = vld [vmem:[#allocation11 + $0x528] sm:$0xff] }
 0x182   :  { %v826_v62 = vrot.slane %v812_v60, %v8469_v32  ;;  %v827_v63 = vcombine.high %v819_v61, %v819_v61  ;;  %v830_v1 = vpack.i.b16 %v819_v61, %v819_v61  ;;  %v902_v59 = vld [vmem:[#allocation11 + $0xe8] sm:$0xff] }
 0x183   :  { %2428 = vmatpush2.bf16.msra.mxu1 %v6673_v2  ;;  %2469 = vmatpush2.bf16.msra.mxu0 %v6801_v3  ;;  %v1026_v60 = vld [vmem:[#allocation11 + $0x4c8] sm:$0xff] }
 0x184   :  { %2429 = vmatprep.subr.bf16.mxu1 %v6666_v4  ;;  %2470 = vmatprep.subr.bf16.mxu0 %v6794_v5  ;;  %v828_v0 = vcombine.high %v826_v62, %v826_v62  ;;  %v844_v2 = vpack.i.b16 %v827_v63, %v827_v63  ;;  %v837_v3 = vpack.i.b16 %v826_v62, %v826_v62  ;;  %v1030_v61 = vld [vmem:[#allocation11 + $0x4e8] sm:$0xff] }
 0x185   :  { %v835_v5 = vrot.slane %v830_v1, %v8474_v36  ;;  %v6723_v63 = vcombine.low %v1034_v52, %v1038_v53  ;;  %v6716_v1 = vcombine.high %v1026_v60, %v1030_v61 }
 0x186   :  { %v851_v4 = vpack.i.b16 %v828_v0, %v828_v0  ;;  %v849_v6 = vrot.slane %v844_v2, %v8474_v36  ;;  %v890_v2 = vld [vmem:[#allocation11 + $0x88] sm:$0xff] }
 0x187   :  { %2430 = vmatpush2.bf16.msra.mxu1 %v6665_v10  ;;  %2471 = vmatpush2.bf16.msra.mxu0 %v6793_v11  ;;  %v842_v11 = vrot.slane %v837_v3, %v8474_v36  ;;  %v894_v3 = vld [vmem:[#allocation11 + $0xa8] sm:$0xff] }
 0x188   :  { %2431 = vmatprep.subr.bf16.mxu1 %v6658_v12  ;;  %2472 = vmatprep.subr.bf16.mxu0 %v6786_v13  ;;  %v856_v12 = vrot.slane %v851_v4, %v8474_v36  ;;  %v1018_v4 = vld [vmem:[#allocation11 + $0x488] sm:$0xff] }
 0x18b   :  { %2432 = vmatpush2.bf16.msra.mxu1 %v6657_v18  ;;  %2473 = vmatpush2.bf16.msra.mxu0 %v6785_v19 }
 0x18c   :  { %2433 = vmatprep.subr.bf16.mxu1 %v6650_v20  ;;  %2474 = vmatprep.subr.bf16.mxu0 %v6778_v21  ;;  %v922_v21 = vld [vmem:[#allocation11 + $0x188] sm:$0xff] }
 0x18f   :  { %2434 = vmatpush2.bf16.msra.mxu1 %v6649_v26  ;;  %2475 = vmatpush2.bf16.msra.mxu0 %v6777_v27  ;;  %v1054_v26 = vld [vmem:[#allocation11 + $0x5a8] sm:$0xff] }
 0x190   :  { %2435 = vmatprep.subr.bf16.mxu1 %v6642_v28  ;;  %2476 = vmatprep.subr.bf16.mxu0 %v6770_v30  ;;  %v6739_v47 = vcombine.low %v1050_v25, %v1054_v26 }
 0x193   :  { %2436 = vmatpush2.bf16.msra.mxu1 %v6641_v31  ;;  %2477 = vmatpush2.bf16.msra.mxu0 %v6769_v33 }
 0x194   :  { %2437 = vmatprep.subr.bf16.mxu1 %v6634_v38  ;;  %2478 = vmatprep.subr.bf16.mxu0 %v6762_v42  ;;  %v6612_v38 = vcombine.high %v922_v21, %v926_v24  ;;  %v6740_v42 = vcombine.high %v1050_v25, %v1054_v26  ;;  %v994_v26 = vld [vmem:[#allocation11 + $0x3c8] sm:$0xff] }
 0x197   :  { %2438 = vmatpush2.bf16.msra.mxu1 %v6633_v40  ;;  %2479 = vmatpush2.bf16.msra.mxu0 %v6761_v41 }
 0x198   :  { %2439 = vmatprep.subr.bf16.mxu1 %v6626_v46  ;;  %2480 = vmatprep.subr.bf16.mxu0 %v6754_v50  ;;  %v6611_v46 = vcombine.low %v922_v21, %v926_v24  ;;  %v906_v50 = vld [vmem:[#allocation11 + $0x108] sm:$0xff] }
 0x199   :  { %v6595_v62 = vcombine.low %v906_v50, %v910_v51  ;;  %v1006_v21 = vld [vmem:[#allocation11 + $0x428] sm:$0xff] }
 0x19b   :  { %2440 = vmatpush2.bf16.msra.mxu1 %v6625_v48  ;;  %2481 = vmatpush2.bf16.msra.mxu0 %v6753_v49  ;;  %v6604_v48 = vcombine.high %v914_v39, %v918_v43  ;;  %v6732_v49 = vcombine.high %v1042_v44, %v1046_v45  ;;  %v1118_v44 = vld [vmem:[#allocation11 + $0x7a8] sm:$0xff] }
 0x19c   :  { %2491 = vmatprep.subr.bf16.mxu1 %v6620_v54  ;;  %2532 = vmatprep.subr.bf16.mxu0 %v6748_v58  ;;  %v6603_v54 = vcombine.low %v914_v39, %v918_v43  ;;  %v898_v58 = vld [vmem:[#allocation11 + $0xc8] sm:$0xff] }
 0x19d   :  { %v6588_v0 = vcombine.high %v898_v58, %v902_v59  ;;  %v986_v39 = vld [vmem:[#allocation11 + $0x388] sm:$0xff] }
 0x19e   :  { %v1114_v43 = vld [vmem:[#allocation11 + $0x788] sm:$0xff] }
 0x21e   :  { %v751_v7 = vpop.f32.mrf.mxu1  ;;  %v792_v8 = vpop.f32.mrf.mxu0 }
 0x21f   :  { %v799_v9 = vpack.c.bf16 %v751_v7, %v751_v7  ;;  %v801_v10 = vpack.c.bf16 %v792_v8, %v792_v8  ;;  %v6715_v7 = vcombine.low %v1026_v60, %v1030_v61  ;;  %v6580_v8 = vcombine.high %v890_v2, %v894_v3  ;;  %v1102_v60 = vld [vmem:[#allocation11 + $0x728] sm:$0xff] }
 0x220   :  { %v753_v13 = vpop.f32.mrf.mxu1  ;;  %v794_v14 = vpop.f32.mrf.mxu0 }
 0x221   :  { %v857_v15 = vadd.bf16 %v835_v5, %v799_v9  ;;  %v859_v16 = vadd.bf16 %v849_v6, %v801_v10  ;;  %v800_v17 = vpack.c.bf16 %v753_v13, %v753_v13  ;;  %v802_v18 = vpack.c.bf16 %v794_v14, %v794_v14  ;;  %v1022_v5 = vld [vmem:[#allocation11 + $0x4a8] sm:$0xff] }
 0x222   :  { %v755_v19 = vpop.f32.mrf.mxu1  ;;  %v796_v20 = vpop.f32.mrf.mxu0  ;;  %v6587_v6 = vcombine.low %v898_v58, %v902_v59  ;;  %v6708_v9 = vcombine.high %v1018_v4, %v1022_v5  ;;  %v882_v10 = vld [vmem:[#allocation11 + $0x48] sm:$0xff]  ;;  %v6579_v14 = vcombine.low %v890_v2, %v894_v3 }
 0x223   :  { %v858_v22 = vadd.bf16 %v842_v11, %v800_v17  ;;  %v860_v23 = vadd.bf16 %v856_v12, %v802_v18  ;;  %v865_v27 = vmul.bf16 1045249613, %v857_v15  ;;  %v867_v28 = vmul.bf16 1045249613, %v859_v16  ;;  %v886_v11 = vld [vmem:[#allocation11 + $0x68] sm:$0xff] }
 0x224   :  { %v756_v30 = vpop.f32.mrf.mxu1  ;;  %v797_v31 = vpop.f32.mrf.mxu0  ;;  %vm861_vm2 = vcmp.gt.bf16.partialorder %v857_v15, 0  ;;  %vm863_vm3 = vcmp.gt.bf16.partialorder %v859_v16, 0  ;;  %v1010_v12 = vld [vmem:[#allocation11 + $0x448] sm:$0xff] }
 0x225   :  { %v866_v33 = vmul.bf16 1045249613, %v858_v22  ;;  %v868_v34 = vmul.bf16 1045249613, %v860_v23  ;;  %vm862_vm4 = vcmp.gt.bf16.partialorder %v858_v22, 0  ;;  %vm864_vm5 = vcmp.gt.bf16.partialorder %v860_v23, 0 }
 0x226   :  { %v8506_v40 = vsel %vm861_vm2, %v857_v15, %v865_v27  ;;  %v8508_v41 = vsel %vm863_vm3, %v859_v16, %v867_v28  ;;  %v1014_v13 = vld [vmem:[#allocation11 + $0x468] sm:$0xff]  ;;  %v6707_v15 = vcombine.low %v1018_v4, %v1022_v5  ;;  %v6572_v16 = vcombine.high %v882_v10, %v886_v11 }
 0x227   :  { %v8500_v35 = vsel %vm862_vm4, %v858_v22, %v866_v33  ;;  %v8502_v37 = vsel %vm864_vm5, %v860_v23, %v868_v34  ;;  %v6700_v17 = vcombine.high %v1010_v12, %v1014_v13  ;;  %v874_v18 = vld [vmem:[#allocation11 + $0x8] sm:$0xff]  ;;  %v6571_v22 = vcombine.low %v882_v10, %v886_v11 }
 0x228   :  { %2441 = vmatprep.mubr.bf16.mxu1 %v8500_v35  ;;  %2482 = vmatprep.mubr.bf16.mxu0 %v8502_v37  ;;  %v878_v19 = vld [vmem:[#allocation11 + $0x28] sm:$0xff]  ;;  %v6699_v23 = vcombine.low %v1010_v12, %v1014_v13 }
 0x229   :  { %2442 = vmatmul.mubr.bf16.vlgmr.msra.gmra.mxu1 %v8506_v40  ;;  %2483 = vmatmul.mubr.bf16.vlgmr.msra.gmra.mxu0 %v8508_v41  ;;  %v1002_v20 = vld [vmem:[#allocation11 + $0x408] sm:$0xff]  ;;  %v6564_v24 = vcombine.high %v874_v18, %v878_v19  ;;  %v6563_v31 = vcombine.low %v874_v18, %v878_v19 }
 0x22a   :  { %2492 = vmatpush1.bf16.msra.mxu1 %v6619_v56  ;;  %2533 = vmatpush1.bf16.msra.mxu0 %v6747_v57  ;;  %v6596_v56 = vcombine.high %v906_v50, %v910_v51  ;;  %v6724_v57 = vcombine.high %v1034_v52, %v1038_v53  ;;  %v6692_v25 = vcombine.high %v1002_v20, %v1006_v21  ;;  %v998_v27 = vld [vmem:[#allocation11 + $0x3e8] sm:$0xff] }
 0x22b   :  { %2523 = vmatprep.mubr.bf16.mxu1 %v8500_v35  ;;  %2564 = vmatprep.mubr.bf16.mxu0 %v8502_v37  ;;  %v1122_v28 = vld [vmem:[#allocation11 + $0x7c8] sm:$0xff]  ;;  %v6691_v33 = vcombine.low %v1002_v20, %v1006_v21  ;;  %v6684_v34 = vcombine.high %v994_v26, %v998_v27  ;;  %v6683_v45 = vcombine.low %v994_v26, %v998_v27 }
 0x22c   :  { %2493 = vmatprep.subr.bf16.mxu1 %v6612_v38  ;;  %2534 = vmatprep.subr.bf16.mxu0 %v6740_v42  ;;  %v1126_v30 = vld [vmem:[#allocation11 + $0x7e8] sm:$0xff] }
 0x22d   :  { %v6812_v38 = vcombine.high %v1122_v28, %v1126_v30  ;;  %v990_v42 = vld [vmem:[#allocation11 + $0x3a8] sm:$0xff] }
 0x22e   :  { %2494 = vmatpush1.bf16.msra.mxu1 %v6611_v46  ;;  %2535 = vmatpush1.bf16.msra.mxu0 %v6739_v47  ;;  %v6811_v46 = vcombine.low %v1122_v28, %v1126_v30  ;;  %v6676_v47 = vcombine.high %v986_v39, %v990_v42  ;;  %v982_v50 = vld [vmem:[#allocation11 + $0x368] sm:$0xff]  ;;  %v6675_v53 = vcombine.low %v986_v39, %v990_v42  ;;  %v935_v39 = vld [vmem:[#allocation11 + $0x1f0] sm:$0xff] }
 0x22f   :  { %2495 = vmatprep.subr.bf16.mxu1 %v6604_v48  ;;  %2536 = vmatprep.subr.bf16.mxu0 %v6732_v49  ;;  %v6804_v48 = vcombine.high %v1114_v43, %v1118_v44  ;;  %v978_v49 = vld [vmem:[#allocation11 + $0x348] sm:$0xff]  ;;  %v1059_v42 = vld [vmem:[#allocation11 + $0x5d0] sm:$0xff] }
 0x230   :  { %v1106_v51 = vld [vmem:[#allocation11 + $0x748] sm:$0xff]  ;;  %v6667_v61 = vcombine.low %v978_v49, %v982_v50 }
 0x231   :  { %v1110_v52 = vld [vmem:[#allocation11 + $0x768] sm:$0xff] }
 0x232   :  { %2496 = vmatpush1.bf16.msra.mxu1 %v6603_v54  ;;  %2537 = vmatpush1.bf16.msra.mxu0 %v6731_v55  ;;  %v6803_v54 = vcombine.low %v1114_v43, %v1118_v44  ;;  %v6668_v55 = vcombine.high %v978_v49, %v982_v50  ;;  %v974_v58 = vld [vmem:[#allocation11 + $0x328] sm:$0xff]  ;;  %v1063_v43 = vld [vmem:[#allocation11 + $0x5f0] sm:$0xff] }
 0x233   :  { %2497 = vmatprep.subr.bf16.mxu1 %v6596_v56  ;;  %2538 = vmatprep.subr.bf16.mxu0 %v6724_v57  ;;  %v6796_v56 = vcombine.high %v1106_v51, %v1110_v52  ;;  %v970_v57 = vld [vmem:[#allocation11 + $0x308] sm:$0xff]  ;;  %v927_v49 = vld [vmem:[#allocation11 + $0x1b0] sm:$0xff] }
 0x234   :  { %v1098_v59 = vld [vmem:[#allocation11 + $0x708] sm:$0xff]  ;;  %v6659_v5 = vcombine.low %v970_v57, %v974_v58  ;;  %v1051_v50 = vld [vmem:[#allocation11 + $0x590] sm:$0xff] }
 0x235   :  { %v966_v2 = vld [vmem:[#allocation11 + $0x2e8] sm:$0xff] }
 0x236   :  { %2498 = vmatpush1.bf16.msra.mxu1 %v6595_v62  ;;  %2539 = vmatpush1.bf16.msra.mxu0 %v6723_v63  ;;  %v6795_v62 = vcombine.low %v1106_v51, %v1110_v52  ;;  %v6660_v63 = vcombine.high %v970_v57, %v974_v58  ;;  %v1090_v3 = vld [vmem:[#allocation11 + $0x6c8] sm:$0xff]  ;;  %v1055_v51 = vld [vmem:[#allocation11 + $0x5b0] sm:$0xff] }
 0x237   :  { %2499 = vmatprep.subr.bf16.mxu1 %v6588_v0  ;;  %2540 = vmatprep.subr.bf16.mxu0 %v6716_v1  ;;  %v6788_v0 = vcombine.high %v1098_v59, %v1102_v60  ;;  %v962_v1 = vld [vmem:[#allocation11 + $0x2c8] sm:$0xff]  ;;  %v919_v57 = vld [vmem:[#allocation11 + $0x170] sm:$0xff] }
 0x238   :  { %v1094_v4 = vld [vmem:[#allocation11 + $0x6e8] sm:$0xff]  ;;  %v6651_v13 = vcombine.low %v962_v1, %v966_v2  ;;  %v1043_v58 = vld [vmem:[#allocation11 + $0x550] sm:$0xff] }
 0x239   :  { %v958_v10 = vld [vmem:[#allocation11 + $0x2a8] sm:$0xff] }
 0x23a   :  { %2500 = vmatpush1.bf16.msra.mxu1 %v6587_v6  ;;  %2541 = vmatpush1.bf16.msra.mxu0 %v6715_v7  ;;  %v6787_v6 = vcombine.low %v1098_v59, %v1102_v60  ;;  %v6652_v7 = vcombine.high %v962_v1, %v966_v2  ;;  %v1082_v11 = vld [vmem:[#allocation11 + $0x688] sm:$0xff]  ;;  %v1047_v59 = vld [vmem:[#allocation11 + $0x570] sm:$0xff] }
 0x23b   :  { %2501 = vmatprep.subr.bf16.mxu1 %v6580_v8  ;;  %2542 = vmatprep.subr.bf16.mxu0 %v6708_v9  ;;  %v6780_v8 = vcombine.high %v1090_v3, %v1094_v4  ;;  %v954_v9 = vld [vmem:[#allocation11 + $0x288] sm:$0xff]  ;;  %v911_v1 = vld [vmem:[#allocation11 + $0x130] sm:$0xff] }
 0x23c   :  { %v1086_v12 = vld [vmem:[#allocation11 + $0x6a8] sm:$0xff]  ;;  %v6643_v21 = vcombine.low %v954_v9, %v958_v10  ;;  %v1035_v2 = vld [vmem:[#allocation11 + $0x510] sm:$0xff] }
 0x23d   :  { %v950_v18 = vld [vmem:[#allocation11 + $0x268] sm:$0xff] }
 0x23e   :  { %2502 = vmatpush1.bf16.msra.mxu1 %v6579_v14  ;;  %2543 = vmatpush1.bf16.msra.mxu0 %v6707_v15  ;;  %v6779_v14 = vcombine.low %v1090_v3, %v1094_v4  ;;  %v6644_v15 = vcombine.high %v954_v9, %v958_v10  ;;  %v1074_v19 = vld [vmem:[#allocation11 + $0x648] sm:$0xff]  ;;  %v1039_v3 = vld [vmem:[#allocation11 + $0x530] sm:$0xff] }
 0x23f   :  { %2503 = vmatprep.subr.bf16.mxu1 %v6572_v16  ;;  %2544 = vmatprep.subr.bf16.mxu0 %v6700_v17  ;;  %v6772_v16 = vcombine.high %v1082_v11, %v1086_v12  ;;  %v946_v17 = vld [vmem:[#allocation11 + $0x248] sm:$0xff]  ;;  %v903_v9 = vld [vmem:[#allocation11 + $0xf0] sm:$0xff] }
 0x240   :  { %v1078_v20 = vld [vmem:[#allocation11 + $0x668] sm:$0xff]  ;;  %v6635_v30 = vcombine.low %v946_v17, %v950_v18  ;;  %v1027_v10 = vld [vmem:[#allocation11 + $0x4d0] sm:$0xff] }
 0x241   :  { %v942_v26 = vld [vmem:[#allocation11 + $0x228] sm:$0xff] }
 0x242   :  { %2504 = vmatpush1.bf16.msra.mxu1 %v6571_v22  ;;  %2545 = vmatpush1.bf16.msra.mxu0 %v6699_v23  ;;  %v6771_v22 = vcombine.low %v1082_v11, %v1086_v12  ;;  %v6636_v23 = vcombine.high %v946_v17, %v950_v18  ;;  %v1066_v27 = vld [vmem:[#allocation11 + $0x608] sm:$0xff]  ;;  %v1031_v11 = vld [vmem:[#allocation11 + $0x4f0] sm:$0xff] }
 0x243   :  { %2505 = vmatprep.subr.bf16.mxu1 %v6564_v24  ;;  %2546 = vmatprep.subr.bf16.mxu0 %v6692_v25  ;;  %v6764_v24 = vcombine.high %v1074_v19, %v1078_v20  ;;  %v938_v25 = vld [vmem:[#allocation11 + $0x208] sm:$0xff]  ;;  %v895_v17 = vld [vmem:[#allocation11 + $0xb0] sm:$0xff] }
 0x244   :  { %v1070_v28 = vld [vmem:[#allocation11 + $0x628] sm:$0xff]  ;;  %v6627_v44 = vcombine.low %v938_v25, %v942_v26  ;;  %v1019_v18 = vld [vmem:[#allocation11 + $0x490] sm:$0xff] }
 0x246   :  { %2506 = vmatpush1.bf16.msra.mxu1 %v6563_v31  ;;  %2547 = vmatpush1.bf16.msra.mxu0 %v6691_v33  ;;  %v6763_v31 = vcombine.low %v1074_v19, %v1078_v20  ;;  %v6628_v33 = vcombine.high %v938_v25, %v942_v26  ;;  %v1023_v19 = vld [vmem:[#allocation11 + $0x4b0] sm:$0xff] }
 0x247   :  { %2507 = vmatprep.subr.bf16.mxu1 %v6684_v34  ;;  %2548 = vmatprep.subr.bf16.mxu0 %v6812_v38  ;;  %v6756_v34 = vcombine.high %v1066_v27, %v1070_v28  ;;  %v931_v38 = vld [vmem:[#allocation11 + $0x1d0] sm:$0xff] }
 0x248   :  { %v6621_v52 = vcombine.low %v931_v38, %v935_v39  ;;  %v887_v25 = vld [vmem:[#allocation11 + $0x70] sm:$0xff] }
 0x249   :  { %v1011_v26 = vld [vmem:[#allocation11 + $0x450] sm:$0xff] }
 0x24a   :  { %2508 = vmatpush2.bf16.msra.mxu1 %v6683_v45  ;;  %2549 = vmatpush2.bf16.msra.mxu0 %v6811_v46  ;;  %v6755_v45 = vcombine.low %v1066_v27, %v1070_v28  ;;  %v6622_v46 = vcombine.high %v931_v38, %v935_v39  ;;  %v1015_v27 = vld [vmem:[#allocation11 + $0x470] sm:$0xff] }
 0x24b   :  { %2509 = vmatprep.subr.bf16.mxu1 %v6676_v47  ;;  %2550 = vmatprep.subr.bf16.mxu0 %v6804_v48  ;;  %v6750_v47 = vcombine.high %v1059_v42, %v1063_v43  ;;  %v923_v48 = vld [vmem:[#allocation11 + $0x190] sm:$0xff] }
 0x24c   :  { %v6613_v60 = vcombine.low %v923_v48, %v927_v49  ;;  %v879_v38 = vld [vmem:[#allocation11 + $0x30] sm:$0xff] }
 0x24d   :  { %v1003_v39 = vld [vmem:[#allocation11 + $0x410] sm:$0xff] }
 0x24e   :  { %2510 = vmatpush2.bf16.msra.mxu1 %v6675_v53  ;;  %2551 = vmatpush2.bf16.msra.mxu0 %v6803_v54  ;;  %v6749_v53 = vcombine.low %v1059_v42, %v1063_v43  ;;  %v6614_v54 = vcombine.high %v923_v48, %v927_v49  ;;  %v1007_v42 = vld [vmem:[#allocation11 + $0x430] sm:$0xff] }
 0x24f   :  { %2511 = vmatprep.subr.bf16.mxu1 %v6668_v55  ;;  %2552 = vmatprep.subr.bf16.mxu0 %v6796_v56  ;;  %v6742_v55 = vcombine.high %v1051_v50, %v1055_v51  ;;  %v915_v56 = vld [vmem:[#allocation11 + $0x150] sm:$0xff] }
 0x250   :  { %v6605_v4 = vcombine.low %v915_v56, %v919_v57  ;;  %v999_v48 = vld [vmem:[#allocation11 + $0x3f0] sm:$0xff] }
 0x251   :  { %v1123_v49 = vld [vmem:[#allocation11 + $0x7d0] sm:$0xff] }
 0x252   :  { %2512 = vmatpush2.bf16.msra.mxu1 %v6667_v61  ;;  %2553 = vmatpush2.bf16.msra.mxu0 %v6795_v62  ;;  %v6741_v61 = vcombine.low %v1051_v50, %v1055_v51  ;;  %v6606_v62 = vcombine.high %v915_v56, %v919_v57  ;;  %v1127_v50 = vld [vmem:[#allocation11 + $0x7f0] sm:$0xff] }
 0x253   :  { %2513 = vmatprep.subr.bf16.mxu1 %v6660_v63  ;;  %2554 = vmatprep.subr.bf16.mxu0 %v6788_v0  ;;  %v6734_v63 = vcombine.high %v1043_v58, %v1047_v59  ;;  %v907_v0 = vld [vmem:[#allocation11 + $0x110] sm:$0xff] }
 0x254   :  { %v6597_v12 = vcombine.low %v907_v0, %v911_v1  ;;  %v991_v56 = vld [vmem:[#allocation11 + $0x3b0] sm:$0xff] }
 0x255   :  { %v1115_v57 = vld [vmem:[#allocation11 + $0x790] sm:$0xff] }
 0x256   :  { %2514 = vmatpush2.bf16.msra.mxu1 %v6659_v5  ;;  %2555 = vmatpush2.bf16.msra.mxu0 %v6787_v6  ;;  %v6733_v5 = vcombine.low %v1043_v58, %v1047_v59  ;;  %v6598_v6 = vcombine.high %v907_v0, %v911_v1  ;;  %v1119_v58 = vld [vmem:[#allocation11 + $0x7b0] sm:$0xff] }
 0x257   :  { %2515 = vmatprep.subr.bf16.mxu1 %v6652_v7  ;;  %2556 = vmatprep.subr.bf16.mxu0 %v6780_v8  ;;  %v6726_v7 = vcombine.high %v1035_v2, %v1039_v3  ;;  %v899_v8 = vld [vmem:[#allocation11 + $0xd0] sm:$0xff] }
 0x258   :  { %v6589_v20 = vcombine.low %v899_v8, %v903_v9  ;;  %v983_v0 = vld [vmem:[#allocation11 + $0x370] sm:$0xff] }
 0x259   :  { %v1107_v1 = vld [vmem:[#allocation11 + $0x750] sm:$0xff] }
 0x25a   :  { %2516 = vmatpush2.bf16.msra.mxu1 %v6651_v13  ;;  %2557 = vmatpush2.bf16.msra.mxu0 %v6779_v14  ;;  %v6725_v13 = vcombine.low %v1035_v2, %v1039_v3  ;;  %v6590_v14 = vcombine.high %v899_v8, %v903_v9  ;;  %v1111_v2 = vld [vmem:[#allocation11 + $0x770] sm:$0xff] }
 0x25b   :  { %2517 = vmatprep.subr.bf16.mxu1 %v6644_v15  ;;  %2558 = vmatprep.subr.bf16.mxu0 %v6772_v16  ;;  %v6718_v15 = vcombine.high %v1027_v10, %v1031_v11  ;;  %v891_v16 = vld [vmem:[#allocation11 + $0x90] sm:$0xff] }
 0x25c   :  { %v6581_v28 = vcombine.low %v891_v16, %v895_v17  ;;  %v975_v8 = vld [vmem:[#allocation11 + $0x330] sm:$0xff] }
 0x25d   :  { %v1099_v9 = vld [vmem:[#allocation11 + $0x710] sm:$0xff] }
 0x25e   :  { %2518 = vmatpush2.bf16.msra.mxu1 %v6643_v21  ;;  %2559 = vmatpush2.bf16.msra.mxu0 %v6771_v22  ;;  %v6717_v21 = vcombine.low %v1027_v10, %v1031_v11  ;;  %v6582_v22 = vcombine.high %v891_v16, %v895_v17  ;;  %v1103_v10 = vld [vmem:[#allocation11 + $0x730] sm:$0xff] }
 0x25f   :  { %2519 = vmatprep.subr.bf16.mxu1 %v6636_v23  ;;  %2560 = vmatprep.subr.bf16.mxu0 %v6764_v24  ;;  %v6710_v23 = vcombine.high %v1019_v18, %v1023_v19  ;;  %v883_v24 = vld [vmem:[#allocation11 + $0x50] sm:$0xff] }
 0x260   :  { %v6573_v43 = vcombine.low %v883_v24, %v887_v25  ;;  %v967_v16 = vld [vmem:[#allocation11 + $0x2f0] sm:$0xff] }
 0x261   :  { %v1091_v17 = vld [vmem:[#allocation11 + $0x6d0] sm:$0xff] }
 0x262   :  { %2520 = vmatpush2.bf16.msra.mxu1 %v6635_v30  ;;  %2561 = vmatpush2.bf16.msra.mxu0 %v6763_v31  ;;  %v6709_v30 = vcombine.low %v1019_v18, %v1023_v19  ;;  %v6574_v31 = vcombine.high %v883_v24, %v887_v25  ;;  %v1095_v18 = vld [vmem:[#allocation11 + $0x6f0] sm:$0xff] }
 0x263   :  { %2521 = vmatprep.subr.bf16.mxu1 %v6628_v33  ;;  %2562 = vmatprep.subr.bf16.mxu0 %v6756_v34  ;;  %v6702_v33 = vcombine.high %v1011_v26, %v1015_v27  ;;  %v875_v34 = vld [vmem:[#allocation11 + $0x10] sm:$0xff] }
 0x264   :  { %v6565_v51 = vcombine.low %v875_v34, %v879_v38  ;;  %v959_v24 = vld [vmem:[#allocation11 + $0x2b0] sm:$0xff] }
 0x265   :  { %v1083_v25 = vld [vmem:[#allocation11 + $0x690] sm:$0xff] }
 0x266   :  { %2522 = vmatpush2.bf16.msra.mxu1 %v6627_v44  ;;  %2563 = vmatpush2.bf16.msra.mxu0 %v6755_v45  ;;  %v6701_v44 = vcombine.low %v1011_v26, %v1015_v27  ;;  %v6566_v45 = vcombine.high %v875_v34, %v879_v38  ;;  %v1087_v26 = vld [vmem:[#allocation11 + $0x6b0] sm:$0xff] }
 0x267   :  { %2573 = vmatprep.subr.bf16.mxu1 %v6622_v46  ;;  %2614 = vmatprep.subr.bf16.mxu0 %v6750_v47  ;;  %v6694_v46 = vcombine.high %v1003_v39, %v1007_v42  ;;  %v995_v47 = vld [vmem:[#allocation11 + $0x3d0] sm:$0xff] }
 0x268   :  { %v6685_v59 = vcombine.low %v995_v47, %v999_v48  ;;  %v951_v34 = vld [vmem:[#allocation11 + $0x270] sm:$0xff] }
 0x269   :  { %2524 = vmatmul.mubr.bf16.vlgmr.msra.gmra.mxu1 %v8506_v40  ;;  %2565 = vmatmul.mubr.bf16.vlgmr.msra.gmra.mxu0 %v8508_v41  ;;  %v1075_v38 = vld [vmem:[#allocation11 + $0x650] sm:$0xff] }
 0x26a   :  { %2574 = vmatpush1.bf16.msra.mxu1 %v6621_v52  ;;  %2605 = vmatprep.mubr.bf16.mxu1 %v8500_v35  ;;  %v6693_v52 = vcombine.low %v1003_v39, %v1007_v42  ;;  %v1079_v39 = vld [vmem:[#allocation11 + $0x670] sm:$0xff] }
 0x26b   :  { %2615 = vmatpush1.bf16.msra.mxu0 %v6749_v53  ;;  %2646 = vmatprep.mubr.bf16.mxu0 %v8502_v37  ;;  %v6686_v53 = vcombine.high %v995_v47, %v999_v48  ;;  %v943_v47 = vld [vmem:[#allocation11 + $0x230] sm:$0xff] }
 0x26c   :  { %2575 = vmatprep.subr.bf16.mxu1 %v6614_v54  ;;  %2616 = vmatprep.subr.bf16.mxu0 %v6742_v55  ;;  %v6814_v54 = vcombine.high %v1123_v49, %v1127_v50  ;;  %v987_v55 = vld [vmem:[#allocation11 + $0x390] sm:$0xff] }
 0x26d   :  { %v6677_v3 = vcombine.low %v987_v55, %v991_v56  ;;  %v1067_v48 = vld [vmem:[#allocation11 + $0x610] sm:$0xff] }
 0x26e   :  { %2576 = vmatpush1.bf16.msra.mxu1 %v6613_v60  ;;  %v6813_v60 = vcombine.low %v1123_v49, %v1127_v50  ;;  %v1071_v49 = vld [vmem:[#allocation11 + $0x630] sm:$0xff] }
 0x26f   :  { %2617 = vmatpush1.bf16.msra.mxu0 %v6741_v61  ;;  %2577 = vmatprep.subr.bf16.mxu1 %v6606_v62  ;;  %v6678_v61 = vcombine.high %v987_v55, %v991_v56  ;;  %v6806_v62 = vcombine.high %v1115_v57, %v1119_v58  ;;  %v936_v55 = vld [vmem:[#allocation11 + $0x1f8] sm:$0xff] }
 0x270   :  { %2618 = vmatprep.subr.bf16.mxu0 %v6734_v63  ;;  %v979_v63 = vld [vmem:[#allocation11 + $0x350] sm:$0xff]  ;;  %v1060_v56 = vld [vmem:[#allocation11 + $0x5d8] sm:$0xff] }
 0x271   :  { %v6669_v11 = vcombine.low %v979_v63, %v983_v0 }
 0x272   :  { %2578 = vmatpush1.bf16.msra.mxu1 %v6605_v4  ;;  %v6805_v4 = vcombine.low %v1115_v57, %v1119_v58  ;;  %v1064_v57 = vld [vmem:[#allocation11 + $0x5f8] sm:$0xff] }
 0x273   :  { %2619 = vmatpush1.bf16.msra.mxu0 %v6733_v5  ;;  %2579 = vmatprep.subr.bf16.mxu1 %v6598_v6  ;;  %v6670_v5 = vcombine.high %v979_v63, %v983_v0  ;;  %v6798_v6 = vcombine.high %v1107_v1, %v1111_v2  ;;  %v928_v63 = vld [vmem:[#allocation11 + $0x1b8] sm:$0xff] }
 0x274   :  { %2620 = vmatprep.subr.bf16.mxu0 %v6726_v7  ;;  %v971_v7 = vld [vmem:[#allocation11 + $0x310] sm:$0xff] }
 0x275   :  { %v6661_v19 = vcombine.low %v971_v7, %v975_v8 }
 0x276   :  { %2580 = vmatpush1.bf16.msra.mxu1 %v6597_v12  ;;  %v6797_v12 = vcombine.low %v1107_v1, %v1111_v2  ;;  %v1052_v1 = vld [vmem:[#allocation11 + $0x598] sm:$0xff] }
 0x277   :  { %2621 = vmatpush1.bf16.msra.mxu0 %v6725_v13  ;;  %2581 = vmatprep.subr.bf16.mxu1 %v6590_v14  ;;  %v6662_v13 = vcombine.high %v971_v7, %v975_v8  ;;  %v6790_v14 = vcombine.high %v1099_v9, %v1103_v10  ;;  %v1056_v2 = vld [vmem:[#allocation11 + $0x5b8] sm:$0xff] }
 0x278   :  { %2622 = vmatprep.subr.bf16.mxu0 %v6718_v15  ;;  %v963_v15 = vld [vmem:[#allocation11 + $0x2d0] sm:$0xff]  ;;  %v6744_v7 = vcombine.high %v1052_v1, %v1056_v2  ;;  %v1044_v8 = vld [vmem:[#allocation11 + $0x558] sm:$0xff] }
 0x279   :  { %v6653_v27 = vcombine.low %v963_v15, %v967_v16 }
 0x27a   :  { %2582 = vmatpush1.bf16.msra.mxu1 %v6589_v20  ;;  %v6789_v20 = vcombine.low %v1099_v9, %v1103_v10  ;;  %v1048_v9 = vld [vmem:[#allocation11 + $0x578] sm:$0xff] }
 0x27b   :  { %2623 = vmatpush1.bf16.msra.mxu0 %v6717_v21  ;;  %2583 = vmatprep.subr.bf16.mxu1 %v6582_v22  ;;  %v6654_v21 = vcombine.high %v963_v15, %v967_v16  ;;  %v6782_v22 = vcombine.high %v1091_v17, %v1095_v18  ;;  %v912_v15 = vld [vmem:[#allocation11 + $0x138] sm:$0xff] }
 0x27c   :  { %2624 = vmatprep.subr.bf16.mxu0 %v6710_v23  ;;  %v955_v23 = vld [vmem:[#allocation11 + $0x290] sm:$0xff]  ;;  %v1036_v16 = vld [vmem:[#allocation11 + $0x518] sm:$0xff] }
 0x27d   :  { %v6645_v42 = vcombine.low %v955_v23, %v959_v24 }
 0x27e   :  { %2584 = vmatpush1.bf16.msra.mxu1 %v6581_v28  ;;  %v6781_v28 = vcombine.low %v1091_v17, %v1095_v18  ;;  %v1040_v17 = vld [vmem:[#allocation11 + $0x538] sm:$0xff] }
 0x27f   :  { %2625 = vmatpush1.bf16.msra.mxu0 %v6709_v30  ;;  %2585 = vmatprep.subr.bf16.mxu1 %v6574_v31  ;;  %v6646_v30 = vcombine.high %v955_v23, %v959_v24  ;;  %v6774_v31 = vcombine.high %v1083_v25, %v1087_v26  ;;  %v1028_v23 = vld [vmem:[#allocation11 + $0x4d8] sm:$0xff] }
 0x280   :  { %2626 = vmatprep.subr.bf16.mxu0 %v6702_v33  ;;  %v947_v33 = vld [vmem:[#allocation11 + $0x250] sm:$0xff]  ;;  %v1032_v24 = vld [vmem:[#allocation11 + $0x4f8] sm:$0xff] }
 0x281   :  { %v6637_v50 = vcombine.low %v947_v33, %v951_v34 }
 0x282   :  { %2586 = vmatpush1.bf16.msra.mxu1 %v6573_v43  ;;  %v6773_v43 = vcombine.low %v1083_v25, %v1087_v26  ;;  %v6727_v25 = vcombine.low %v1036_v16, %v1040_v17 }
 0x283   :  { %2627 = vmatpush1.bf16.msra.mxu0 %v6701_v44  ;;  %2587 = vmatprep.subr.bf16.mxu1 %v6566_v45  ;;  %v6638_v44 = vcombine.high %v947_v33, %v951_v34  ;;  %v6766_v45 = vcombine.high %v1075_v38, %v1079_v39  ;;  %v1024_v33 = vld [vmem:[#allocation11 + $0x4b8] sm:$0xff] }
 0x284   :  { %2628 = vmatprep.subr.bf16.mxu0 %v6694_v46  ;;  %v939_v46 = vld [vmem:[#allocation11 + $0x210] sm:$0xff] }
 0x285   :  { %v6629_v58 = vcombine.low %v939_v46, %v943_v47 }
 0x286   :  { %2588 = vmatpush1.bf16.msra.mxu1 %v6565_v51  ;;  %v6765_v51 = vcombine.low %v1075_v38, %v1079_v39  ;;  %v6719_v38 = vcombine.low %v1028_v23, %v1032_v24 }
 0x287   :  { %2629 = vmatpush1.bf16.msra.mxu0 %v6693_v52  ;;  %2589 = vmatprep.subr.bf16.mxu1 %v6686_v53  ;;  %v6630_v52 = vcombine.high %v939_v46, %v943_v47  ;;  %v6758_v53 = vcombine.high %v1067_v48, %v1071_v49  ;;  %v1016_v46 = vld [vmem:[#allocation11 + $0x478] sm:$0xff] }
 0x288   :  { %2630 = vmatprep.subr.bf16.mxu0 %v6814_v54  ;;  %v932_v54 = vld [vmem:[#allocation11 + $0x1d8] sm:$0xff] }
 0x289   :  { %v6623_v0 = vcombine.low %v932_v54, %v936_v55 }
 0x28a   :  { %2590 = vmatpush2.bf16.msra.mxu1 %v6685_v59  ;;  %v6757_v59 = vcombine.low %v1067_v48, %v1071_v49 }
 0x28b   :  { %2631 = vmatpush2.bf16.msra.mxu0 %v6813_v60  ;;  %2591 = vmatprep.subr.bf16.mxu1 %v6678_v61  ;;  %v6624_v60 = vcombine.high %v932_v54, %v936_v55  ;;  %v6752_v61 = vcombine.high %v1060_v56, %v1064_v57  ;;  %v1008_v54 = vld [vmem:[#allocation11 + $0x438] sm:$0xff] }
 0x28c   :  { %2632 = vmatprep.subr.bf16.mxu0 %v6806_v62  ;;  %v924_v62 = vld [vmem:[#allocation11 + $0x198] sm:$0xff] }
 0x28d   :  { %v6615_v10 = vcombine.low %v924_v62, %v928_v63 }
 0x28e   :  { %2592 = vmatpush2.bf16.msra.mxu1 %v6677_v3  ;;  %v6751_v3 = vcombine.low %v1060_v56, %v1064_v57 }
 0x28f   :  { %2633 = vmatpush2.bf16.msra.mxu0 %v6805_v4  ;;  %2593 = vmatprep.subr.bf16.mxu1 %v6670_v5  ;;  %v6616_v4 = vcombine.high %v924_v62, %v928_v63  ;;  %v916_v5 = vld [vmem:[#allocation11 + $0x158] sm:$0xff] }
 0x290   :  { %2634 = vmatprep.subr.bf16.mxu0 %v6798_v6  ;;  %v920_v6 = vld [vmem:[#allocation11 + $0x178] sm:$0xff] }
 0x291   :  { %v6607_v18 = vcombine.low %v916_v5, %v920_v6  ;;  %v1128_v62 = vld [vmem:[#allocation11 + $0x7f8] sm:$0xff] }
 0x292   :  { %2594 = vmatpush2.bf16.msra.mxu1 %v6669_v11  ;;  %v6743_v11 = vcombine.low %v1052_v1, %v1056_v2 }
 0x293   :  { %2635 = vmatpush2.bf16.msra.mxu0 %v6797_v12  ;;  %2595 = vmatprep.subr.bf16.mxu1 %v6662_v13  ;;  %v6608_v12 = vcombine.high %v916_v5, %v920_v6  ;;  %v6736_v13 = vcombine.high %v1044_v8, %v1048_v9  ;;  %v1116_v5 = vld [vmem:[#allocation11 + $0x798] sm:$0xff] }
 0x294   :  { %2636 = vmatprep.subr.bf16.mxu0 %v6790_v14  ;;  %v908_v14 = vld [vmem:[#allocation11 + $0x118] sm:$0xff] }
 0x295   :  { %v1120_v6 = vld [vmem:[#allocation11 + $0x7b8] sm:$0xff] }
 0x296   :  { %2596 = vmatpush2.bf16.msra.mxu1 %v6661_v19  ;;  %v6735_v19 = vcombine.low %v1044_v8, %v1048_v9 }
 0x297   :  { %2637 = vmatpush2.bf16.msra.mxu0 %v6789_v20  ;;  %2597 = vmatprep.subr.bf16.mxu1 %v6654_v21  ;;  %v6600_v20 = vcombine.high %v908_v14, %v912_v15  ;;  %v900_v21 = vld [vmem:[#allocation11 + $0xd8] sm:$0xff] }
 0x298   :  { %2638 = vmatprep.subr.bf16.mxu0 %v6782_v22  ;;  %v904_v22 = vld [vmem:[#allocation11 + $0xf8] sm:$0xff] }
 0x299   :  { %v6592_v26 = vcombine.high %v900_v21, %v904_v22  ;;  %v6591_v34 = vcombine.low %v900_v21, %v904_v22  ;;  %v1104_v21 = vld [vmem:[#allocation11 + $0x738] sm:$0xff] }
 0x29a   :  { %2598 = vmatpush2.bf16.msra.mxu1 %v6653_v27  ;;  %v6720_v27 = vcombine.high %v1028_v23, %v1032_v24 }
 0x29b   :  { %2639 = vmatpush2.bf16.msra.mxu0 %v6781_v28  ;;  %2599 = vmatprep.subr.bf16.mxu1 %v6646_v30  ;;  %v892_v28 = vld [vmem:[#allocation11 + $0x98] sm:$0xff] }
 0x29c   :  { %2640 = vmatprep.subr.bf16.mxu0 %v6774_v31  ;;  %v896_v30 = vld [vmem:[#allocation11 + $0xb8] sm:$0xff] }
 0x29d   :  { %v1020_v31 = vld [vmem:[#allocation11 + $0x498] sm:$0xff]  ;;  %v6584_v39 = vcombine.high %v892_v28, %v896_v30  ;;  %v6583_v47 = vcombine.low %v892_v28, %v896_v30 }
 0x29e   :  { %2600 = vmatpush2.bf16.msra.mxu1 %v6645_v42  ;;  %v6712_v42 = vcombine.high %v1020_v31, %v1024_v33  ;;  %v6711_v48 = vcombine.low %v1020_v31, %v1024_v33  ;;  %v1096_v28 = vld [vmem:[#allocation11 + $0x6f8] sm:$0xff] }
 0x29f   :  { %2641 = vmatpush2.bf16.msra.mxu0 %v6773_v43  ;;  %2601 = vmatprep.subr.bf16.mxu1 %v6638_v44  ;;  %v884_v43 = vld [vmem:[#allocation11 + $0x58] sm:$0xff] }
 0x2a0   :  { %2642 = vmatprep.subr.bf16.mxu0 %v6766_v45  ;;  %v888_v44 = vld [vmem:[#allocation11 + $0x78] sm:$0xff] }
 0x2a1   :  { %v1012_v45 = vld [vmem:[#allocation11 + $0x458] sm:$0xff]  ;;  %v6576_v49 = vcombine.high %v884_v43, %v888_v44  ;;  %v6575_v55 = vcombine.low %v884_v43, %v888_v44 }
 0x2a2   :  { %2602 = vmatpush2.bf16.msra.mxu1 %v6637_v50  ;;  %v6704_v50 = vcombine.high %v1012_v45, %v1016_v46  ;;  %v6703_v56 = vcombine.low %v1012_v45, %v1016_v46  ;;  %v1088_v43 = vld [vmem:[#allocation11 + $0x6b8] sm:$0xff] }
 0x2a3   :  { %2643 = vmatpush2.bf16.msra.mxu0 %v6765_v51  ;;  %2603 = vmatprep.subr.bf16.mxu1 %v6630_v52  ;;  %v876_v51 = vld [vmem:[#allocation11 + $0x18] sm:$0xff] }
 0x2a4   :  { %2644 = vmatprep.subr.bf16.mxu0 %v6758_v53  ;;  %v880_v52 = vld [vmem:[#allocation11 + $0x38] sm:$0xff] }
 0x2a5   :  { %v1004_v53 = vld [vmem:[#allocation11 + $0x418] sm:$0xff]  ;;  %v6568_v57 = vcombine.high %v876_v51, %v880_v52  ;;  %v6567_v63 = vcombine.low %v876_v51, %v880_v52  ;;  %v8522_v52 = vld [vmem:[#allocation13] sm:$0xff] }
 0x2a6   :  { %2604 = vmatpush2.bf16.msra.mxu1 %v6629_v58  ;;  %v6696_v58 = vcombine.high %v1004_v53, %v1008_v54  ;;  %v1080_v51 = vld [vmem:[#allocation11 + $0x678] sm:$0xff] }
 0x2a7   :  { %2645 = vmatpush2.bf16.msra.mxu0 %v6757_v59  ;;  %2655 = vmatprep.subr.bf16.mxu1 %v6624_v60  ;;  %v996_v59 = vld [vmem:[#allocation11 + $0x3d8] sm:$0xff] }
 0x2a8   :  { %2696 = vmatprep.subr.bf16.mxu0 %v6752_v61  ;;  %v1000_v60 = vld [vmem:[#allocation11 + $0x3f8] sm:$0xff] }
 0x2a9   :  { %2606 = vmatmul.mubr.bf16.vlgmr.msra.gmra.mxu1 %v8506_v40  ;;  %v1124_v61 = vld [vmem:[#allocation11 + $0x7d8] sm:$0xff]  ;;  %v6688_v1 = vcombine.high %v996_v59, %v1000_v60 }
 0x2aa   :  { %2647 = vmatmul.mubr.bf16.vlgmr.msra.gmra.mxu0 %v8508_v41  ;;  %2656 = vmatpush1.bf16.msra.mxu1 %v6623_v0  ;;  %v6695_v0 = vcombine.low %v1004_v53, %v1008_v54  ;;  %v6816_v2 = vcombine.high %v1124_v61, %v1128_v62  ;;  %v6815_v8 = vcombine.low %v1124_v61, %v1128_v62  ;;  %v1072_v61 = vld [vmem:[#allocation11 + $0x638] sm:$0xff] }
 0x2ab   :  { %2687 = vmatprep.mubr.bf16.mxu1 %v8500_v35  ;;  %2697 = vmatpush1.bf16.msra.mxu0 %v6751_v3  ;;  %v6728_v35 = vcombine.high %v1036_v16, %v1040_v17  ;;  %v988_v3 = vld [vmem:[#allocation11 + $0x398] sm:$0xff]  ;;  %v6807_v16 = vcombine.low %v1116_v5, %v1120_v6 }
 0x2ac   :  { %2728 = vmatprep.mubr.bf16.mxu0 %v8502_v37  ;;  %2657 = vmatprep.subr.bf16.mxu1 %v6616_v4  ;;  %v6599_v37 = vcombine.low %v908_v14, %v912_v15  ;;  %v992_v4 = vld [vmem:[#allocation11 + $0x3b8] sm:$0xff] }
 0x2ad   :  { %2698 = vmatprep.subr.bf16.mxu0 %v6744_v7  ;;  %v6687_v7 = vcombine.low %v996_v59, %v1000_v60  ;;  %v6680_v9 = vcombine.high %v988_v3, %v992_v4  ;;  %v1112_v14 = vld [vmem:[#allocation11 + $0x778] sm:$0xff]  ;;  %v6679_v15 = vcombine.low %v988_v3, %v992_v4  ;;  %v8526_v59 = vrot.slane %v8522_v52, %v8469_v32 }
 0x2ae   :  { %2658 = vmatpush1.bf16.msra.mxu1 %v6615_v10  ;;  %v6808_v10 = vcombine.high %v1116_v5, %v1120_v6  ;;  %v1068_v60 = vld [vmem:[#allocation11 + $0x618] sm:$0xff]  ;;  %v7503_v5 = vld [vmem:[#allocation14 + $0x18c] ss:$28 sps:$4 sm:$0xff]  }
 0x2af   :  { %2699 = vmatpush1.bf16.msra.mxu0 %v6743_v11  ;;  %2659 = vmatprep.subr.bf16.mxu1 %v6608_v12  ;;  %v980_v11 = vld [vmem:[#allocation11 + $0x358] sm:$0xff]  ;;  %v6759_v4 = vcombine.low %v1068_v60, %v1072_v61 }
 0x2b0   :  { %2700 = vmatprep.subr.bf16.mxu0 %v6736_v13  ;;  %v984_v12 = vld [vmem:[#allocation11 + $0x378] sm:$0xff] }
 0x2b1   :  { %v1108_v13 = vld [vmem:[#allocation11 + $0x758] sm:$0xff]  ;;  %v6672_v17 = vcombine.high %v980_v11, %v984_v12  ;;  %v6671_v22 = vcombine.low %v980_v11, %v984_v12 }
 0x2b2   :  { %2660 = vmatpush1.bf16.msra.mxu1 %v6607_v18  ;;  %v6800_v18 = vcombine.high %v1108_v13, %v1112_v14  ;;  %v6799_v23 = vcombine.low %v1108_v13, %v1112_v14  ;;  %v7521_v12 = vld [vmem:[#allocation14 + $0x4d4] ss:$28 sps:$4 sm:$0xff]  }
 0x2b3   :  { %2701 = vmatpush1.bf16.msra.mxu0 %v6735_v19  ;;  %2661 = vmatprep.subr.bf16.mxu1 %v6600_v20  ;;  %v972_v19 = vld [vmem:[#allocation11 + $0x318] sm:$0xff] }
 0x2b4   :  { %2702 = vmatprep.subr.bf16.mxu0 %v6728_v35  ;;  %v976_v20 = vld [vmem:[#allocation11 + $0x338] sm:$0xff] }
 0x2b5   :  { %v1100_v35 = vld [vmem:[#allocation11 + $0x718] sm:$0xff]  ;;  %v6664_v24 = vcombine.high %v972_v19, %v976_v20  ;;  %v6663_v30 = vcombine.low %v972_v19, %v976_v20 }
 0x2b6   :  { %2662 = vmatpush1.bf16.msra.mxu1 %v6599_v37  ;;  %v6792_v37 = vcombine.high %v1100_v35, %v1104_v21  ;;  %v6791_v31 = vcombine.low %v1100_v35, %v1104_v21  ;;  %v7519_v19 = vld [vmem:[#allocation14 + $0x4d0] ss:$28 sps:$4 sm:$0xff]   ;;  %v7527_v21 = vld [vmem:[#allocation14 + $0x49c] ss:$28 sps:$4 sm:$0xff]  }
 0x2b7   :  { %2703 = vmatpush1.bf16.msra.mxu0 %v6727_v25  ;;  %2663 = vmatprep.subr.bf16.mxu1 %v6592_v26  ;;  %v964_v25 = vld [vmem:[#allocation11 + $0x2d8] sm:$0xff] }
 0x2b8   :  { %2704 = vmatprep.subr.bf16.mxu0 %v6720_v27  ;;  %v968_v26 = vld [vmem:[#allocation11 + $0x2f8] sm:$0xff] }
 0x2b9   :  { %v1092_v27 = vld [vmem:[#allocation11 + $0x6d8] sm:$0xff]  ;;  %v6656_v33 = vcombine.high %v964_v25, %v968_v26  ;;  %v6655_v44 = vcombine.low %v964_v25, %v968_v26  ;;  %v7512_v25 = vld [vmem:[#allocation14 + $0xe4] ss:$28 sps:$4 sm:$0xff]  }
 0x2ba   :  { %2664 = vmatpush1.bf16.msra.mxu1 %v6591_v34  ;;  %v6784_v34 = vcombine.high %v1092_v27, %v1096_v28  ;;  %v6783_v45 = vcombine.low %v1092_v27, %v1096_v28  ;;  %v7525_v26 = vld [vmem:[#allocation14 + $0x498] ss:$28 sps:$4 sm:$0xff]   ;;  %v7533_v28 = vld [vmem:[#allocation14 + $0x464] ss:$28 sps:$4 sm:$0xff]  }
 0x2bb   :  { %2705 = vmatpush1.bf16.msra.mxu0 %v6719_v38  ;;  %2665 = vmatprep.subr.bf16.mxu1 %v6584_v39  ;;  %v956_v38 = vld [vmem:[#allocation11 + $0x298] sm:$0xff] }
 0x2bc   :  { %2706 = vmatprep.subr.bf16.mxu0 %v6712_v42  ;;  %v960_v39 = vld [vmem:[#allocation11 + $0x2b8] sm:$0xff] }
 0x2bd   :  { %v1084_v42 = vld [vmem:[#allocation11 + $0x698] sm:$0xff]  ;;  %v6648_v46 = vcombine.high %v956_v38, %v960_v39  ;;  %v6647_v53 = vcombine.low %v956_v38, %v960_v39  ;;  %v7539_v39 = vld [vmem:[#allocation14 + $0x42c] ss:$28 sps:$4 sm:$0xff]  }
 0x2be   :  { %2666 = vmatpush1.bf16.msra.mxu1 %v6583_v47  ;;  %v6776_v47 = vcombine.high %v1084_v42, %v1088_v43  ;;  %v6775_v54 = vcombine.low %v1084_v42, %v1088_v43  ;;  %v7516_v42 = vld [vmem:[#allocation14 + $0xa8] ss:$28 sps:$4 sm:$0xff]   ;;  %v7524_v43 = vld [vmem:[#allocation14 + $0x74] ss:$28 sps:$4 sm:$0xff]  }
 0x2bf   :  { %2707 = vmatpush1.bf16.msra.mxu0 %v6711_v48  ;;  %2667 = vmatprep.subr.bf16.mxu1 %v6576_v49  ;;  %v948_v48 = vld [vmem:[#allocation11 + $0x258] sm:$0xff] }
 0x2c0   :  { %2708 = vmatprep.subr.bf16.mxu0 %v6704_v50  ;;  %v952_v49 = vld [vmem:[#allocation11 + $0x278] sm:$0xff] }
 0x2c1   :  { %v1076_v50 = vld [vmem:[#allocation11 + $0x658] sm:$0xff]  ;;  %v6639_v62 = vcombine.low %v948_v48, %v952_v49 }
 0x2c2   :  { %2668 = vmatpush1.bf16.msra.mxu1 %v6575_v55  ;;  %v6640_v55 = vcombine.high %v948_v48, %v952_v49  ;;  %v7543_v48 = vld [vmem:[#allocation14 + $0x3f0] ss:$28 sps:$4 sm:$0xff]   ;;  %v7551_v49 = vld [vmem:[#allocation14 + $0x3bc] ss:$28 sps:$4 sm:$0xff]  }
 0x2c3   :  { %2709 = vmatpush1.bf16.msra.mxu0 %v6703_v56  ;;  %2669 = vmatprep.subr.bf16.mxu1 %v6568_v57  ;;  %v6768_v56 = vcombine.high %v1076_v50, %v1080_v51  ;;  %v940_v57 = vld [vmem:[#allocation11 + $0x218] sm:$0xff] }
 0x2c4   :  { %2710 = vmatprep.subr.bf16.mxu0 %v6696_v58  ;;  %v944_v58 = vld [vmem:[#allocation11 + $0x238] sm:$0xff] }
 0x2c5   :  { %v6631_v3 = vcombine.low %v940_v57, %v944_v58 }
 0x2c6   :  { %2670 = vmatpush1.bf16.msra.mxu1 %v6567_v63  ;;  %v6767_v63 = vcombine.low %v1076_v50, %v1080_v51  ;;  %v7528_v50 = vld [vmem:[#allocation14 + $0x38] ss:$28 sps:$4 sm:$0xff]   ;;  %v7536_v51 = vld [vmem:[#allocation14 + $0x4] ss:$28 sps:$4 sm:$0xff]  }
 0x2c7   :  { %2711 = vmatpush1.bf16.msra.mxu0 %v6695_v0  ;;  %2671 = vmatprep.subr.bf16.mxu1 %v6688_v1  ;;  %v6632_v0 = vcombine.high %v940_v57, %v944_v58  ;;  %v6760_v1 = vcombine.high %v1068_v60, %v1072_v61  ;;  %v7555_v57 = vld [vmem:[#allocation14 + $0x380] ss:$28 sps:$4 sm:$0xff]   ;;  %v7563_v58 = vld [vmem:[#allocation14 + $0x6cc] ss:$28 sps:$4 sm:$0xff]   ;;  %v7548_v61 = vld [vmem:[#allocation14 + $0x314] ss:$28 sps:$4 sm:$0xff]  }
 0x2c8   :  { %2712 = vmatprep.subr.bf16.mxu0 %v6816_v2  ;;  %v2762_v2 = vcombine.high %v8526_v59, %v8526_v59  ;;  %v7540_v60 = vld [vmem:[#allocation14 + $0x348] ss:$28 sps:$4 sm:$0xff]  }
 0x2ca   :  { %2672 = vmatpush2.bf16.msra.mxu1 %v6687_v7  ;;  %v8531_v6 = vrot.slane %v2762_v2, %v8469_v32  ;;  %v7515_v7 = vld [vmem:[#allocation14 + $0x50c] ss:$28 sps:$4 sm:$0xff]  }
 0x2cb   :  { %2713 = vmatpush2.bf16.msra.mxu0 %v6815_v8  ;;  %2673 = vmatprep.subr.bf16.mxu1 %v6680_v9  ;;  %v7501_v8 = vld [vmem:[#allocation14 + $0x188] ss:$28 sps:$4 sm:$0xff]   ;;  %v7506_v9 = vld [vmem:[#allocation14 + $0x154] ss:$28 sps:$4 sm:$0xff]  }
 0x2cc   :  { %2714 = vmatprep.subr.bf16.mxu0 %v6808_v10  ;;  %v7513_v10 = vld [vmem:[#allocation14 + $0x508] ss:$28 sps:$4 sm:$0xff]   ;;  %v2804_v11 = vpack.i.b16 %v8531_v6, %v8531_v6  ;;  %v7567_v2 = vld [vmem:[#allocation14 + $0x690] ss:$28 sps:$4 sm:$0xff]  }
 0x2ce   :  { %2674 = vmatpush2.bf16.msra.mxu1 %v6679_v15  ;;  %v7504_v15 = vld [vmem:[#allocation14 + $0x150] ss:$28 sps:$4 sm:$0xff]   ;;  %v2809_v35 = vrot.slane %v2804_v11, %v8474_v36  ;;  %v7579_v11 = vld [vmem:[#allocation14 + $0x620] ss:$28 sps:$4 sm:$0xff]  }
 0x2cf   :  { %2715 = vmatpush2.bf16.msra.mxu0 %v6807_v16  ;;  %2675 = vmatprep.subr.bf16.mxu1 %v6672_v17 }
 0x2d0   :  { %2716 = vmatprep.subr.bf16.mxu0 %v6800_v18  ;;  %v7509_v18 = vld [vmem:[#allocation14 + $0x11c] ss:$28 sps:$4 sm:$0xff]  }
 0x2d2   :  { %2676 = vmatpush2.bf16.msra.mxu1 %v6671_v22 }
 0x2d3   :  { %2717 = vmatpush2.bf16.msra.mxu0 %v6799_v23  ;;  %2677 = vmatprep.subr.bf16.mxu1 %v6664_v24  ;;  %v7507_v24 = vld [vmem:[#allocation14 + $0x118] ss:$28 sps:$4 sm:$0xff]  }
 0x2d4   :  { %2718 = vmatprep.subr.bf16.mxu0 %v6792_v37 }
 0x2d6   :  { %2678 = vmatpush2.bf16.msra.mxu1 %v6663_v30 }
 0x2d7   :  { %2719 = vmatpush2.bf16.msra.mxu0 %v6791_v31  ;;  %2679 = vmatprep.subr.bf16.mxu1 %v6656_v33  ;;  %v7510_v31 = vld [vmem:[#allocation14 + $0xe0] ss:$28 sps:$4 sm:$0xff]   ;;  %v7518_v33 = vld [vmem:[#allocation14 + $0xac] ss:$28 sps:$4 sm:$0xff]  }
 0x2d8   :  { %2720 = vmatprep.subr.bf16.mxu0 %v6784_v34  ;;  %v7531_v34 = vld [vmem:[#allocation14 + $0x460] ss:$28 sps:$4 sm:$0xff]  }
 0x2da   :  { %2680 = vmatpush2.bf16.msra.mxu1 %v6655_v44  ;;  %v7537_v44 = vld [vmem:[#allocation14 + $0x428] ss:$28 sps:$4 sm:$0xff]  }
 0x2db   :  { %2721 = vmatpush2.bf16.msra.mxu0 %v6783_v45  ;;  %2681 = vmatprep.subr.bf16.mxu1 %v6648_v46  ;;  %v7545_v45 = vld [vmem:[#allocation14 + $0x3f4] ss:$28 sps:$4 sm:$0xff]  }
 0x2dc   :  { %2722 = vmatprep.subr.bf16.mxu0 %v6776_v47  ;;  %v7522_v46 = vld [vmem:[#allocation14 + $0x70] ss:$28 sps:$4 sm:$0xff]   ;;  %v7530_v47 = vld [vmem:[#allocation14 + $0x3c] ss:$28 sps:$4 sm:$0xff]  }
 0x2de   :  { %2682 = vmatpush2.bf16.msra.mxu1 %v6647_v53  ;;  %v7549_v53 = vld [vmem:[#allocation14 + $0x3b8] ss:$28 sps:$4 sm:$0xff]  }
 0x2df   :  { %2723 = vmatpush2.bf16.msra.mxu0 %v6775_v54  ;;  %2683 = vmatprep.subr.bf16.mxu1 %v6640_v55  ;;  %v7557_v54 = vld [vmem:[#allocation14 + $0x384] ss:$28 sps:$4 sm:$0xff]  }
 0x2e0   :  { %2724 = vmatprep.subr.bf16.mxu0 %v6768_v56  ;;  %v7534_v55 = vld [vmem:[#allocation14] ss:$28 sps:$4 sm:$0xff]   ;;  %v7542_v56 = vld [vmem:[#allocation14 + $0x34c] ss:$28 sps:$4 sm:$0xff]  }
 0x2e2   :  { %2684 = vmatpush2.bf16.msra.mxu1 %v6639_v62  ;;  %v7561_v62 = vld [vmem:[#allocation14 + $0x6c8] ss:$28 sps:$4 sm:$0xff]  }
 0x2e3   :  { %2725 = vmatpush2.bf16.msra.mxu0 %v6767_v63  ;;  %2685 = vmatprep.subr.bf16.mxu1 %v6632_v0  ;;  %v7569_v63 = vld [vmem:[#allocation14 + $0x694] ss:$28 sps:$4 sm:$0xff]  }
 0x2e4   :  { %2726 = vmatprep.subr.bf16.mxu0 %v6760_v1  ;;  %v7546_v0 = vld [vmem:[#allocation14 + $0x310] ss:$28 sps:$4 sm:$0xff]   ;;  %v7554_v1 = vld [vmem:[#allocation14 + $0x2dc] ss:$28 sps:$4 sm:$0xff]  }
 0x2e6   :  { %2686 = vmatpush2.bf16.msra.mxu1 %v6631_v3  ;;  %v7575_v3 = vld [vmem:[#allocation14 + $0x65c] ss:$28 sps:$4 sm:$0xff]  }
 0x2e7   :  { %2727 = vmatpush2.bf16.msra.mxu0 %v6759_v4  ;;  %5768 = vmatprep.subr.bf16.mxu1 %v7503_v5  ;;  %v7552_v4 = vld [vmem:[#allocation14 + $0x2d8] ss:$28 sps:$4 sm:$0xff]   ;;  %v7560_v5 = vld [vmem:[#allocation14 + $0x2a4] ss:$28 sps:$4 sm:$0xff]  }
 0x2e8   :  { %5809 = vmatprep.subr.bf16.mxu0 %v7515_v7  ;;  %v7573_v7 = vld [vmem:[#allocation14 + $0x658] ss:$28 sps:$4 sm:$0xff]  }
 0x2e9   :  { %2688 = vmatmul.mubr.bf16.vlgmr.msra.gmra.mxu1 %v8506_v40  ;;  %v8536_v13 = vpop.f32.mrf.mxu1  ;;  %v8538_v14 = vpop.f32.mrf.mxu0 }
 0x2ea   :  { %2729 = vmatmul.mubr.bf16.vlgmr.msra.gmra.mxu0 %v8508_v41  ;;  %5769 = vmatpush1.bf16.msra.mxu1 %v7501_v8  ;;  %v7581_v8 = vld [vmem:[#allocation14 + $0x624] ss:$28 sps:$4 sm:$0xff]  }
 0x2eb   :  { %v2445_v16 = vpop.f32.mrf.mxu1  ;;  %v2486_v17 = vpop.f32.mrf.mxu0  ;;  %5770 = vmatprep.subr.bf16.mxu1 %v7506_v9  ;;  %5810 = vmatpush1.bf16.msra.mxu0 %v7513_v10  ;;  %v7558_v9 = vld [vmem:[#allocation14 + $0x2a0] ss:$28 sps:$4 sm:$0xff]   ;;  %v7566_v10 = vld [vmem:[#allocation14 + $0x26c] ss:$28 sps:$4 sm:$0xff]  }
 0x2ec   :  { %v2487_v20 = vadd.f32 %v2486_v17, %v2445_v16  ;;  %5811 = vmatprep.subr.bf16.mxu0 %v7521_v12  ;;  %v2770_v12 = vrot.slane %v8526_v59, %v8469_v32  ;;  %v7564_v16 = vld [vmem:[#allocation14 + $0x268] ss:$28 sps:$4 sm:$0xff]   ;;  %v7572_v17 = vld [vmem:[#allocation14 + $0x234] ss:$28 sps:$4 sm:$0xff]  }
 0x2ed   :  { %v2447_v40 = vpop.f32.mrf.mxu1  ;;  %v2488_v22 = vpop.f32.mrf.mxu0  ;;  %v7588_v59 = vld [vmem:[#allocation14 + $0x5b0] ss:$28 sps:$4 sm:$0xff]  }
 0x2ee   :  { %v2738_v23 = vpack.c.bf16 %v2487_v20, %v2487_v20  ;;  %5771 = vmatpush1.bf16.msra.mxu1 %v7504_v15  ;;  %v7587_v15 = vld [vmem:[#allocation14 + $0x5ec] ss:$28 sps:$4 sm:$0xff]   ;;  %v2797_v20 = vpack.i.b16 %v2770_v12, %v2770_v12  ;;  %v7578_v40 = vld [vmem:[#allocation14 + $0x1fc] ss:$28 sps:$4 sm:$0xff]  }
 0x2ef   :  { %v2448_v37 = vpop.f32.mrf.mxu1  ;;  %v2489_v41 = vpop.f32.mrf.mxu0  ;;  %5772 = vmatprep.subr.bf16.mxu1 %v7509_v18  ;;  %5812 = vmatpush1.bf16.msra.mxu0 %v7519_v19  ;;  %v7585_v18 = vld [vmem:[#allocation14 + $0x5e8] ss:$28 sps:$4 sm:$0xff]   ;;  %v2485_v19 = vadd.f32 %v8538_v14, %v8536_v13  ;;  %v7591_v13 = vld [vmem:[#allocation14 + $0x578] ss:$28 sps:$4 sm:$0xff]  }
 0x2f0   :  { %v2853_v27 = vadd.bf16 %v2809_v35, %v2738_v23  ;;  %5813 = vmatprep.subr.bf16.mxu0 %v7527_v21  ;;  %v7590_v35 = vld [vmem:[#allocation14 + $0x5b4] ss:$28 sps:$4 sm:$0xff]   ;;  %v2802_v23 = vrot.slane %v2797_v20, %v8474_v36  ;;  %v7584_v41 = vld [vmem:[#allocation14 + $0x1c4] ss:$28 sps:$4 sm:$0xff]  }
 0x2f1   :  { %v7570_v21 = vld [vmem:[#allocation14 + $0x230] ss:$28 sps:$4 sm:$0xff]   ;;  %v2737_v22 = vpack.c.bf16 %v2485_v19, %v2485_v19  ;;  %v7576_v37 = vld [vmem:[#allocation14 + $0x1f8] ss:$28 sps:$4 sm:$0xff]  }
 0x2f2   :  { %v2869_v30 = vmul.bf16 1045249613, %v2853_v27  ;;  %5773 = vmatpush1.bf16.msra.mxu1 %v7507_v24  ;;  %vm2861_vm6 = vcmp.gt.bf16.partialorder %v2853_v27, 0  ;;  %v7593_v24 = vld [vmem:[#allocation14 + $0x57c] ss:$28 sps:$4 sm:$0xff]  }
 0x2f3   :  { %5774 = vmatprep.subr.bf16.mxu1 %v7512_v25  ;;  %5814 = vmatpush1.bf16.msra.mxu0 %v7525_v26  ;;  %v2852_v14 = vadd.bf16 %v2802_v23, %v2737_v22  ;;  %v7596_v25 = vld [vmem:[#allocation14 + $0x544] ss:$28 sps:$4 sm:$0xff]   ;;  %v7617_v19 = vld [vmem:[#allocation14 + $0x73c] ss:$28 sps:$4 sm:$0xff]   ;;  %v7672_v22 = vld [vmem:[#allocation14 + $0xb2c] ss:$28 sps:$4 sm:$0xff]  }
 0x2f4   :  { %v8542_v38 = vsel %vm2861_vm6, %v2853_v27, %v2869_v30  ;;  %5815 = vmatprep.subr.bf16.mxu0 %v7533_v28  ;;  %v7582_v26 = vld [vmem:[#allocation14 + $0x1c0] ss:$28 sps:$4 sm:$0xff]   ;;  %v2792_v27 = vcombine.high %v2770_v12, %v2770_v12  ;;  %v7599_v30 = vld [vmem:[#allocation14 + $0x88c] ss:$28 sps:$4 sm:$0xff]   ;;  %v7658_v20 = vld [vmem:[#allocation14 + $0xb98] ss:$28 sps:$4 sm:$0xff]  }
 0x2f5   :  { %5800 = vmatprep.mubr.bf16.mxu1 %v8542_v38  ;;  %v7594_v28 = vld [vmem:[#allocation14 + $0x540] ss:$28 sps:$4 sm:$0xff]   ;;  %vm2860_vm7 = vcmp.gt.bf16.partialorder %v2852_v14, 0  ;;  %v7609_v12 = vld [vmem:[#allocation14 + $0x7a8] ss:$28 sps:$4 sm:$0xff]  }
 0x2f6   :  { %5775 = vmatpush1.bf16.msra.mxu1 %v7510_v31  ;;  %v2868_v31 = vmul.bf16 1045249613, %v2852_v14  ;;  %v7618_v23 = vld [vmem:[#allocation14 + $0x700] ss:$28 sps:$4 sm:$0xff]  }
 0x2f7   :  { %5776 = vmatprep.subr.bf16.mxu1 %v7518_v33  ;;  %5816 = vmatpush1.bf16.msra.mxu0 %v7531_v34  ;;  %v2794_v33 = vcombine.high %v8531_v6, %v8531_v6  ;;  %v7648_v34 = vld [vmem:[#allocation14 + $0xc0c] ss:$28 sps:$4 sm:$0xff]  }
 0x2f8   :  { %5817 = vmatprep.subr.bf16.mxu0 %v7539_v39  ;;  %v2811_v39 = vpack.i.b16 %v2792_v27, %v2792_v27  ;;  %v7624_v27 = vld [vmem:[#allocation14 + $0xa10] ss:$28 sps:$4 sm:$0xff]  }
 0x2fa   :  { %5777 = vmatpush1.bf16.msra.mxu1 %v7516_v42  ;;  %v7597_v42 = vld [vmem:[#allocation14 + $0x888] ss:$28 sps:$4 sm:$0xff]   ;;  %v2816_v6 = vrot.slane %v2811_v39, %v8474_v36  ;;  %v7688_v39 = vld [vmem:[#allocation14 + $0xa80] ss:$28 sps:$4 sm:$0xff]  }
 0x2fb   :  { %5778 = vmatprep.subr.bf16.mxu1 %v7524_v43  ;;  %5818 = vmatpush1.bf16.msra.mxu0 %v7537_v44  ;;  %v7602_v43 = vld [vmem:[#allocation14 + $0x854] ss:$28 sps:$4 sm:$0xff]   ;;  %v8552_v44 = vsel %vm2860_vm7, %v2852_v14, %v2868_v31  ;;  %v7690_v31 = vld [vmem:[#allocation14 + $0xa84] ss:$28 sps:$4 sm:$0xff]  }
 0x2fc   :  { %5819 = vmatprep.subr.bf16.mxu0 %v7545_v45  ;;  %v2818_v45 = vpack.i.b16 %v2794_v33, %v2794_v33  ;;  %v7626_v14 = vld [vmem:[#allocation14 + $0xa14] ss:$28 sps:$4 sm:$0xff]  }
 0x2fd   :  { %v7627_v33 = vld [vmem:[#allocation14 + $0x9d8] ss:$28 sps:$4 sm:$0xff]  }
 0x2fe   :  { %5779 = vmatpush1.bf16.msra.mxu1 %v7522_v46 }
 0x2ff   :  { %5780 = vmatprep.subr.bf16.mxu1 %v7530_v47  ;;  %5820 = vmatpush1.bf16.msra.mxu0 %v7543_v48 }
 0x300   :  { %5821 = vmatprep.subr.bf16.mxu0 %v7551_v49  ;;  %v7600_v49 = vld [vmem:[#allocation14 + $0x850] ss:$28 sps:$4 sm:$0xff]  }
 0x302   :  { %5781 = vmatpush1.bf16.msra.mxu1 %v7528_v50 }
 0x303   :  { %5782 = vmatprep.subr.bf16.mxu1 %v7536_v51  ;;  %5822 = vmatpush1.bf16.msra.mxu0 %v7549_v53  ;;  %v7605_v53 = vld [vmem:[#allocation14 + $0x81c] ss:$28 sps:$4 sm:$0xff]  }
 0x304   :  { %5823 = vmatprep.subr.bf16.mxu0 %v7557_v54 }
 0x306   :  { %5783 = vmatpush1.bf16.msra.mxu1 %v7534_v55 }
 0x307   :  { %5784 = vmatprep.subr.bf16.mxu1 %v7542_v56  ;;  %5824 = vmatpush1.bf16.msra.mxu0 %v7555_v57  ;;  %v2823_v56 = vrot.slane %v2818_v45, %v8474_v36  ;;  %v7635_v45 = vld [vmem:[#allocation14 + $0x96c] ss:$28 sps:$4 sm:$0xff]  }
 0x308   :  { %5825 = vmatprep.subr.bf16.mxu0 %v7563_v58 }
 0x30a   :  { %5785 = vmatpush2.bf16.msra.mxu1 %v7540_v60 }
 0x30b   :  { %5786 = vmatprep.subr.bf16.mxu1 %v7548_v61  ;;  %5826 = vmatpush2.bf16.msra.mxu0 %v7561_v62  ;;  %v7603_v62 = vld [vmem:[#allocation14 + $0x818] ss:$28 sps:$4 sm:$0xff]  }
 0x30c   :  { %5827 = vmatprep.subr.bf16.mxu0 %v7569_v63 }
 0x30e   :  { %5787 = vmatpush2.bf16.msra.mxu1 %v7546_v0 }
 0x30f   :  { %5788 = vmatprep.subr.bf16.mxu1 %v7554_v1  ;;  %5828 = vmatpush2.bf16.msra.mxu0 %v7567_v2  ;;  %v7608_v1 = vld [vmem:[#allocation14 + $0x7e4] ss:$28 sps:$4 sm:$0xff]  }
 0x310   :  { %5829 = vmatprep.subr.bf16.mxu0 %v7575_v3 }
 0x312   :  { %5789 = vmatpush2.bf16.msra.mxu1 %v7552_v4 }
 0x313   :  { %5790 = vmatprep.subr.bf16.mxu1 %v7560_v5  ;;  %5830 = vmatpush2.bf16.msra.mxu0 %v7573_v7  ;;  %v7606_v5 = vld [vmem:[#allocation14 + $0x7e0] ss:$28 sps:$4 sm:$0xff]   ;;  %v7611_v7 = vld [vmem:[#allocation14 + $0x7ac] ss:$28 sps:$4 sm:$0xff]  }
 0x314   :  { %5831 = vmatprep.subr.bf16.mxu0 %v7581_v8  ;;  %v7646_v8 = vld [vmem:[#allocation14 + $0xc08] ss:$28 sps:$4 sm:$0xff]  }
 0x316   :  { %5791 = vmatpush2.bf16.msra.mxu1 %v7558_v9 }
 0x317   :  { %5792 = vmatprep.subr.bf16.mxu1 %v7566_v10  ;;  %5832 = vmatpush2.bf16.msra.mxu0 %v7579_v11  ;;  %v7654_v10 = vld [vmem:[#allocation14 + $0xbd4] ss:$28 sps:$4 sm:$0xff]  }
 0x318   :  { %5833 = vmatprep.subr.bf16.mxu0 %v7587_v15  ;;  %v7614_v15 = vld [vmem:[#allocation14 + $0x774] ss:$28 sps:$4 sm:$0xff]  }
 0x31a   :  { %5793 = vmatpush2.bf16.msra.mxu1 %v7564_v16  ;;  %v7652_v16 = vld [vmem:[#allocation14 + $0xbd0] ss:$28 sps:$4 sm:$0xff]  }
 0x31b   :  { %5794 = vmatprep.subr.bf16.mxu1 %v7572_v17  ;;  %5834 = vmatpush2.bf16.msra.mxu0 %v7585_v18  ;;  %v7660_v17 = vld [vmem:[#allocation14 + $0xb9c] ss:$28 sps:$4 sm:$0xff]   ;;  %v7612_v18 = vld [vmem:[#allocation14 + $0x770] ss:$28 sps:$4 sm:$0xff]  }
 0x31c   :  { %5835 = vmatprep.subr.bf16.mxu0 %v7590_v35  ;;  %v7666_v35 = vld [vmem:[#allocation14 + $0xb64] ss:$28 sps:$4 sm:$0xff]  }
 0x31e   :  { %5795 = vmatpush2.bf16.msra.mxu1 %v7570_v21  ;;  %v7615_v21 = vld [vmem:[#allocation14 + $0x738] ss:$28 sps:$4 sm:$0xff]  }
 0x31f   :  { %5796 = vmatprep.subr.bf16.mxu1 %v7578_v40  ;;  %5836 = vmatpush2.bf16.msra.mxu0 %v7588_v59  ;;  %v7620_v40 = vld [vmem:[#allocation14 + $0x704] ss:$28 sps:$4 sm:$0xff]  }
 0x320   :  { %5837 = vmatprep.subr.bf16.mxu0 %v7593_v24  ;;  %v7664_v59 = vld [vmem:[#allocation14 + $0xb60] ss:$28 sps:$4 sm:$0xff]   ;;  %v7623_v24 = vld [vmem:[#allocation14 + $0xa4c] ss:$28 sps:$4 sm:$0xff]  }
 0x322   :  { %5797 = vmatpush2.bf16.msra.mxu1 %v7576_v37  ;;  %v7670_v37 = vld [vmem:[#allocation14 + $0xb28] ss:$28 sps:$4 sm:$0xff]  }
 0x323   :  { %5798 = vmatprep.subr.bf16.mxu1 %v7584_v41  ;;  %5838 = vmatpush2.bf16.msra.mxu0 %v7591_v13  ;;  %v7678_v41 = vld [vmem:[#allocation14 + $0xaf4] ss:$28 sps:$4 sm:$0xff]   ;;  %v7621_v13 = vld [vmem:[#allocation14 + $0xa48] ss:$28 sps:$4 sm:$0xff]  }
 0x324   :  { %5839 = vmatprep.subr.bf16.mxu0 %v7596_v25  ;;  %v7676_v25 = vld [vmem:[#allocation14 + $0xaf0] ss:$28 sps:$4 sm:$0xff]  }
 0x326   :  { %5799 = vmatpush2.bf16.msra.mxu1 %v7582_v26  ;;  %v7684_v26 = vld [vmem:[#allocation14 + $0xabc] ss:$28 sps:$4 sm:$0xff]  }
 0x327   :  { %5840 = vmatpush2.bf16.msra.mxu0 %v7594_v28  ;;  %5850 = vmatprep.subr.bf16.mxu1 %v7599_v30  ;;  %v7629_v28 = vld [vmem:[#allocation14 + $0x9dc] ss:$28 sps:$4 sm:$0xff]  }
 0x328   :  { %5891 = vmatprep.subr.bf16.mxu0 %v7648_v34  ;;  %v7682_v30 = vld [vmem:[#allocation14 + $0xab8] ss:$28 sps:$4 sm:$0xff]   ;;  %v7632_v34 = vld [vmem:[#allocation14 + $0x9a4] ss:$28 sps:$4 sm:$0xff]  }
 0x329   :  { %v2525_v46 = vpop.f32.mrf.mxu1  ;;  %v2566_v47 = vpop.f32.mrf.mxu0  ;;  %5801 = vmatmul.mubr.bf16.vlgmr.msra.gmra.mxu1 %v8552_v44 }
 0x32a   :  { %v2567_v48 = vadd.f32 %v2566_v47, %v2525_v46  ;;  %5851 = vmatpush1.bf16.msra.mxu1 %v7597_v42  ;;  %v7696_v42 = vld [vmem:[#allocation14 + $0xdcc] ss:$28 sps:$4 sm:$0xff]   ;;  %v7702_v47 = vld [vmem:[#allocation14 + $0xd94] ss:$28 sps:$4 sm:$0xff]  }
 0x32b   :  { %v2527_v50 = vpop.f32.mrf.mxu1  ;;  %v2568_v51 = vpop.f32.mrf.mxu0  ;;  %5852 = vmatprep.subr.bf16.mxu1 %v7602_v43  ;;  %v7630_v43 = vld [vmem:[#allocation14 + $0x9a0] ss:$28 sps:$4 sm:$0xff]   ;;  %v7694_v46 = vld [vmem:[#allocation14 + $0xdc8] ss:$28 sps:$4 sm:$0xff]  }
 0x32c   :  { %v2739_v54 = vpack.c.bf16 %v2567_v48, %v2567_v48  ;;  %v2569_v55 = vadd.f32 %v2568_v51, %v2527_v50  ;;  %v7633_v48 = vld [vmem:[#allocation14 + $0x968] ss:$28 sps:$4 sm:$0xff]   ;;  %v7708_v50 = vld [vmem:[#allocation14 + $0xd5c] ss:$28 sps:$4 sm:$0xff]   ;;  %v2747_v51 = vcombine.high %v8522_v52, %v8522_v52 }
 0x32d   :  { %v2529_v57 = vpop.f32.mrf.mxu1  ;;  %v2570_v58 = vpop.f32.mrf.mxu0  ;;  %v7643_v52 = vld [vmem:[#allocation14 + $0x8c0] ss:$28 sps:$4 sm:$0xff]  }
 0x32e   :  { %v2854_v60 = vadd.bf16 %v2816_v6, %v2739_v54  ;;  %v2740_v61 = vpack.c.bf16 %v2569_v55, %v2569_v55  ;;  %5853 = vmatpush1.bf16.msra.mxu1 %v7600_v49  ;;  %v7639_v6 = vld [vmem:[#allocation14 + $0x934] ss:$28 sps:$4 sm:$0xff]   ;;  %v7642_v54 = vld [vmem:[#allocation14 + $0x8fc] ss:$28 sps:$4 sm:$0xff]   ;;  %v2761_v57 = vrot.slane %v2747_v51, %v8469_v32  ;;  %v7693_v51 = vld [vmem:[#allocation14 + $0xc] ss:$28 sps:$4 sm:$0xff]  }
 0x32f   :  { %v2530_v63 = vpop.f32.mrf.mxu1  ;;  %v2571_v0 = vpop.f32.mrf.mxu0  ;;  %5854 = vmatprep.subr.bf16.mxu1 %v7605_v53  ;;  %v7700_v49 = vld [vmem:[#allocation14 + $0xd90] ss:$28 sps:$4 sm:$0xff]   ;;  %v7706_v55 = vld [vmem:[#allocation14 + $0xd58] ss:$28 sps:$4 sm:$0xff]  }
 0x330   :  { %v2855_v2 = vadd.bf16 %v2823_v56, %v2740_v61  ;;  %v2870_v3 = vmul.bf16 1045249613, %v2854_v60  ;;  %vm2862_vm9 = vcmp.gt.bf16.partialorder %v2854_v60, 0  ;;  %v7637_v53 = vld [vmem:[#allocation14 + $0x930] ss:$28 sps:$4 sm:$0xff]   ;;  %v2763_v63 = vcombine.high %v2761_v57, %v2761_v57 }
 0x331   :  { %v7714_v56 = vld [vmem:[#allocation14 + $0xd24] ss:$28 sps:$4 sm:$0xff]   ;;  %v7640_v58 = vld [vmem:[#allocation14 + $0x8f8] ss:$28 sps:$4 sm:$0xff]   ;;  %v8567_v0 = vrot.slane %v2761_v57, %v8469_v32 }
 0x332   :  { %v2871_v4 = vmul.bf16 1045249613, %v2855_v2  ;;  %vm2863_vm8 = vcmp.gt.bf16.partialorder %v2855_v2, 0  ;;  %5855 = vmatpush1.bf16.msra.mxu1 %v7603_v62  ;;  %v8560_v11 = vsel %vm2862_vm9, %v2854_v60, %v2870_v3  ;;  %v7645_v60 = vld [vmem:[#allocation14 + $0x8c4] ss:$28 sps:$4 sm:$0xff]  }
 0x333   :  { %5856 = vmatprep.subr.bf16.mxu1 %v7608_v1  ;;  %v7712_v61 = vld [vmem:[#allocation14 + $0xd20] ss:$28 sps:$4 sm:$0xff]   ;;  %v7720_v62 = vld [vmem:[#allocation14 + $0xcec] ss:$28 sps:$4 sm:$0xff]   ;;  %v7651_v1 = vld [vmem:[#allocation14 + $0x194] ss:$28 sps:$4 sm:$0xff]  }
 0x334   :  { %v8557_v9 = vsel %vm2863_vm8, %v2855_v2, %v2871_v4  ;;  %v7718_v2 = vld [vmem:[#allocation14 + $0xce8] ss:$28 sps:$4 sm:$0xff]   ;;  %v7726_v3 = vld [vmem:[#allocation14 + $0xcb4] ss:$28 sps:$4 sm:$0xff]   ;;  %v8570_v4 = vrot.slane %v2763_v63, %v8469_v32 }
 0x335   :  { %5841 = vmatprep.mubr.bf16.mxu0 %v8557_v9  ;;  %v7730_v32 = vld [vmem:[#allocation14 + $0xc78] ss:$28 sps:$4 sm:$0xff]  }
 0x336   :  { %5842 = vmatmul.mubr.bf16.vlgmr.msra.gmra.mxu0 %v8560_v11  ;;  %5857 = vmatpush1.bf16.msra.mxu1 %v7606_v5  ;;  %v2825_v5 = vpack.i.b16 %v8567_v0, %v8567_v0  ;;  %v7703_v57 = vld [vmem:[#allocation14 + $0x318] ss:$28 sps:$4 sm:$0xff]  }
 0x337   :  { %5858 = vmatprep.subr.bf16.mxu1 %v7611_v7  ;;  %5892 = vmatpush1.bf16.msra.mxu0 %v7646_v8  ;;  %v7724_v7 = vld [vmem:[#allocation14 + $0xcb0] ss:$28 sps:$4 sm:$0xff]   ;;  %v7732_v8 = vld [vmem:[#allocation14 + $0xc7c] ss:$28 sps:$4 sm:$0xff]  }
 0x338   :  { %5893 = vmatprep.subr.bf16.mxu0 %v7654_v10  ;;  %v7723_v63 = vld [vmem:[#allocation14 + $0x274] ss:$28 sps:$4 sm:$0xff]  }
 0x33a   :  { %5859 = vmatpush1.bf16.msra.mxu1 %v7609_v12  ;;  %v2832_v12 = vpack.i.b16 %v8570_v4, %v8570_v4 }
 0x33b   :  { %5860 = vmatprep.subr.bf16.mxu1 %v7614_v15  ;;  %5894 = vmatpush1.bf16.msra.mxu0 %v7652_v16 }
 0x33c   :  { %5895 = vmatprep.subr.bf16.mxu0 %v7660_v17  ;;  %v2830_v17 = vrot.slane %v2825_v5, %v8474_v36 }
 0x33e   :  { %5861 = vmatpush1.bf16.msra.mxu1 %v7612_v18 }
 0x33f   :  { %5862 = vmatprep.subr.bf16.mxu1 %v7617_v19  ;;  %5896 = vmatpush1.bf16.msra.mxu0 %v7658_v20  ;;  %v7738_v20 = vld [vmem:[#allocation14 + $0xc44] ss:$28 sps:$4 sm:$0xff]  }
 0x340   :  { %5897 = vmatprep.subr.bf16.mxu0 %v7666_v35 }
 0x342   :  { %5863 = vmatpush1.bf16.msra.mxu1 %v7615_v21 }
 0x343   :  { %5864 = vmatprep.subr.bf16.mxu1 %v7620_v40  ;;  %5898 = vmatpush1.bf16.msra.mxu0 %v7664_v59  ;;  %v2837_v40 = vrot.slane %v2832_v12, %v8474_v36  ;;  %v7735_v12 = vld [vmem:[#allocation14 + $0x204] ss:$28 sps:$4 sm:$0xff]  }
 0x344   :  { %5899 = vmatprep.subr.bf16.mxu0 %v7672_v22 }
 0x346   :  { %5865 = vmatpush1.bf16.msra.mxu1 %v7618_v23 }
 0x347   :  { %5866 = vmatprep.subr.bf16.mxu1 %v7623_v24  ;;  %5900 = vmatpush1.bf16.msra.mxu0 %v7670_v37 }
 0x348   :  { %5901 = vmatprep.subr.bf16.mxu0 %v7678_v41  ;;  %v7736_v41 = vld [vmem:[#allocation14 + $0xc40] ss:$28 sps:$4 sm:$0xff]  }
 0x34a   :  { %5867 = vmatpush2.bf16.msra.mxu1 %v7621_v13 }
 0x34b   :  { %5868 = vmatprep.subr.bf16.mxu1 %v7626_v14  ;;  %5902 = vmatpush1.bf16.msra.mxu0 %v7676_v25  ;;  %v7744_v14 = vld [vmem:[#allocation14 + $0x514] ss:$28 sps:$4 sm:$0xff]  }
 0x34c   :  { %5903 = vmatprep.subr.bf16.mxu0 %v7684_v26 }
 0x34e   :  { %5869 = vmatpush2.bf16.msra.mxu1 %v7624_v27 }
 0x34f   :  { %5870 = vmatprep.subr.bf16.mxu1 %v7629_v28  ;;  %5904 = vmatpush1.bf16.msra.mxu0 %v7682_v30  ;;  %v7649_v28 = vld [vmem:[#allocation14 + $0x190] ss:$28 sps:$4 sm:$0xff]  }
 0x350   :  { %5905 = vmatprep.subr.bf16.mxu0 %v7690_v31  ;;  %v7657_v31 = vld [vmem:[#allocation14 + $0x15c] ss:$28 sps:$4 sm:$0xff]  }
 0x352   :  { %5871 = vmatpush2.bf16.msra.mxu1 %v7627_v33 }
 0x353   :  { %5872 = vmatprep.subr.bf16.mxu1 %v7632_v34  ;;  %5906 = vmatpush1.bf16.msra.mxu0 %v7688_v39  ;;  %v7655_v34 = vld [vmem:[#allocation14 + $0x158] ss:$28 sps:$4 sm:$0xff]   ;;  %v7663_v39 = vld [vmem:[#allocation14 + $0x124] ss:$28 sps:$4 sm:$0xff]  }
 0x354   :  { %5907 = vmatprep.subr.bf16.mxu0 %v7696_v42  ;;  %v7661_v42 = vld [vmem:[#allocation14 + $0x120] ss:$28 sps:$4 sm:$0xff]  }
 0x356   :  { %5873 = vmatpush2.bf16.msra.mxu1 %v7630_v43  ;;  %v7669_v43 = vld [vmem:[#allocation14 + $0xec] ss:$28 sps:$4 sm:$0xff]  }
 0x357   :  { %5874 = vmatprep.subr.bf16.mxu1 %v7635_v45  ;;  %5908 = vmatpush2.bf16.msra.mxu0 %v7694_v46  ;;  %v7667_v45 = vld [vmem:[#allocation14 + $0xe8] ss:$28 sps:$4 sm:$0xff]   ;;  %v7675_v46 = vld [vmem:[#allocation14 + $0xb4] ss:$28 sps:$4 sm:$0xff]  }
 0x358   :  { %5909 = vmatprep.subr.bf16.mxu0 %v7702_v47  ;;  %v7673_v47 = vld [vmem:[#allocation14 + $0xb0] ss:$28 sps:$4 sm:$0xff]  }
 0x35a   :  { %5875 = vmatpush2.bf16.msra.mxu1 %v7633_v48  ;;  %v7681_v48 = vld [vmem:[#allocation14 + $0x7c] ss:$28 sps:$4 sm:$0xff]  }
 0x35b   :  { %5876 = vmatprep.subr.bf16.mxu1 %v7639_v6  ;;  %5910 = vmatpush2.bf16.msra.mxu0 %v7700_v49  ;;  %v7679_v6 = vld [vmem:[#allocation14 + $0x78] ss:$28 sps:$4 sm:$0xff]   ;;  %v7687_v49 = vld [vmem:[#allocation14 + $0x44] ss:$28 sps:$4 sm:$0xff]  }
 0x35c   :  { %5911 = vmatprep.subr.bf16.mxu0 %v7708_v50  ;;  %v7685_v50 = vld [vmem:[#allocation14 + $0x40] ss:$28 sps:$4 sm:$0xff]  }
 0x35e   :  { %5877 = vmatpush2.bf16.msra.mxu1 %v7637_v53  ;;  %v7691_v53 = vld [vmem:[#allocation14 + $0x8] ss:$28 sps:$4 sm:$0xff]  }
 0x35f   :  { %5878 = vmatprep.subr.bf16.mxu1 %v7642_v54  ;;  %5912 = vmatpush2.bf16.msra.mxu0 %v7706_v55  ;;  %v7699_v54 = vld [vmem:[#allocation14 + $0x354] ss:$28 sps:$4 sm:$0xff]  }
 0x360   :  { %5913 = vmatprep.subr.bf16.mxu0 %v7714_v56  ;;  %v7697_v55 = vld [vmem:[#allocation14 + $0x350] ss:$28 sps:$4 sm:$0xff]   ;;  %v7705_v56 = vld [vmem:[#allocation14 + $0x31c] ss:$28 sps:$4 sm:$0xff]  }
 0x362   :  { %5879 = vmatpush2.bf16.msra.mxu1 %v7640_v58  ;;  %v7711_v58 = vld [vmem:[#allocation14 + $0x2e4] ss:$28 sps:$4 sm:$0xff]  }
 0x363   :  { %5880 = vmatprep.subr.bf16.mxu1 %v7645_v60  ;;  %5914 = vmatpush2.bf16.msra.mxu0 %v7712_v61  ;;  %v7709_v60 = vld [vmem:[#allocation14 + $0x2e0] ss:$28 sps:$4 sm:$0xff]   ;;  %v7717_v61 = vld [vmem:[#allocation14 + $0x2ac] ss:$28 sps:$4 sm:$0xff]  }
 0x364   :  { %5915 = vmatprep.subr.bf16.mxu0 %v7720_v62  ;;  %v7715_v62 = vld [vmem:[#allocation14 + $0x2a8] ss:$28 sps:$4 sm:$0xff]  }
 0x366   :  { %5881 = vmatpush2.bf16.msra.mxu1 %v7643_v52  ;;  %v2793_v52 = vcombine.high %v8567_v0, %v8567_v0 }
 0x367   :  { %5932 = vmatprep.subr.bf16.mxu1 %v7651_v1  ;;  %5916 = vmatpush2.bf16.msra.mxu0 %v7718_v2  ;;  %v7721_v1 = vld [vmem:[#allocation14 + $0x270] ss:$28 sps:$4 sm:$0xff]   ;;  %v7729_v2 = vld [vmem:[#allocation14 + $0x23c] ss:$28 sps:$4 sm:$0xff]  }
 0x368   :  { %5917 = vmatprep.subr.bf16.mxu0 %v7726_v3  ;;  %v2795_v3 = vcombine.high %v8570_v4, %v8570_v4  ;;  %v2839_v5 = vpack.i.b16 %v2793_v52, %v2793_v52  ;;  %v7778_v52 = vld [vmem:[#allocation14 + $0x3c0] ss:$28 sps:$4 sm:$0xff]  }
 0x369   :  { %v2607_v10 = vpop.f32.mrf.mxu1 }
 0x36a   :  { %v2648_v15 = vpop.f32.mrf.mxu0 }
 0x36b   :  { %v2649_v16 = vadd.f32 %v2648_v15, %v2607_v10  ;;  %v2609_v18 = vpop.f32.mrf.mxu1  ;;  %5918 = vmatpush2.bf16.msra.mxu0 %v7724_v7  ;;  %v7727_v7 = vld [vmem:[#allocation14 + $0x238] ss:$28 sps:$4 sm:$0xff]   ;;  %v2846_v10 = vpack.i.b16 %v2795_v3, %v2795_v3  ;;  %v7789_v3 = vld [vmem:[#allocation14 + $0x70c] ss:$28 sps:$4 sm:$0xff]  }
 0x36c   :  { %v2650_v19 = vpop.f32.mrf.mxu0  ;;  %5919 = vmatprep.subr.bf16.mxu0 %v7732_v8 }
 0x36d   :  { %v2741_v35 = vpack.c.bf16 %v2649_v16, %v2649_v16  ;;  %v2651_v21 = vadd.f32 %v2650_v19, %v2609_v18  ;;  %v2611_v59 = vpop.f32.mrf.mxu1 }
 0x36e   :  { %v2652_v22 = vpop.f32.mrf.mxu0 }
 0x36f   :  { %v2856_v23 = vadd.bf16 %v2830_v17, %v2741_v35  ;;  %v2742_v24 = vpack.c.bf16 %v2651_v21, %v2651_v21  ;;  %v2612_v37 = vpop.f32.mrf.mxu1  ;;  %5920 = vmatpush2.bf16.msra.mxu0 %v7730_v32  ;;  %v2844_v17 = vrot.slane %v2839_v5, %v8474_v36  ;;  %v7733_v32 = vld [vmem:[#allocation14 + $0x200] ss:$28 sps:$4 sm:$0xff]   ;;  %v2851_v35 = vrot.slane %v2846_v10, %v8474_v36  ;;  %v7741_v21 = vld [vmem:[#allocation14 + $0x1cc] ss:$28 sps:$4 sm:$0xff]   ;;  %v7795_v10 = vld [vmem:[#allocation14 + $0xa54] ss:$28 sps:$4 sm:$0xff]  }
 0x370   :  { %v2653_v13 = vpop.f32.mrf.mxu0  ;;  %5921 = vmatprep.subr.bf16.mxu0 %v7738_v20  ;;  %v7739_v37 = vld [vmem:[#allocation14 + $0x1c8] ss:$28 sps:$4 sm:$0xff]  }
 0x371   :  { %v2857_v25 = vadd.bf16 %v2837_v40, %v2742_v24  ;;  %v2872_v26 = vmul.bf16 1045249613, %v2856_v23  ;;  %vm2864_vm11 = vcmp.gt.bf16.partialorder %v2856_v23, 0  ;;  %v7747_v13 = vld [vmem:[#allocation14 + $0x894] ss:$28 sps:$4 sm:$0xff]  }
 0x372   :  { %v7784_v5 = vld [vmem:[#allocation14 + $0x388] ss:$28 sps:$4 sm:$0xff]  }
 0x373   :  { %v2873_v27 = vmul.bf16 1045249613, %v2857_v25  ;;  %vm2865_vm10 = vcmp.gt.bf16.partialorder %v2857_v25, 0  ;;  %5922 = vmatpush2.bf16.msra.mxu0 %v7736_v41  ;;  %v8581_v33 = vsel %vm2864_vm11, %v2856_v23, %v2872_v26  ;;  %v7742_v26 = vld [vmem:[#allocation14 + $0x510] ss:$28 sps:$4 sm:$0xff]  }
 0x374   :  { %5973 = vmatprep.subr.bf16.mxu0 %v7744_v14 }
 0x375   :  { %v8578_v30 = vsel %vm2865_vm10, %v2857_v25, %v2873_v27  ;;  %v7745_v27 = vld [vmem:[#allocation14 + $0x890] ss:$28 sps:$4 sm:$0xff]  }
 0x376   :  { %5882 = vmatprep.mubr.bf16.mxu1 %v8578_v30 }
 0x377   :  { %5883 = vmatmul.mubr.bf16.vlgmr.msra.gmra.mxu1 %v8581_v33 }
 0x378   :  { %5933 = vmatpush1.bf16.msra.mxu1 %v7649_v28  ;;  %5964 = vmatprep.mubr.bf16.mxu1 %v8542_v38 }
 0x379   :  { %5934 = vmatprep.subr.bf16.mxu1 %v7657_v31 }
 0x37c   :  { %5935 = vmatpush1.bf16.msra.mxu1 %v7655_v34  ;;  %v7750_v34 = vld [vmem:[#allocation14 + $0x4dc] ss:$28 sps:$4 sm:$0xff]  }
 0x37d   :  { %5936 = vmatprep.subr.bf16.mxu1 %v7663_v39  ;;  %v7753_v39 = vld [vmem:[#allocation14 + $0x85c] ss:$28 sps:$4 sm:$0xff]  }
 0x380   :  { %5937 = vmatpush1.bf16.msra.mxu1 %v7661_v42  ;;  %v7748_v42 = vld [vmem:[#allocation14 + $0x4d8] ss:$28 sps:$4 sm:$0xff]  }
 0x381   :  { %5938 = vmatprep.subr.bf16.mxu1 %v7669_v43  ;;  %v7751_v43 = vld [vmem:[#allocation14 + $0x858] ss:$28 sps:$4 sm:$0xff]  }
 0x384   :  { %5939 = vmatpush1.bf16.msra.mxu1 %v7667_v45  ;;  %v7756_v45 = vld [vmem:[#allocation14 + $0x4a4] ss:$28 sps:$4 sm:$0xff]  }
 0x385   :  { %5940 = vmatprep.subr.bf16.mxu1 %v7675_v46  ;;  %v7759_v46 = vld [vmem:[#allocation14 + $0x824] ss:$28 sps:$4 sm:$0xff]  }
 0x388   :  { %5941 = vmatpush1.bf16.msra.mxu1 %v7673_v47  ;;  %v7754_v47 = vld [vmem:[#allocation14 + $0x4a0] ss:$28 sps:$4 sm:$0xff]  }
 0x389   :  { %5942 = vmatprep.subr.bf16.mxu1 %v7681_v48  ;;  %v7757_v48 = vld [vmem:[#allocation14 + $0x820] ss:$28 sps:$4 sm:$0xff]  }
 0x38c   :  { %5943 = vmatpush1.bf16.msra.mxu1 %v7679_v6  ;;  %v7762_v6 = vld [vmem:[#allocation14 + $0x46c] ss:$28 sps:$4 sm:$0xff]  }
 0x38d   :  { %5944 = vmatprep.subr.bf16.mxu1 %v7687_v49  ;;  %v7765_v49 = vld [vmem:[#allocation14 + $0x7ec] ss:$28 sps:$4 sm:$0xff]  }
 0x390   :  { %5945 = vmatpush1.bf16.msra.mxu1 %v7685_v50  ;;  %v7760_v50 = vld [vmem:[#allocation14 + $0x468] ss:$28 sps:$4 sm:$0xff]  }
 0x391   :  { %5946 = vmatprep.subr.bf16.mxu1 %v7693_v51  ;;  %v7763_v51 = vld [vmem:[#allocation14 + $0x7e8] ss:$28 sps:$4 sm:$0xff]  }
 0x394   :  { %5947 = vmatpush1.bf16.msra.mxu1 %v7691_v53  ;;  %v7768_v53 = vld [vmem:[#allocation14 + $0x434] ss:$28 sps:$4 sm:$0xff]  }
 0x395   :  { %5948 = vmatprep.subr.bf16.mxu1 %v7699_v54  ;;  %v7771_v54 = vld [vmem:[#allocation14 + $0x7b4] ss:$28 sps:$4 sm:$0xff]  }
 0x398   :  { %5949 = vmatpush2.bf16.msra.mxu1 %v7697_v55  ;;  %v7766_v55 = vld [vmem:[#allocation14 + $0x430] ss:$28 sps:$4 sm:$0xff]  }
 0x399   :  { %5950 = vmatprep.subr.bf16.mxu1 %v7705_v56  ;;  %v7769_v56 = vld [vmem:[#allocation14 + $0x7b0] ss:$28 sps:$4 sm:$0xff]  }
 0x39c   :  { %5951 = vmatpush2.bf16.msra.mxu1 %v7703_v57  ;;  %v7774_v57 = vld [vmem:[#allocation14 + $0x3fc] ss:$28 sps:$4 sm:$0xff]  }
 0x39d   :  { %5952 = vmatprep.subr.bf16.mxu1 %v7711_v58  ;;  %v7777_v58 = vld [vmem:[#allocation14 + $0x77c] ss:$28 sps:$4 sm:$0xff]  }
 0x3a0   :  { %5953 = vmatpush2.bf16.msra.mxu1 %v7709_v60  ;;  %v7772_v60 = vld [vmem:[#allocation14 + $0x3f8] ss:$28 sps:$4 sm:$0xff]  }
 0x3a1   :  { %5954 = vmatprep.subr.bf16.mxu1 %v7717_v61  ;;  %v7775_v61 = vld [vmem:[#allocation14 + $0x778] ss:$28 sps:$4 sm:$0xff]  }
 0x3a4   :  { %5955 = vmatpush2.bf16.msra.mxu1 %v7715_v62  ;;  %v7780_v62 = vld [vmem:[#allocation14 + $0x3c4] ss:$28 sps:$4 sm:$0xff]  }
 0x3a5   :  { %5956 = vmatprep.subr.bf16.mxu1 %v7723_v63  ;;  %v7783_v63 = vld [vmem:[#allocation14 + $0x744] ss:$28 sps:$4 sm:$0xff]  }
 0x3a8   :  { %5957 = vmatpush2.bf16.msra.mxu1 %v7721_v1  ;;  %v7781_v1 = vld [vmem:[#allocation14 + $0x740] ss:$28 sps:$4 sm:$0xff]  }
 0x3a9   :  { %v2689_v8 = vpop.f32.mrf.mxu1  ;;  %5958 = vmatprep.subr.bf16.mxu1 %v7729_v2  ;;  %v7786_v2 = vld [vmem:[#allocation14 + $0x38c] ss:$28 sps:$4 sm:$0xff]  }
 0x3aa   :  { %v2730_v15 = vpop.f32.mrf.mxu0 }
 0x3ab   :  { %v2731_v16 = vadd.f32 %v2730_v15, %v2689_v8  ;;  %v2691_v18 = vpop.f32.mrf.mxu1  ;;  %v7792_v8 = vld [vmem:[#allocation14 + $0x6d4] ss:$28 sps:$4 sm:$0xff]  }
 0x3ac   :  { %5959 = vmatpush2.bf16.msra.mxu1 %v7727_v7  ;;  %v2732_v0 = vpop.f32.mrf.mxu0  ;;  %v7787_v7 = vld [vmem:[#allocation14 + $0x708] ss:$28 sps:$4 sm:$0xff]   ;;  %v7793_v15 = vld [vmem:[#allocation14 + $0xa50] ss:$28 sps:$4 sm:$0xff]  }
 0x3ad   :  { %v2743_v19 = vpack.c.bf16 %v2731_v16, %v2731_v16  ;;  %v2733_v20 = vadd.f32 %v2732_v0, %v2691_v18  ;;  %v2693_v4 = vpop.f32.mrf.mxu1  ;;  %5960 = vmatprep.subr.bf16.mxu1 %v7735_v12  ;;  %v7790_v12 = vld [vmem:[#allocation14 + $0x6d0] ss:$28 sps:$4 sm:$0xff]   ;;  %v7798_v16 = vld [vmem:[#allocation14 + $0x69c] ss:$28 sps:$4 sm:$0xff]  }
 0x3ae   :  { %v2734_v40 = vpop.f32.mrf.mxu0  ;;  %v7796_v18 = vld [vmem:[#allocation14 + $0x698] ss:$28 sps:$4 sm:$0xff]   ;;  %v7810_v4 = vld [vmem:[#allocation14 + $0x62c] ss:$28 sps:$4 sm:$0xff]  }
 0x3af   :  { %v2858_v59 = vadd.bf16 %v2844_v17, %v2743_v19  ;;  %v2744_v22 = vpack.c.bf16 %v2733_v20, %v2733_v20  ;;  %v2694_v23 = vpop.f32.mrf.mxu1  ;;  %v7801_v17 = vld [vmem:[#allocation14 + $0xa1c] ss:$28 sps:$4 sm:$0xff]   ;;  %v7807_v19 = vld [vmem:[#allocation14 + $0x9e4] ss:$28 sps:$4 sm:$0xff]  }
 0x3b0   :  { %5961 = vmatpush2.bf16.msra.mxu1 %v7733_v32  ;;  %v2735_v24 = vpop.f32.mrf.mxu0  ;;  %v7799_v0 = vld [vmem:[#allocation14 + $0xa18] ss:$28 sps:$4 sm:$0xff]   ;;  %v7804_v32 = vld [vmem:[#allocation14 + $0x664] ss:$28 sps:$4 sm:$0xff]  }
 0x3b1   :  { %v2859_v41 = vadd.bf16 %v2851_v35, %v2744_v22  ;;  %5962 = vmatprep.subr.bf16.mxu1 %v7741_v21  ;;  %v2874_v14 = vmul.bf16 1045249613, %v2858_v59  ;;  %vm2866_vm13 = vcmp.gt.bf16.partialorder %v2858_v59, 0  ;;  %v7802_v20 = vld [vmem:[#allocation14 + $0x660] ss:$28 sps:$4 sm:$0xff]  }
 0x3b2   :  { %v7805_v35 = vld [vmem:[#allocation14 + $0x9e0] ss:$28 sps:$4 sm:$0xff]   ;;  %v7813_v21 = vld [vmem:[#allocation14 + $0x9ac] ss:$28 sps:$4 sm:$0xff]   ;;  %v7816_v22 = vld [vmem:[#allocation14 + $0x5f4] ss:$28 sps:$4 sm:$0xff]  }
 0x3b3   :  { %v2875_v25 = vmul.bf16 1045249613, %v2859_v41  ;;  %vm2867_vm12 = vcmp.gt.bf16.partialorder %v2859_v41, 0  ;;  %v8594_v31 = vsel %vm2866_vm13, %v2858_v59, %v2874_v14  ;;  %v7808_v40 = vld [vmem:[#allocation14 + $0x628] ss:$28 sps:$4 sm:$0xff]  }
 0x3b4   :  { %5963 = vmatpush2.bf16.msra.mxu1 %v7739_v37  ;;  %v7811_v59 = vld [vmem:[#allocation14 + $0x9a8] ss:$28 sps:$4 sm:$0xff]   ;;  %v7819_v23 = vld [vmem:[#allocation14 + $0x974] ss:$28 sps:$4 sm:$0xff]  }
 0x3b5   :  { %v8591_v28 = vsel %vm2867_vm12, %v2859_v41, %v2875_v25  ;;  %6014 = vmatprep.subr.bf16.mxu1 %v7747_v13  ;;  %v7814_v24 = vld [vmem:[#allocation14 + $0x5f0] ss:$28 sps:$4 sm:$0xff]   ;;  %v7822_v41 = vld [vmem:[#allocation14 + $0x5bc] ss:$28 sps:$4 sm:$0xff]   ;;  %v3396_v14 = vld [vmem:[#allocation16] sm:$0x7f] }
 0x3b6   :  { %5923 = vmatprep.mubr.bf16.mxu0 %v8591_v28  ;;  %v7817_v37 = vld [vmem:[#allocation14 + $0x970] ss:$28 sps:$4 sm:$0xff]   ;;  %v7825_v13 = vld [vmem:[#allocation14 + $0x93c] ss:$28 sps:$4 sm:$0xff]  }
 0x3b7   :  { %5965 = vmatmul.mubr.bf16.vlgmr.msra.gmra.mxu1 %v8552_v44  ;;  %5924 = vmatmul.mubr.bf16.vlgmr.msra.gmra.mxu0 %v8594_v31  ;;  %v7820_v25 = vld [vmem:[#allocation14 + $0x5b8] ss:$28 sps:$4 sm:$0xff]  }
 0x3b8   :  { %5974 = vmatpush1.bf16.msra.mxu0 %v7742_v26  ;;  %6015 = vmatpush1.bf16.msra.mxu1 %v7745_v27  ;;  %v7823_v26 = vld [vmem:[#allocation14 + $0x938] ss:$28 sps:$4 sm:$0xff]   ;;  %v8600_v27 = vunpack.c.l.bf16 %v3396_v14  ;;  %v7879_v14 = vld [vmem:[#allocation14 + $0x4c] ss:$28 sps:$4 sm:$0xff]  }
 0x3b9   :  { %6046 = vmatprep.mubr.bf16.mxu1 %v8578_v30  ;;  %6005 = vmatprep.mubr.bf16.mxu0 %v8557_v9 }
 0x3ba   :  { %5975 = vmatprep.subr.bf16.mxu0 %v7750_v34  ;;  %6016 = vmatprep.subr.bf16.mxu1 %v7753_v39  ;;  %v7828_v39 = vld [vmem:[#allocation14 + $0x584] ss:$28 sps:$4 sm:$0xff]  }
 0x3bc   :  { %5976 = vmatpush1.bf16.msra.mxu0 %v7748_v42  ;;  %6017 = vmatpush1.bf16.msra.mxu1 %v7751_v43  ;;  %v7831_v42 = vld [vmem:[#allocation14 + $0x904] ss:$28 sps:$4 sm:$0xff]   ;;  %v3407_v43 = vsub.s32 2, %v8466_v29 }
 0x3bd   :  { %5977 = vmatprep.subr.bf16.mxu0 %v7756_v45  ;;  %6018 = vmatprep.subr.bf16.mxu1 %v7759_v46  ;;  %v7826_v46 = vld [vmem:[#allocation14 + $0x580] ss:$28 sps:$4 sm:$0xff]  }
 0x3c0   :  { %5978 = vmatpush1.bf16.msra.mxu0 %v7754_v47  ;;  %6019 = vmatpush1.bf16.msra.mxu1 %v7757_v48  ;;  %v7829_v47 = vld [vmem:[#allocation14 + $0x900] ss:$28 sps:$4 sm:$0xff]   ;;  %v3404_v48 = vrot.slane %v8600_v27, %v8474_v36 }
 0x3c1   :  { %5979 = vmatprep.subr.bf16.mxu0 %v7762_v6  ;;  %6020 = vmatprep.subr.bf16.mxu1 %v7765_v49  ;;  %v7834_v49 = vld [vmem:[#allocation14 + $0x54c] ss:$28 sps:$4 sm:$0xff]  }
 0x3c4   :  { %5980 = vmatpush1.bf16.msra.mxu0 %v7760_v50  ;;  %6021 = vmatpush1.bf16.msra.mxu1 %v7763_v51  ;;  %v7837_v50 = vld [vmem:[#allocation14 + $0x8cc] ss:$28 sps:$4 sm:$0xff]   ;;  %v3408_v51 = vrot.slane %v8600_v27, %v3407_v43 }
 0x3c5   :  { %5981 = vmatprep.subr.bf16.mxu0 %v7768_v53  ;;  %6022 = vmatprep.subr.bf16.mxu1 %v7771_v54  ;;  %v7832_v54 = vld [vmem:[#allocation14 + $0x548] ss:$28 sps:$4 sm:$0xff]  }
 0x3c8   :  { %5982 = vmatpush1.bf16.msra.mxu0 %v7766_v55  ;;  %6023 = vmatpush1.bf16.msra.mxu1 %v7769_v56  ;;  %v7835_v55 = vld [vmem:[#allocation14 + $0x8c8] ss:$28 sps:$4 sm:$0xff]   ;;  %v3439_v56 = vrot.slane %v3404_v48, %v8474_v36  ;;  %v7886_v48 = vld [vmem:[#allocation14 + $0xdd0] ss:$28 sps:$4 sm:$0xff]  }
 0x3c9   :  { %5983 = vmatprep.subr.bf16.mxu0 %v7774_v57  ;;  %6024 = vmatprep.subr.bf16.mxu1 %v7777_v58  ;;  %v7840_v57 = vld [vmem:[#allocation14 + $0xc14] ss:$28 sps:$4 sm:$0xff]   ;;  %v7843_v58 = vld [vmem:[#allocation14 + $0x19c] ss:$28 sps:$4 sm:$0xff]  }
 0x3cc   :  { %5984 = vmatpush1.bf16.msra.mxu0 %v7772_v60  ;;  %6025 = vmatpush1.bf16.msra.mxu1 %v7775_v61  ;;  %v3443_v60 = vrot.slane %v3408_v51, %v8474_v36  ;;  %v7838_v61 = vld [vmem:[#allocation14 + $0xc10] ss:$28 sps:$4 sm:$0xff]   ;;  %v7892_v51 = vld [vmem:[#allocation14 + $0xd98] ss:$28 sps:$4 sm:$0xff]  }
 0x3cd   :  { %5985 = vmatprep.subr.bf16.mxu0 %v7780_v62  ;;  %6026 = vmatprep.subr.bf16.mxu1 %v7783_v63  ;;  %v7841_v63 = vld [vmem:[#allocation14 + $0x198] ss:$28 sps:$4 sm:$0xff]  }
 0x3d0   :  { %5986 = vmatpush1.bf16.msra.mxu0 %v7778_v52  ;;  %6027 = vmatpush1.bf16.msra.mxu1 %v7781_v1  ;;  %v7846_v1 = vld [vmem:[#allocation14 + $0xbdc] ss:$28 sps:$4 sm:$0xff]  }
 0x3d1   :  { %5987 = vmatprep.subr.bf16.mxu0 %v7786_v2  ;;  %6028 = vmatprep.subr.bf16.mxu1 %v7789_v3  ;;  %v7849_v2 = vld [vmem:[#allocation14 + $0x164] ss:$28 sps:$4 sm:$0xff]  }
 0x3d4   :  { %5988 = vmatpush1.bf16.msra.mxu0 %v7784_v5  ;;  %6029 = vmatpush1.bf16.msra.mxu1 %v7787_v7 }
 0x3d5   :  { %5989 = vmatprep.subr.bf16.mxu0 %v7792_v8  ;;  %6030 = vmatprep.subr.bf16.mxu1 %v7795_v10  ;;  %v7844_v8 = vld [vmem:[#allocation14 + $0xbd8] ss:$28 sps:$4 sm:$0xff]  }
 0x3d8   :  { %5990 = vmatpush2.bf16.msra.mxu0 %v7790_v12  ;;  %6031 = vmatpush2.bf16.msra.mxu1 %v7793_v15  ;;  %v7847_v12 = vld [vmem:[#allocation14 + $0x160] ss:$28 sps:$4 sm:$0xff]  }
 0x3d9   :  { %5991 = vmatprep.subr.bf16.mxu0 %v7798_v16  ;;  %6032 = vmatprep.subr.bf16.mxu1 %v7801_v17  ;;  %v7852_v15 = vld [vmem:[#allocation14 + $0xba4] ss:$28 sps:$4 sm:$0xff]   ;;  %v7855_v17 = vld [vmem:[#allocation14 + $0x12c] ss:$28 sps:$4 sm:$0xff]  }
 0x3dc   :  { %5992 = vmatpush2.bf16.msra.mxu0 %v7796_v18  ;;  %6033 = vmatpush2.bf16.msra.mxu1 %v7799_v0  ;;  %v7850_v0 = vld [vmem:[#allocation14 + $0xba0] ss:$28 sps:$4 sm:$0xff]  }
 0x3dd   :  { %5993 = vmatprep.subr.bf16.mxu0 %v7804_v32  ;;  %6034 = vmatprep.subr.bf16.mxu1 %v7807_v19  ;;  %v7853_v32 = vld [vmem:[#allocation14 + $0x128] ss:$28 sps:$4 sm:$0xff]  }
 0x3de   :  { %v7858_v19 = vld [vmem:[#allocation14 + $0xb6c] ss:$28 sps:$4 sm:$0xff]  }
 0x3e0   :  { %5994 = vmatpush2.bf16.msra.mxu0 %v7802_v20  ;;  %6035 = vmatpush2.bf16.msra.mxu1 %v7805_v35  ;;  %v7861_v20 = vld [vmem:[#allocation14 + $0xf4] ss:$28 sps:$4 sm:$0xff]   ;;  %v7856_v35 = vld [vmem:[#allocation14 + $0xb68] ss:$28 sps:$4 sm:$0xff]  }
 0x3e1   :  { %5995 = vmatprep.subr.bf16.mxu0 %v7810_v4  ;;  %6036 = vmatprep.subr.bf16.mxu1 %v7813_v21  ;;  %v7859_v4 = vld [vmem:[#allocation14 + $0xf0] ss:$28 sps:$4 sm:$0xff]  }
 0x3e2   :  { %v7864_v21 = vld [vmem:[#allocation14 + $0xb34] ss:$28 sps:$4 sm:$0xff]  }
 0x3e4   :  { %5996 = vmatpush2.bf16.msra.mxu0 %v7808_v40  ;;  %6037 = vmatpush2.bf16.msra.mxu1 %v7811_v59  ;;  %v7867_v40 = vld [vmem:[#allocation14 + $0xbc] ss:$28 sps:$4 sm:$0xff]   ;;  %v7862_v59 = vld [vmem:[#allocation14 + $0xb30] ss:$28 sps:$4 sm:$0xff]  }
 0x3e5   :  { %5997 = vmatprep.subr.bf16.mxu0 %v7816_v22  ;;  %6038 = vmatprep.subr.bf16.mxu1 %v7819_v23  ;;  %v7865_v22 = vld [vmem:[#allocation14 + $0xb8] ss:$28 sps:$4 sm:$0xff]  }
 0x3e6   :  { %v7870_v23 = vld [vmem:[#allocation14 + $0xafc] ss:$28 sps:$4 sm:$0xff]  }
 0x3e8   :  { %5998 = vmatpush2.bf16.msra.mxu0 %v7814_v24  ;;  %6039 = vmatpush2.bf16.msra.mxu1 %v7817_v37  ;;  %v7873_v24 = vld [vmem:[#allocation14 + $0x84] ss:$28 sps:$4 sm:$0xff]   ;;  %v7868_v37 = vld [vmem:[#allocation14 + $0xaf8] ss:$28 sps:$4 sm:$0xff]  }
 0x3e9   :  { %v5802_v34 = vpop.f32.mrf.mxu1  ;;  %5999 = vmatprep.subr.bf16.mxu0 %v7822_v41  ;;  %6040 = vmatprep.subr.bf16.mxu1 %v7825_v13  ;;  %v7871_v41 = vld [vmem:[#allocation14 + $0x80] ss:$28 sps:$4 sm:$0xff]  }
 0x3ea   :  { %v5803_v62 = vadd.f32 %v5802_v34, %v3439_v56  ;;  %v7876_v13 = vld [vmem:[#allocation14 + $0xac4] ss:$28 sps:$4 sm:$0xff]   ;;  %v7882_v34 = vld [vmem:[#allocation14 + $0xa8c] ss:$28 sps:$4 sm:$0xff]  }
 0x3eb   :  { %v5804_v45 = vpop.f32.mrf.mxu1  ;;  %v7898_v56 = vld [vmem:[#allocation14 + $0xd60] ss:$28 sps:$4 sm:$0xff]  }
 0x3ec   :  { %6000 = vmatpush2.bf16.msra.mxu0 %v7820_v25  ;;  %6041 = vmatpush2.bf16.msra.mxu1 %v7823_v26  ;;  %v5805_v3 = vadd.f32 %v5804_v45, %v3443_v60  ;;  %v7874_v25 = vld [vmem:[#allocation14 + $0xac0] ss:$28 sps:$4 sm:$0xff]   ;;  %v7877_v26 = vld [vmem:[#allocation14 + $0x48] ss:$28 sps:$4 sm:$0xff]   ;;  %v7883_v45 = vld [vmem:[#allocation14 + $0x10] ss:$28 sps:$4 sm:$0xff]  }
 0x3ed   :  { %v5806_v6 = vpop.f32.mrf.mxu1  ;;  %6001 = vmatprep.subr.bf16.mxu0 %v7828_v39  ;;  %6042 = vmatprep.subr.bf16.mxu1 %v7831_v42  ;;  %v7885_v39 = vld [vmem:[#allocation14 + $0x14] ss:$28 sps:$4 sm:$0xff]   ;;  %v7880_v42 = vld [vmem:[#allocation14 + $0xa88] ss:$28 sps:$4 sm:$0xff]  }
 0x3ee   :  { %v7889_v6 = vld [vmem:[#allocation14 + $0x358] ss:$28 sps:$4 sm:$0xff]  }
 0x3ef   :  { %v5807_v53 = vpop.f32.mrf.mxu1  ;;  %v7909_v60 = vld [vmem:[#allocation14 + $0x2b4] ss:$28 sps:$4 sm:$0xff]  }
 0x3f0   :  { %6002 = vmatpush2.bf16.msra.mxu0 %v7826_v46  ;;  %6043 = vmatpush2.bf16.msra.mxu1 %v7829_v47  ;;  %v7888_v46 = vld [vmem:[#allocation14 + $0xdd4] ss:$28 sps:$4 sm:$0xff]   ;;  %v7891_v47 = vld [vmem:[#allocation14 + $0x35c] ss:$28 sps:$4 sm:$0xff]  }
 0x3f1   :  { %6003 = vmatprep.subr.bf16.mxu0 %v7834_v49  ;;  %6044 = vmatprep.subr.bf16.mxu1 %v7837_v50  ;;  %v7894_v49 = vld [vmem:[#allocation14 + $0xd9c] ss:$28 sps:$4 sm:$0xff]   ;;  %v7897_v50 = vld [vmem:[#allocation14 + $0x324] ss:$28 sps:$4 sm:$0xff]  }
 0x3f2   :  { %v7895_v53 = vld [vmem:[#allocation14 + $0x320] ss:$28 sps:$4 sm:$0xff]  }
 0x3f4   :  { %6004 = vmatpush2.bf16.msra.mxu0 %v7832_v54  ;;  %6045 = vmatpush2.bf16.msra.mxu1 %v7835_v55  ;;  %v7900_v54 = vld [vmem:[#allocation14 + $0xd64] ss:$28 sps:$4 sm:$0xff]   ;;  %v7903_v55 = vld [vmem:[#allocation14 + $0x2ec] ss:$28 sps:$4 sm:$0xff]  }
 0x3f5   :  { %6055 = vmatprep.subr.bf16.mxu0 %v7840_v57  ;;  %6096 = vmatprep.subr.bf16.mxu1 %v7843_v58  ;;  %v7901_v57 = vld [vmem:[#allocation14 + $0x2e8] ss:$28 sps:$4 sm:$0xff]  }
 0x3f6   :  { %v5843_v52 = vpop.f32.mrf.mxu0  ;;  %v7906_v58 = vld [vmem:[#allocation14 + $0xd2c] ss:$28 sps:$4 sm:$0xff]  }
 0x3f7   :  { %6006 = vmatmul.mubr.bf16.vlgmr.msra.gmra.mxu0 %v8560_v11  ;;  %6047 = vmatmul.mubr.bf16.vlgmr.msra.gmra.mxu1 %v8581_v33  ;;  %v8612_v5 = vadd.f32 %v5843_v52, %v5803_v62  ;;  %v7907_v62 = vld [vmem:[#allocation14 + $0x2b0] ss:$28 sps:$4 sm:$0xff]   ;;  %v7915_v52 = vld [vmem:[#allocation14 + $0x27c] ss:$28 sps:$4 sm:$0xff]  }
 0x3f8   :  { %6056 = vmatpush1.bf16.msra.mxu0 %v7838_v61  ;;  %6087 = vmatprep.mubr.bf16.mxu0 %v8591_v28  ;;  %v5845_v7 = vpop.f32.mrf.mxu0  ;;  %v7904_v61 = vld [vmem:[#allocation14 + $0xd28] ss:$28 sps:$4 sm:$0xff]  }
 0x3f9   :  { %6097 = vmatpush1.bf16.msra.mxu1 %v7841_v63  ;;  %6128 = vmatprep.mubr.bf16.mxu1 %v8542_v38  ;;  %v8616_v10 = vadd.f32 %v5845_v7, %v5805_v3  ;;  %v7912_v63 = vld [vmem:[#allocation14 + $0xcf4] ss:$28 sps:$4 sm:$0xff]   ;;  %v7918_v3 = vld [vmem:[#allocation14 + $0xcbc] ss:$28 sps:$4 sm:$0xff]   ;;  %v7921_v7 = vld [vmem:[#allocation14 + $0x244] ss:$28 sps:$4 sm:$0xff]  }
 0x3fa   :  { %6057 = vmatprep.subr.bf16.mxu0 %v7846_v1  ;;  %6098 = vmatprep.subr.bf16.mxu1 %v7849_v2  ;;  %v5847_v16 = vpop.f32.mrf.mxu0  ;;  %v7910_v1 = vld [vmem:[#allocation14 + $0xcf0] ss:$28 sps:$4 sm:$0xff]   ;;  %v7913_v2 = vld [vmem:[#allocation14 + $0x278] ss:$28 sps:$4 sm:$0xff]  }
 0x3fb   :  { %v7927_v16 = vld [vmem:[#allocation14 + $0x20c] ss:$28 sps:$4 sm:$0xff]  }
 0x3fc   :  { %6058 = vmatpush1.bf16.msra.mxu0 %v7844_v8  ;;  %v5848_v18 = vpop.f32.mrf.mxu0  ;;  %v7916_v8 = vld [vmem:[#allocation14 + $0xcb8] ss:$28 sps:$4 sm:$0xff]  }
 0x3fd   :  { %6099 = vmatpush1.bf16.msra.mxu1 %v7847_v12  ;;  %6059 = vmatprep.subr.bf16.mxu0 %v7852_v15  ;;  %v7919_v12 = vld [vmem:[#allocation14 + $0x240] ss:$28 sps:$4 sm:$0xff]   ;;  %v7925_v18 = vld [vmem:[#allocation14 + $0x208] ss:$28 sps:$4 sm:$0xff]  }
 0x3fe   :  { %6100 = vmatprep.subr.bf16.mxu1 %v7855_v17  ;;  %v7924_v15 = vld [vmem:[#allocation14 + $0xc84] ss:$28 sps:$4 sm:$0xff]  }
 0x3ff   :  { %v7922_v17 = vld [vmem:[#allocation14 + $0xc80] ss:$28 sps:$4 sm:$0xff]  }
 0x400   :  { %6060 = vmatpush1.bf16.msra.mxu0 %v7850_v0  ;;  %v7930_v0 = vld [vmem:[#allocation14 + $0xc4c] ss:$28 sps:$4 sm:$0xff]  }
 0x401   :  { %6101 = vmatpush1.bf16.msra.mxu1 %v7853_v32  ;;  %6061 = vmatprep.subr.bf16.mxu0 %v7858_v19  ;;  %v7933_v32 = vld [vmem:[#allocation14 + $0x1d4] ss:$28 sps:$4 sm:$0xff]   ;;  %v7928_v19 = vld [vmem:[#allocation14 + $0xc48] ss:$28 sps:$4 sm:$0xff]  }
 0x402   :  { %6102 = vmatprep.subr.bf16.mxu1 %v7861_v20  ;;  %v7931_v20 = vld [vmem:[#allocation14 + $0x1d0] ss:$28 sps:$4 sm:$0xff]  }
 0x404   :  { %6062 = vmatpush1.bf16.msra.mxu0 %v7856_v35  ;;  %v7936_v35 = vld [vmem:[#allocation14 + $0x51c] ss:$28 sps:$4 sm:$0xff]  }
 0x405   :  { %6103 = vmatpush1.bf16.msra.mxu1 %v7859_v4  ;;  %6063 = vmatprep.subr.bf16.mxu0 %v7864_v21  ;;  %v7939_v4 = vld [vmem:[#allocation14 + $0x89c] ss:$28 sps:$4 sm:$0xff]  }
 0x406   :  { %6104 = vmatprep.subr.bf16.mxu1 %v7867_v40  ;;  %v7934_v21 = vld [vmem:[#allocation14 + $0x518] ss:$28 sps:$4 sm:$0xff]  }
 0x407   :  { %v7937_v40 = vld [vmem:[#allocation14 + $0x898] ss:$28 sps:$4 sm:$0xff]  }
 0x408   :  { %6064 = vmatpush1.bf16.msra.mxu0 %v7862_v59  ;;  %v7942_v59 = vld [vmem:[#allocation14 + $0x4e4] ss:$28 sps:$4 sm:$0xff]  }
 0x409   :  { %6105 = vmatpush1.bf16.msra.mxu1 %v7865_v22  ;;  %6065 = vmatprep.subr.bf16.mxu0 %v7870_v23  ;;  %v7945_v23 = vld [vmem:[#allocation14 + $0x864] ss:$28 sps:$4 sm:$0xff]  }
 0x40a   :  { %6106 = vmatprep.subr.bf16.mxu1 %v7873_v24 }
 0x40c   :  { %6066 = vmatpush1.bf16.msra.mxu0 %v7868_v37  ;;  %v7940_v37 = vld [vmem:[#allocation14 + $0x4e0] ss:$28 sps:$4 sm:$0xff]  }
 0x40d   :  { %6107 = vmatpush1.bf16.msra.mxu1 %v7871_v41  ;;  %6067 = vmatprep.subr.bf16.mxu0 %v7876_v13  ;;  %v7943_v13 = vld [vmem:[#allocation14 + $0x860] ss:$28 sps:$4 sm:$0xff]  }
 0x40e   :  { %6108 = vmatprep.subr.bf16.mxu1 %v7879_v14  ;;  %v7948_v14 = vld [vmem:[#allocation14 + $0x4ac] ss:$28 sps:$4 sm:$0xff]  }
 0x410   :  { %6068 = vmatpush1.bf16.msra.mxu0 %v7874_v25  ;;  %v7951_v25 = vld [vmem:[#allocation14 + $0x82c] ss:$28 sps:$4 sm:$0xff]  }
 0x411   :  { %6109 = vmatpush1.bf16.msra.mxu1 %v7877_v26  ;;  %6069 = vmatprep.subr.bf16.mxu0 %v7882_v34  ;;  %v7946_v34 = vld [vmem:[#allocation14 + $0x4a8] ss:$28 sps:$4 sm:$0xff]  }
 0x412   :  { %6110 = vmatprep.subr.bf16.mxu1 %v7885_v39  ;;  %v7949_v39 = vld [vmem:[#allocation14 + $0x828] ss:$28 sps:$4 sm:$0xff]  }
 0x414   :  { %6070 = vmatpush1.bf16.msra.mxu0 %v7880_v42  ;;  %v7954_v42 = vld [vmem:[#allocation14 + $0x474] ss:$28 sps:$4 sm:$0xff]  }
 0x415   :  { %6111 = vmatpush1.bf16.msra.mxu1 %v7883_v45  ;;  %6071 = vmatprep.subr.bf16.mxu0 %v7888_v46  ;;  %v7957_v45 = vld [vmem:[#allocation14 + $0x7f4] ss:$28 sps:$4 sm:$0xff]  }
 0x416   :  { %6112 = vmatprep.subr.bf16.mxu1 %v7891_v47  ;;  %v7952_v46 = vld [vmem:[#allocation14 + $0x470] ss:$28 sps:$4 sm:$0xff]  }
 0x417   :  { %v7955_v47 = vld [vmem:[#allocation14 + $0x7f0] ss:$28 sps:$4 sm:$0xff]  }
 0x418   :  { %6072 = vmatpush2.bf16.msra.mxu0 %v7886_v48  ;;  %v7960_v48 = vld [vmem:[#allocation14 + $0x43c] ss:$28 sps:$4 sm:$0xff]  }
 0x419   :  { %6113 = vmatpush2.bf16.msra.mxu1 %v7889_v6  ;;  %6073 = vmatprep.subr.bf16.mxu0 %v7894_v49  ;;  %v7963_v6 = vld [vmem:[#allocation14 + $0x7bc] ss:$28 sps:$4 sm:$0xff]  }
 0x41a   :  { %6114 = vmatprep.subr.bf16.mxu1 %v7897_v50  ;;  %v7958_v49 = vld [vmem:[#allocation14 + $0x438] ss:$28 sps:$4 sm:$0xff]  }
 0x41b   :  { %v7961_v50 = vld [vmem:[#allocation14 + $0x7b8] ss:$28 sps:$4 sm:$0xff]  }
 0x41c   :  { %6074 = vmatpush2.bf16.msra.mxu0 %v7892_v51  ;;  %v7966_v51 = vld [vmem:[#allocation14 + $0x404] ss:$28 sps:$4 sm:$0xff]  }
 0x41d   :  { %6115 = vmatpush2.bf16.msra.mxu1 %v7895_v53  ;;  %6075 = vmatprep.subr.bf16.mxu0 %v7900_v54  ;;  %v7969_v53 = vld [vmem:[#allocation14 + $0x784] ss:$28 sps:$4 sm:$0xff]  }
 0x41e   :  { %6116 = vmatprep.subr.bf16.mxu1 %v7903_v55  ;;  %v7964_v54 = vld [vmem:[#allocation14 + $0x400] ss:$28 sps:$4 sm:$0xff]  }
 0x41f   :  { %v7967_v55 = vld [vmem:[#allocation14 + $0x780] ss:$28 sps:$4 sm:$0xff]  }
 0x420   :  { %6076 = vmatpush2.bf16.msra.mxu0 %v7898_v56  ;;  %v7972_v56 = vld [vmem:[#allocation14 + $0x3cc] ss:$28 sps:$4 sm:$0xff]  }
 0x421   :  { %6117 = vmatpush2.bf16.msra.mxu1 %v7901_v57  ;;  %6077 = vmatprep.subr.bf16.mxu0 %v7906_v58  ;;  %v7975_v57 = vld [vmem:[#allocation14 + $0x74c] ss:$28 sps:$4 sm:$0xff]  }
 0x422   :  { %6118 = vmatprep.subr.bf16.mxu1 %v7909_v60  ;;  %v7970_v58 = vld [vmem:[#allocation14 + $0x3c8] ss:$28 sps:$4 sm:$0xff]  }
 0x423   :  { %v7973_v60 = vld [vmem:[#allocation14 + $0x748] ss:$28 sps:$4 sm:$0xff]  }
 0x424   :  { %6078 = vmatpush2.bf16.msra.mxu0 %v7904_v61  ;;  %v7978_v61 = vld [vmem:[#allocation14 + $0x394] ss:$28 sps:$4 sm:$0xff]  }
 0x425   :  { %6119 = vmatpush2.bf16.msra.mxu1 %v7907_v62  ;;  %6079 = vmatprep.subr.bf16.mxu0 %v7912_v63  ;;  %v7981_v62 = vld [vmem:[#allocation14 + $0x714] ss:$28 sps:$4 sm:$0xff]  }
 0x426   :  { %6120 = vmatprep.subr.bf16.mxu1 %v7915_v52  ;;  %v7976_v63 = vld [vmem:[#allocation14 + $0x390] ss:$28 sps:$4 sm:$0xff]  }
 0x427   :  { %v7979_v52 = vld [vmem:[#allocation14 + $0x710] ss:$28 sps:$4 sm:$0xff]  }
 0x428   :  { %6080 = vmatpush2.bf16.msra.mxu0 %v7910_v1  ;;  %v7984_v1 = vld [vmem:[#allocation14 + $0x6dc] ss:$28 sps:$4 sm:$0xff]  }
 0x429   :  { %6121 = vmatpush2.bf16.msra.mxu1 %v7913_v2  ;;  %6081 = vmatprep.subr.bf16.mxu0 %v7918_v3  ;;  %v7987_v2 = vld [vmem:[#allocation14 + $0xa5c] ss:$28 sps:$4 sm:$0xff]  }
 0x42a   :  { %6122 = vmatprep.subr.bf16.mxu1 %v7921_v7  ;;  %v7982_v3 = vld [vmem:[#allocation14 + $0x6d8] ss:$28 sps:$4 sm:$0xff]  }
 0x42b   :  { %v7985_v7 = vld [vmem:[#allocation14 + $0xa58] ss:$28 sps:$4 sm:$0xff]  }
 0x42c   :  { %6082 = vmatpush2.bf16.msra.mxu0 %v7916_v8  ;;  %v7990_v8 = vld [vmem:[#allocation14 + $0x6a4] ss:$28 sps:$4 sm:$0xff]  }
 0x42d   :  { %6123 = vmatpush2.bf16.msra.mxu1 %v7919_v12  ;;  %6083 = vmatprep.subr.bf16.mxu0 %v7924_v15  ;;  %v7993_v12 = vld [vmem:[#allocation14 + $0xa24] ss:$28 sps:$4 sm:$0xff]  }
 0x42e   :  { %6124 = vmatprep.subr.bf16.mxu1 %v7927_v16  ;;  %v7988_v15 = vld [vmem:[#allocation14 + $0x6a0] ss:$28 sps:$4 sm:$0xff]  }
 0x42f   :  { %v7991_v16 = vld [vmem:[#allocation14 + $0xa20] ss:$28 sps:$4 sm:$0xff]  }
 0x430   :  { %6084 = vmatpush2.bf16.msra.mxu0 %v7922_v17  ;;  %v7996_v17 = vld [vmem:[#allocation14 + $0x66c] ss:$28 sps:$4 sm:$0xff]  }
 0x431   :  { %6125 = vmatpush2.bf16.msra.mxu1 %v7925_v18  ;;  %6085 = vmatprep.subr.bf16.mxu0 %v7930_v0  ;;  %v7999_v18 = vld [vmem:[#allocation14 + $0x9ec] ss:$28 sps:$4 sm:$0xff]  }
 0x432   :  { %6126 = vmatprep.subr.bf16.mxu1 %v7933_v32  ;;  %v7994_v0 = vld [vmem:[#allocation14 + $0x668] ss:$28 sps:$4 sm:$0xff]  }
 0x433   :  { %v7997_v32 = vld [vmem:[#allocation14 + $0x9e8] ss:$28 sps:$4 sm:$0xff]  }
 0x434   :  { %6086 = vmatpush2.bf16.msra.mxu0 %v7928_v19  ;;  %v8002_v19 = vld [vmem:[#allocation14 + $0x634] ss:$28 sps:$4 sm:$0xff]  }
 0x435   :  { %6127 = vmatpush2.bf16.msra.mxu1 %v7931_v20  ;;  %6137 = vmatprep.subr.bf16.mxu0 %v7936_v35  ;;  %v8005_v20 = vld [vmem:[#allocation14 + $0x9b4] ss:$28 sps:$4 sm:$0xff]  }
 0x436   :  { %6178 = vmatprep.subr.bf16.mxu1 %v7939_v4  ;;  %v8000_v35 = vld [vmem:[#allocation14 + $0x630] ss:$28 sps:$4 sm:$0xff]  }
 0x437   :  { %6088 = vmatmul.mubr.bf16.vlgmr.msra.gmra.mxu0 %v8594_v31  ;;  %v5884_v22 = vpop.f32.mrf.mxu1  ;;  %v8003_v4 = vld [vmem:[#allocation14 + $0x9b0] ss:$28 sps:$4 sm:$0xff]  }
 0x438   :  { %6129 = vmatmul.mubr.bf16.vlgmr.msra.gmra.mxu1 %v8552_v44  ;;  %v8621_v24 = vadd.f32 %v5884_v22, %v8612_v5  ;;  %6138 = vmatpush1.bf16.msra.mxu0 %v7934_v21  ;;  %v8008_v21 = vld [vmem:[#allocation14 + $0x5fc] ss:$28 sps:$4 sm:$0xff]  }
 0x439   :  { %6169 = vmatprep.mubr.bf16.mxu0 %v8557_v9  ;;  %6179 = vmatpush1.bf16.msra.mxu1 %v7937_v40  ;;  %v8624_v41 = vpop.f32.mrf.mxu1  ;;  %v8011_v40 = vld [vmem:[#allocation14 + $0x97c] ss:$28 sps:$4 sm:$0xff]  }
 0x43a   :  { %6210 = vmatprep.mubr.bf16.mxu1 %v8578_v30  ;;  %6139 = vmatprep.subr.bf16.mxu0 %v7942_v59  ;;  %v8006_v59 = vld [vmem:[#allocation14 + $0x5f8] ss:$28 sps:$4 sm:$0xff]  }
 0x43b   :  { %6180 = vmatprep.subr.bf16.mxu1 %v7945_v23  ;;  %v5888_v26 = vpop.f32.mrf.mxu1  ;;  %v8009_v22 = vld [vmem:[#allocation14 + $0x978] ss:$28 sps:$4 sm:$0xff]   ;;  %v8014_v23 = vld [vmem:[#allocation14 + $0x5c4] ss:$28 sps:$4 sm:$0xff]  }
 0x43c   :  { %6140 = vmatpush1.bf16.msra.mxu0 %v7940_v37  ;;  %v8017_v37 = vld [vmem:[#allocation14 + $0x944] ss:$28 sps:$4 sm:$0xff]   ;;  %v8023_v26 = vld [vmem:[#allocation14 + $0x90c] ss:$28 sps:$4 sm:$0xff]  }
 0x43d   :  { %6181 = vmatpush1.bf16.msra.mxu1 %v7943_v13  ;;  %v5889_v5 = vpop.f32.mrf.mxu1  ;;  %6141 = vmatprep.subr.bf16.mxu0 %v7948_v14  ;;  %v8012_v13 = vld [vmem:[#allocation14 + $0x5c0] ss:$28 sps:$4 sm:$0xff]  }
 0x43e   :  { %6182 = vmatprep.subr.bf16.mxu1 %v7951_v25  ;;  %v8015_v14 = vld [vmem:[#allocation14 + $0x940] ss:$28 sps:$4 sm:$0xff]   ;;  %v8020_v25 = vld [vmem:[#allocation14 + $0x58c] ss:$28 sps:$4 sm:$0xff]  }
 0x43f   :  { %v8021_v5 = vld [vmem:[#allocation14 + $0x908] ss:$28 sps:$4 sm:$0xff]  }
 0x440   :  { %6142 = vmatpush1.bf16.msra.mxu0 %v7946_v34  ;;  %v8018_v34 = vld [vmem:[#allocation14 + $0x588] ss:$28 sps:$4 sm:$0xff]  }
 0x441   :  { %6183 = vmatpush1.bf16.msra.mxu1 %v7949_v39  ;;  %6143 = vmatprep.subr.bf16.mxu0 %v7954_v42  ;;  %v8026_v39 = vld [vmem:[#allocation14 + $0x554] ss:$28 sps:$4 sm:$0xff]  }
 0x442   :  { %6184 = vmatprep.subr.bf16.mxu1 %v7957_v45  ;;  %v8029_v42 = vld [vmem:[#allocation14 + $0x8d4] ss:$28 sps:$4 sm:$0xff]  }
 0x443   :  { %v8024_v45 = vld [vmem:[#allocation14 + $0x550] ss:$28 sps:$4 sm:$0xff]  }
 0x444   :  { %6144 = vmatpush1.bf16.msra.mxu0 %v7952_v46  ;;  %v8027_v46 = vld [vmem:[#allocation14 + $0x8d0] ss:$28 sps:$4 sm:$0xff]  }
 0x445   :  { %6185 = vmatpush1.bf16.msra.mxu1 %v7955_v47  ;;  %6145 = vmatprep.subr.bf16.mxu0 %v7960_v48  ;;  %v8032_v47 = vld [vmem:[#allocation14 + $0xc1c] ss:$28 sps:$4 sm:$0xff]  }
 0x446   :  { %6186 = vmatprep.subr.bf16.mxu1 %v7963_v6  ;;  %v8033_v48 = vld [vmem:[#allocation14 + $0x360] ss:$28 sps:$4 sm:$0xff]   ;;  %v8030_v6 = vld [vmem:[#allocation14 + $0xc18] ss:$28 sps:$4 sm:$0xff]  }
 0x448   :  { %6146 = vmatpush1.bf16.msra.mxu0 %v7958_v49  ;;  %v8034_v49 = vld [vmem:[#allocation14 + $0x1a0] ss:$28 sps:$4 sm:$0xff]  }
 0x449   :  { %6187 = vmatpush1.bf16.msra.mxu1 %v7961_v50  ;;  %6147 = vmatprep.subr.bf16.mxu0 %v7966_v51  ;;  %v8037_v50 = vld [vmem:[#allocation14 + $0xbe4] ss:$28 sps:$4 sm:$0xff]  }
 0x44a   :  { %6188 = vmatprep.subr.bf16.mxu1 %v7969_v53 }
 0x44c   :  { %6148 = vmatpush1.bf16.msra.mxu0 %v7964_v54  ;;  %v8038_v54 = vld [vmem:[#allocation14 + $0x328] ss:$28 sps:$4 sm:$0xff]  }
 0x44d   :  { %6189 = vmatpush1.bf16.msra.mxu1 %v7967_v55  ;;  %6149 = vmatprep.subr.bf16.mxu0 %v7972_v56  ;;  %v5887_v55 = vadd.f32 %v8624_v41, %v8616_v10 }
 0x44e   :  { %6190 = vmatprep.subr.bf16.mxu1 %v7975_v57  ;;  %v8035_v57 = vld [vmem:[#allocation14 + $0xbe0] ss:$28 sps:$4 sm:$0xff]  }
 0x450   :  { %6150 = vmatpush1.bf16.msra.mxu0 %v7970_v58 }
 0x451   :  { %6191 = vmatpush1.bf16.msra.mxu1 %v7973_v60  ;;  %6151 = vmatprep.subr.bf16.mxu0 %v7978_v61  ;;  %v8039_v61 = vld [vmem:[#allocation14 + $0x168] ss:$28 sps:$4 sm:$0xff]  }
 0x452   :  { %6192 = vmatprep.subr.bf16.mxu1 %v7981_v62  ;;  %v8042_v62 = vld [vmem:[#allocation14 + $0xbac] ss:$28 sps:$4 sm:$0xff]  }
 0x454   :  { %6152 = vmatpush1.bf16.msra.mxu0 %v7976_v63 }
 0x455   :  { %6193 = vmatpush1.bf16.msra.mxu1 %v7979_v52  ;;  %6153 = vmatprep.subr.bf16.mxu0 %v7984_v1  ;;  %v8043_v52 = vld [vmem:[#allocation14 + $0x2f0] ss:$28 sps:$4 sm:$0xff]  }
 0x456   :  { %6194 = vmatprep.subr.bf16.mxu1 %v7987_v2 }
 0x458   :  { %6154 = vmatpush2.bf16.msra.mxu0 %v7982_v3  ;;  %v8044_v3 = vld [vmem:[#allocation14 + $0x130] ss:$28 sps:$4 sm:$0xff]  }
 0x459   :  { %6195 = vmatpush2.bf16.msra.mxu1 %v7985_v7  ;;  %6155 = vmatprep.subr.bf16.mxu0 %v7990_v8  ;;  %v8047_v7 = vld [vmem:[#allocation14 + $0xb74] ss:$28 sps:$4 sm:$0xff]  }
 0x45a   :  { %6196 = vmatprep.subr.bf16.mxu1 %v7993_v12  ;;  %v8048_v8 = vld [vmem:[#allocation14 + $0x2b8] ss:$28 sps:$4 sm:$0xff]  }
 0x45b   :  { %v8049_v12 = vld [vmem:[#allocation14 + $0xf8] ss:$28 sps:$4 sm:$0xff]  }
 0x45c   :  { %6156 = vmatpush2.bf16.msra.mxu0 %v7988_v15  ;;  %v8052_v15 = vld [vmem:[#allocation14 + $0xb3c] ss:$28 sps:$4 sm:$0xff]  }
 0x45d   :  { %6197 = vmatpush2.bf16.msra.mxu1 %v7991_v16  ;;  %6157 = vmatprep.subr.bf16.mxu0 %v7996_v17  ;;  %v8053_v16 = vld [vmem:[#allocation14 + $0x280] ss:$28 sps:$4 sm:$0xff]   ;;  %v8050_v17 = vld [vmem:[#allocation14 + $0xb38] ss:$28 sps:$4 sm:$0xff]  }
 0x45e   :  { %6198 = vmatprep.subr.bf16.mxu1 %v7999_v18  ;;  %v8054_v18 = vld [vmem:[#allocation14 + $0xc0] ss:$28 sps:$4 sm:$0xff]  }
 0x460   :  { %6158 = vmatpush2.bf16.msra.mxu0 %v7994_v0  ;;  %v8057_v0 = vld [vmem:[#allocation14 + $0xb04] ss:$28 sps:$4 sm:$0xff]  }
 0x461   :  { %6199 = vmatpush2.bf16.msra.mxu1 %v7997_v32  ;;  %6159 = vmatprep.subr.bf16.mxu0 %v8002_v19  ;;  %v8058_v32 = vld [vmem:[#allocation14 + $0x248] ss:$28 sps:$4 sm:$0xff]  }
 0x462   :  { %6200 = vmatprep.subr.bf16.mxu1 %v8005_v20  ;;  %v8055_v20 = vld [vmem:[#allocation14 + $0xb00] ss:$28 sps:$4 sm:$0xff]  }
 0x464   :  { %6160 = vmatpush2.bf16.msra.mxu0 %v8000_v35 }
 0x465   :  { %6201 = vmatpush2.bf16.msra.mxu1 %v8003_v4  ;;  %6161 = vmatprep.subr.bf16.mxu0 %v8008_v21  ;;  %v8059_v4 = vld [vmem:[#allocation14 + $0x88] ss:$28 sps:$4 sm:$0xff]  }
 0x466   :  { %6202 = vmatprep.subr.bf16.mxu1 %v8011_v40  ;;  %v8062_v21 = vld [vmem:[#allocation14 + $0xacc] ss:$28 sps:$4 sm:$0xff]  }
 0x467   :  { %v8063_v40 = vld [vmem:[#allocation14 + $0x210] ss:$28 sps:$4 sm:$0xff]  }
 0x468   :  { %6162 = vmatpush2.bf16.msra.mxu0 %v8006_v59 }
 0x469   :  { %6203 = vmatpush2.bf16.msra.mxu1 %v8009_v22  ;;  %6163 = vmatprep.subr.bf16.mxu0 %v8014_v23  ;;  %v8060_v22 = vld [vmem:[#allocation14 + $0xac8] ss:$28 sps:$4 sm:$0xff]   ;;  %v8064_v23 = vld [vmem:[#allocation14 + $0x50] ss:$28 sps:$4 sm:$0xff]  }
 0x46a   :  { %6204 = vmatprep.subr.bf16.mxu1 %v8017_v37  ;;  %v8067_v37 = vld [vmem:[#allocation14 + $0xa94] ss:$28 sps:$4 sm:$0xff]  }
 0x46c   :  { %6164 = vmatpush2.bf16.msra.mxu0 %v8012_v13  ;;  %v8068_v13 = vld [vmem:[#allocation14 + $0x1d8] ss:$28 sps:$4 sm:$0xff]  }
 0x46d   :  { %6205 = vmatpush2.bf16.msra.mxu1 %v8015_v14  ;;  %6165 = vmatprep.subr.bf16.mxu0 %v8020_v25  ;;  %v8065_v14 = vld [vmem:[#allocation14 + $0xa90] ss:$28 sps:$4 sm:$0xff]   ;;  %v8069_v25 = vld [vmem:[#allocation14 + $0x18] ss:$28 sps:$4 sm:$0xff]  }
 0x46e   :  { %6206 = vmatprep.subr.bf16.mxu1 %v8023_v26  ;;  %v8072_v26 = vld [vmem:[#allocation14 + $0xddc] ss:$28 sps:$4 sm:$0xff]  }
 0x470   :  { %6166 = vmatpush2.bf16.msra.mxu0 %v8018_v34  ;;  %v8073_v34 = vld [vmem:[#allocation14 + $0xa60] ss:$28 sps:$4 sm:$0xff]  }
 0x471   :  { %6207 = vmatpush2.bf16.msra.mxu1 %v8021_v5  ;;  %6167 = vmatprep.subr.bf16.mxu0 %v8026_v39  ;;  %v8070_v5 = vld [vmem:[#allocation14 + $0xdd8] ss:$28 sps:$4 sm:$0xff]   ;;  %v8074_v39 = vld [vmem:[#allocation14 + $0x8a0] ss:$28 sps:$4 sm:$0xff]  }
 0x472   :  { %6208 = vmatprep.subr.bf16.mxu1 %v8029_v42  ;;  %v8077_v42 = vld [vmem:[#allocation14 + $0xda4] ss:$28 sps:$4 sm:$0xff]  }
 0x474   :  { %6168 = vmatpush2.bf16.msra.mxu0 %v8024_v45  ;;  %v8078_v45 = vld [vmem:[#allocation14 + $0xa28] ss:$28 sps:$4 sm:$0xff]  }
 0x475   :  { %6209 = vmatpush2.bf16.msra.mxu1 %v8027_v46  ;;  %6219 = vmatprep.subr.bf16.mxu0 %v8032_v47  ;;  %v8075_v46 = vld [vmem:[#allocation14 + $0xda0] ss:$28 sps:$4 sm:$0xff]   ;;  %v8079_v47 = vld [vmem:[#allocation14 + $0x868] ss:$28 sps:$4 sm:$0xff]  }
 0x476   :  { %7273 = vmatprep.subr.bf16.mxu1 %v8033_v48  ;;  %v8082_v48 = vld [vmem:[#allocation14 + $0xd6c] ss:$28 sps:$4 sm:$0xff]  }
 0x477   :  { %v8627_v51 = vpop.f32.mrf.mxu1  ;;  %6170 = vmatmul.mubr.bf16.vlgmr.msra.gmra.mxu0 %v8560_v11  ;;  %v5925_v53 = vpop.f32.mrf.mxu0 }
 0x478   :  { %6211 = vmatmul.mubr.bf16.vlgmr.msra.gmra.mxu1 %v8581_v33  ;;  %v5926_v56 = vadd.f32 %v5925_v53, %v8621_v24  ;;  %6220 = vmatpush1.bf16.msra.mxu0 %v8030_v6  ;;  %v8040_v24 = vld [vmem:[#allocation14 + $0xba8] ss:$28 sps:$4 sm:$0xff]   ;;  %v8083_v6 = vld [vmem:[#allocation14 + $0x9f0] ss:$28 sps:$4 sm:$0xff]  }
 0x479   :  { %6251 = vmatprep.mubr.bf16.mxu0 %v8591_v28  ;;  %7274 = vmatpush3.bf16.msra.mxu1 %v8034_v49  ;;  %v8635_v58 = vpop.f32.mrf.mxu1  ;;  %v5927_v60 = vpop.f32.mrf.mxu0  ;;  %v8080_v49 = vld [vmem:[#allocation14 + $0xd68] ss:$28 sps:$4 sm:$0xff]   ;;  %v8087_v53 = vld [vmem:[#allocation14 + $0xd34] ss:$28 sps:$4 sm:$0xff]  }
 0x47a   :  { %6292 = vmatprep.mubr.bf16.mxu1 %v8542_v38  ;;  %v5928_v63 = vadd.f32 %v5927_v60, %v5887_v55  ;;  %6221 = vmatprep.subr.bf16.mxu0 %v8037_v50  ;;  %8142 = vtanh.f32 %v5926_v56  ;;  %v8045_v38 = vld [vmem:[#allocation14 + $0xb70] ss:$28 sps:$4 sm:$0xff]   ;;  %v8089_v55 = vld [vmem:[#allocation14 + $0x7f8] ss:$28 sps:$4 sm:$0xff]   ;;  %v8094_v60 = vld [vmem:[#allocation14 + $0x7c0] ss:$28 sps:$4 sm:$0xff]  }
 0x47b   :  { %v5970_v10 = vpop.f32.mrf.mxu1  ;;  %7275 = vmatprep.subr.bf16.mxu1 %v8038_v54  ;;  %v5929_v41 = vpop.f32.mrf.mxu0  ;;  %v8084_v50 = vld [vmem:[#allocation14 + $0x830] ss:$28 sps:$4 sm:$0xff]   ;;  %v8088_v54 = vld [vmem:[#allocation14 + $0x9b8] ss:$28 sps:$4 sm:$0xff]  }
 0x47c   :  { %8144 = vtanh.f32 %v5928_v63  ;;  %6222 = vmatpush1.bf16.msra.mxu0 %v8035_v57  ;;  %v8092_v56 = vld [vmem:[#allocation14 + $0xcfc] ss:$28 sps:$4 sm:$0xff]   ;;  %v8102_v10 = vld [vmem:[#allocation14 + $0xc8c] ss:$28 sps:$4 sm:$0xff]   ;;  %v3411_v41 = vsub.s32 4, %v8466_v29 }
 0x47d   :  { %7276 = vmatpush3.bf16.msra.mxu1 %v8039_v61  ;;  %v5971_v1 = vpop.f32.mrf.mxu1  ;;  %v5930_v2 = vpop.f32.mrf.mxu0  ;;  %6223 = vmatprep.subr.bf16.mxu0 %v8042_v62  ;;  %v8090_v57 = vld [vmem:[#allocation14 + $0xcf8] ss:$28 sps:$4 sm:$0xff]   ;;  %v8097_v61 = vld [vmem:[#allocation14 + $0xcc4] ss:$28 sps:$4 sm:$0xff]  }
 0x47e   :  { %7277 = vmatprep.subr.bf16.mxu1 %v8043_v52  ;;  %v8098_v62 = vld [vmem:[#allocation14 + $0x948] ss:$28 sps:$4 sm:$0xff]   ;;  %v8095_v63 = vld [vmem:[#allocation14 + $0xcc0] ss:$28 sps:$4 sm:$0xff]   ;;  %v8104_v2 = vld [vmem:[#allocation14 + $0x750] ss:$28 sps:$4 sm:$0xff]  }
 0x47f   :  { %v8099_v52 = vld [vmem:[#allocation14 + $0x788] ss:$28 sps:$4 sm:$0xff]  }
 0x480   :  { %6224 = vmatpush1.bf16.msra.mxu0 %v8040_v24  ;;  %v8103_v24 = vld [vmem:[#allocation14 + $0x910] ss:$28 sps:$4 sm:$0xff]   ;;  %v8100_v1 = vld [vmem:[#allocation14 + $0xc88] ss:$28 sps:$4 sm:$0xff]  }
 0x481   :  { %7278 = vmatpush3.bf16.msra.mxu1 %v8044_v3  ;;  %6225 = vmatprep.subr.bf16.mxu0 %v8047_v7  ;;  %v8107_v3 = vld [vmem:[#allocation14 + $0xc54] ss:$28 sps:$4 sm:$0xff]   ;;  %v3412_v7 = vrot.slane %v8600_v27, %v3411_v41 }
 0x482   :  { %7279 = vmatprep.subr.bf16.mxu1 %v8048_v8  ;;  %v8108_v8 = vld [vmem:[#allocation14 + $0x8d8] ss:$28 sps:$4 sm:$0xff]  }
 0x484   :  { %6226 = vmatpush1.bf16.msra.mxu0 %v8045_v38  ;;  %v8105_v38 = vld [vmem:[#allocation14 + $0xc50] ss:$28 sps:$4 sm:$0xff]  }
 0x485   :  { %7280 = vmatpush3.bf16.msra.mxu1 %v8049_v12  ;;  %6227 = vmatprep.subr.bf16.mxu0 %v8052_v15  ;;  %v8109_v12 = vld [vmem:[#allocation14 + $0x718] ss:$28 sps:$4 sm:$0xff]   ;;  %v8110_v15 = vld [vmem:[#allocation14 + $0x6e0] ss:$28 sps:$4 sm:$0xff]  }
 0x486   :  { %7281 = vmatprep.subr.bf16.mxu1 %v8053_v16  ;;  %v3447_v16 = vrot.slane %v3412_v7, %v8474_v36 }
 0x487   :  { %v8143_v19 = vpop.eup %8142 }
 0x488   :  { %6228 = vmatpush1.bf16.msra.mxu0 %v8050_v17  ;;  %v8111_v17 = vld [vmem:[#allocation14 + $0x520] ss:$28 sps:$4 sm:$0xff]  }
 0x489   :  { %v8145_v35 = vpop.eup %8144  ;;  %7282 = vmatpush3.bf16.msra.mxu1 %v8054_v18  ;;  %6229 = vmatprep.subr.bf16.mxu0 %v8057_v0  ;;  %v8112_v18 = vld [vmem:[#allocation14 + $0x6a8] ss:$28 sps:$4 sm:$0xff]   ;;  %v5967_v0 = vadd.f32 %v8627_v51, %v3447_v16 }
 0x48a   :  { %7283 = vmatprep.subr.bf16.mxu1 %v8058_v32  ;;  %v7269_v59 = vpack.c.bf16 %v8145_v35, %v8143_v19  ;;  %v8113_v35 = vld [vmem:[#allocation14 + $0x4e8] ss:$28 sps:$4 sm:$0xff]  }
 0x48c   :  { %6230 = vmatpush1.bf16.msra.mxu0 %v8055_v20  ;;  %6456 = vst [vmem:[#allocation17] sm:$0xff] %v7269_v59 }
 0x48d   :  { %7284 = vmatpush3.bf16.msra.mxu1 %v8059_v4  ;;  %6231 = vmatprep.subr.bf16.mxu0 %v8062_v21 }
 0x48e   :  { %7285 = vmatprep.subr.bf16.mxu1 %v8063_v40  ;;  %v8114_v40 = vld [vmem:[#allocation14 + $0x670] ss:$28 sps:$4 sm:$0xff]  }
 0x490   :  { %6232 = vmatpush1.bf16.msra.mxu0 %v8060_v22 }
 0x491   :  { %7286 = vmatpush3.bf16.msra.mxu1 %v8064_v23  ;;  %6233 = vmatprep.subr.bf16.mxu0 %v8067_v37  ;;  %v8115_v23 = vld [vmem:[#allocation14 + $0x4b0] ss:$28 sps:$4 sm:$0xff]  }
 0x492   :  { %7287 = vmatprep.subr.bf16.mxu1 %v8068_v13 }
 0x494   :  { %6234 = vmatpush1.bf16.msra.mxu0 %v8065_v14  ;;  %v8117_v14 = vld [vmem:[#allocation14 + $0x478] ss:$28 sps:$4 sm:$0xff]  }
 0x495   :  { %7288 = vmatpush3.bf16.msra.mxu1 %v8069_v25  ;;  %6235 = vmatprep.subr.bf16.mxu0 %v8072_v26  ;;  %v8119_v25 = vld [vmem:[#allocation14 + $0x440] ss:$28 sps:$4 sm:$0xff]   ;;  %v8120_v26 = vld [vmem:[#allocation14 + $0x5c8] ss:$28 sps:$4 sm:$0xff]  }
 0x496   :  { %7317 = vmatprep.subr.bf16.mxu1 %v8073_v34  ;;  %v8121_v34 = vld [vmem:[#allocation14 + $0x408] ss:$28 sps:$4 sm:$0xff]  }
 0x498   :  { %6293 = vmatmul.mubr.bf16.vlgmr.msra.gmra.mxu1 %v8552_v44  ;;  %6236 = vmatpush2.bf16.msra.mxu0 %v8070_v5  ;;  %v8085_v44 = vld [vmem:[#allocation14 + $0xd30] ss:$28 sps:$4 sm:$0xff]  }
 0x499   :  { %7318 = vmatpush3.bf16.msra.mxu1 %v8074_v39  ;;  %6372 = vmatprep.mubr.bf16.mxu1 %v8578_v30  ;;  %v8093_v30 = vld [vmem:[#allocation14 + $0x980] ss:$28 sps:$4 sm:$0xff]   ;;  %v8122_v5 = vld [vmem:[#allocation14 + $0x590] ss:$28 sps:$4 sm:$0xff]  }
 0x49a   :  { %6237 = vmatprep.subr.bf16.mxu0 %v8077_v42  ;;  %7319 = vmatprep.subr.bf16.mxu1 %v8078_v45  ;;  %v8123_v39 = vld [vmem:[#allocation14 + $0x3d0] ss:$28 sps:$4 sm:$0xff]   ;;  %v8124_v42 = vld [vmem:[#allocation14 + $0x558] ss:$28 sps:$4 sm:$0xff]  }
 0x49b   :  { %v8125_v45 = vld [vmem:[#allocation14 + $0x398] ss:$28 sps:$4 sm:$0xff]  }
 0x49c   :  { %6238 = vmatpush2.bf16.msra.mxu0 %v8075_v46  ;;  %v8126_v46 = vld [vmem:[#allocation14 + $0xde0] ss:$28 sps:$4 sm:$0xff]  }
 0x49d   :  { %7320 = vmatpush3.bf16.msra.mxu1 %v8079_v47  ;;  %6239 = vmatprep.subr.bf16.mxu0 %v8082_v48  ;;  %v8127_v47 = vld [vmem:[#allocation14 + $0xc20] ss:$28 sps:$4 sm:$0xff]   ;;  %v8128_v48 = vld [vmem:[#allocation14 + $0xda8] ss:$28 sps:$4 sm:$0xff]  }
 0x49e   :  { %7321 = vmatprep.subr.bf16.mxu1 %v8083_v6  ;;  %v8129_v6 = vld [vmem:[#allocation14 + $0xbe8] ss:$28 sps:$4 sm:$0xff]  }
 0x4a0   :  { %6240 = vmatpush2.bf16.msra.mxu0 %v8080_v49  ;;  %v8130_v49 = vld [vmem:[#allocation14 + $0xd70] ss:$28 sps:$4 sm:$0xff]  }
 0x4a1   :  { %7322 = vmatpush3.bf16.msra.mxu1 %v8084_v50  ;;  %6241 = vmatprep.subr.bf16.mxu0 %v8087_v53  ;;  %v8131_v50 = vld [vmem:[#allocation14 + $0xbb0] ss:$28 sps:$4 sm:$0xff]   ;;  %v8132_v53 = vld [vmem:[#allocation14 + $0xd38] ss:$28 sps:$4 sm:$0xff]  }
 0x4a2   :  { %7323 = vmatprep.subr.bf16.mxu1 %v8088_v54  ;;  %v8133_v54 = vld [vmem:[#allocation14 + $0xb78] ss:$28 sps:$4 sm:$0xff]  }
 0x4a4   :  { %6242 = vmatpush2.bf16.msra.mxu0 %v8085_v44  ;;  %v8134_v44 = vld [vmem:[#allocation14 + $0xd00] ss:$28 sps:$4 sm:$0xff]  }
 0x4a5   :  { %7324 = vmatpush3.bf16.msra.mxu1 %v8089_v55  ;;  %6243 = vmatprep.subr.bf16.mxu0 %v8092_v56  ;;  %v8135_v55 = vld [vmem:[#allocation14 + $0xb40] ss:$28 sps:$4 sm:$0xff]   ;;  %v8136_v56 = vld [vmem:[#allocation14 + $0xcc8] ss:$28 sps:$4 sm:$0xff]  }
 0x4a6   :  { %7325 = vmatprep.subr.bf16.mxu1 %v8093_v30  ;;  %v8137_v30 = vld [vmem:[#allocation14 + $0xb08] ss:$28 sps:$4 sm:$0xff]  }
 0x4a8   :  { %6244 = vmatpush2.bf16.msra.mxu0 %v8090_v57 }
 0x4a9   :  { %7326 = vmatpush3.bf16.msra.mxu1 %v8094_v60  ;;  %6245 = vmatprep.subr.bf16.mxu0 %v8097_v61  ;;  %v8139_v60 = vld [vmem:[#allocation14 + $0xad0] ss:$28 sps:$4 sm:$0xff]   ;;  %v8140_v61 = vld [vmem:[#allocation14 + $0xc58] ss:$28 sps:$4 sm:$0xff]  }
 0x4aa   :  { %7327 = vmatprep.subr.bf16.mxu1 %v8098_v62 }
 0x4ac   :  { %6246 = vmatpush2.bf16.msra.mxu0 %v8095_v63  ;;  %v8141_v63 = vld [vmem:[#allocation14 + $0xa98] ss:$28 sps:$4 sm:$0xff]  }
 0x4ad   :  { %7328 = vmatpush3.bf16.msra.mxu1 %v8099_v52  ;;  %6247 = vmatprep.subr.bf16.mxu0 %v8102_v10 }
 0x4ae   :  { %7329 = vmatprep.subr.bf16.mxu1 %v8103_v24 }
 0x4b0   :  { %6248 = vmatpush2.bf16.msra.mxu0 %v8100_v1 }
 0x4b1   :  { %7330 = vmatpush3.bf16.msra.mxu1 %v8104_v2  ;;  %6249 = vmatprep.subr.bf16.mxu0 %v8107_v3 }
 0x4b2   :  { %7331 = vmatprep.subr.bf16.mxu1 %v8108_v8 }
 0x4b4   :  { %6250 = vmatpush2.bf16.msra.mxu0 %v8105_v38 }
 0x4b5   :  { %7332 = vmatpush3.bf16.msra.mxu1 %v8109_v12  ;;  %7295 = vmatprep.subr.bf16.mxu0 %v8110_v15 }
 0x4b7   :  { %v6007_v32 = vpop.f32.mrf.mxu0  ;;  %v6048_v19 = vpop.f32.mrf.mxu1  ;;  %6252 = vmatmul.mubr.bf16.vlgmr.msra.gmra.mxu0 %v8594_v31 }
 0x4b8   :  { %v6008_v20 = vadd.f32 %v6007_v32, %v5967_v0  ;;  %6373 = vmatmul.mubr.bf16.vlgmr.msra.gmra.mxu1 %v8581_v33  ;;  %7296 = vmatpush3.bf16.msra.mxu0 %v8111_v17  ;;  %v8116_v33 = vld [vmem:[#allocation14 + $0x638] ss:$28 sps:$4 sm:$0xff]  }
 0x4b9   :  { %6332 = vmatprep.mubr.bf16.mxu0 %v8557_v9  ;;  %v8649_v4 = vpop.f32.mrf.mxu0  ;;  %v8651_v21 = vpop.f32.mrf.mxu1  ;;  %7297 = vmatprep.subr.bf16.mxu0 %v8112_v18  ;;  %v8118_v9 = vld [vmem:[#allocation14 + $0x600] ss:$28 sps:$4 sm:$0xff]  }
 0x4ba   :  { %v8653_v59 = vadd.f32 %v6048_v19, %v6008_v20 }
 0x4bb   :  { %v6011_v51 = vpop.f32.mrf.mxu0  ;;  %v6052_v22 = vpop.f32.mrf.mxu1 }
 0x4bc   :  { %7298 = vmatpush3.bf16.msra.mxu0 %v8113_v35 }
 0x4bd   :  { %v6012_v37 = vpop.f32.mrf.mxu0  ;;  %v6053_v13 = vpop.f32.mrf.mxu1  ;;  %7299 = vmatprep.subr.bf16.mxu0 %v8114_v40 }
 0x4be   :  { %v8156_v37 = vld [vmem:[#allocation16] sm:$0x7f] }
 0x4bf   :  { %v3398_v13 = vunpack.c.h.bf16 %v8156_v37 }
 0x4c0   :  { %7300 = vmatpush3.bf16.msra.mxu0 %v8115_v23 }
 0x4c1   :  { %7301 = vmatprep.subr.bf16.mxu0 %v8116_v33  ;;  %v3420_v33 = vrot.slane %v3398_v13, %v8474_v36 }
 0x4c4   :  { %7302 = vmatpush3.bf16.msra.mxu0 %v8117_v14  ;;  %v3424_v14 = vrot.slane %v3398_v13, %v3407_v43 }
 0x4c5   :  { %7303 = vmatprep.subr.bf16.mxu0 %v8118_v9  ;;  %v3455_v9 = vrot.slane %v3420_v33, %v8474_v36 }
 0x4c8   :  { %7304 = vmatpush3.bf16.msra.mxu0 %v8119_v25  ;;  %v3459_v25 = vrot.slane %v3424_v14, %v8474_v36 }
 0x4c9   :  { %7305 = vmatprep.subr.bf16.mxu0 %v8120_v26 }
 0x4cc   :  { %7306 = vmatpush3.bf16.msra.mxu0 %v8121_v34 }
 0x4cd   :  { %7307 = vmatprep.subr.bf16.mxu0 %v8122_v5 }
 0x4d0   :  { %7308 = vmatpush3.bf16.msra.mxu0 %v8123_v39 }
 0x4d1   :  { %7309 = vmatprep.subr.bf16.mxu0 %v8124_v42 }
 0x4d4   :  { %7310 = vmatpush3.bf16.msra.mxu0 %v8125_v45 }
 0x4d5   :  { %7339 = vmatprep.subr.bf16.mxu0 %v8126_v46 }
 0x4d7   :  { %6333 = vmatmul.mubr.bf16.vlgmr.msra.gmra.mxu0 %v8560_v11  ;;  %v3415_v11 = vsub.s32 6, %v8466_v29 }
 0x4d8   :  { %7340 = vmatpush3.bf16.msra.mxu0 %v8127_v47  ;;  %6412 = vmatprep.mubr.bf16.mxu0 %v8591_v28  ;;  %v8138_v28 = vld [vmem:[#allocation14 + $0xc90] ss:$28 sps:$4 sm:$0xff]  }
 0x4d9   :  { %7341 = vmatprep.subr.bf16.mxu0 %v8128_v48  ;;  %v3416_v57 = vrot.slane %v8600_v27, %v3415_v11 }
 0x4db   :  { %v3451_v62 = vrot.slane %v3416_v57, %v8474_v36 }
 0x4dc   :  { %7342 = vmatpush3.bf16.msra.mxu0 %v8129_v6 }
 0x4dd   :  { %7343 = vmatprep.subr.bf16.mxu0 %v8130_v49  ;;  %v5969_v52 = vadd.f32 %v8635_v58, %v3451_v62 }
 0x4df   :  { %v6010_v10 = vadd.f32 %v8649_v4, %v5969_v52 }
 0x4e0   :  { %7344 = vmatpush3.bf16.msra.mxu0 %v8131_v50 }
 0x4e1   :  { %7345 = vmatprep.subr.bf16.mxu0 %v8132_v53  ;;  %v6051_v1 = vadd.f32 %v8651_v21, %v6010_v10 }
 0x4e4   :  { %7346 = vmatpush3.bf16.msra.mxu0 %v8133_v54 }
 0x4e5   :  { %7347 = vmatprep.subr.bf16.mxu0 %v8134_v44 }
 0x4e8   :  { %7348 = vmatpush3.bf16.msra.mxu0 %v8135_v55 }
 0x4e9   :  { %7349 = vmatprep.subr.bf16.mxu0 %v8136_v56 }
 0x4ec   :  { %7350 = vmatpush3.bf16.msra.mxu0 %v8137_v30 }
 0x4ed   :  { %7351 = vmatprep.subr.bf16.mxu0 %v8138_v28 }
 0x4f0   :  { %7352 = vmatpush3.bf16.msra.mxu0 %v8139_v60 }
 0x4f1   :  { %7353 = vmatprep.subr.bf16.mxu0 %v8140_v61  ;;  %v3428_v61 = vrot.slane %v3398_v13, %v3411_v41 }
 0x4f3   :  { %v3463_v62 = vrot.slane %v3428_v61, %v8474_v36 }
 0x4f4   :  { %7354 = vmatpush3.bf16.msra.mxu0 %v8141_v63 }
 0x4f7   :  { %v6089_v24 = vpop.f32.mrf.mxu0  ;;  %6413 = vmatmul.mubr.bf16.vlgmr.msra.gmra.mxu0 %v8594_v31 }
 0x4f8   :  { %v6090_v27 = vadd.f32 %v6089_v24, %v8653_v59  ;;  %v6130_v2 = vpop.f32.mrf.mxu1 }
 0x4f9   :  { %v6091_v3 = vpop.f32.mrf.mxu0  ;;  %v6131_v26 = vadd.f32 %v6130_v2, %v3455_v9 }
 0x4fa   :  { %v6092_v7 = vadd.f32 %v6091_v3, %v6051_v1  ;;  %v6132_v8 = vpop.f32.mrf.mxu1  ;;  %8146 = vtanh.f32 %v6090_v27 }
 0x4fb   :  { %v6093_v38 = vpop.f32.mrf.mxu0  ;;  %v6133_v34 = vadd.f32 %v6132_v8, %v3459_v25 }
 0x4fc   :  { %8148 = vtanh.f32 %v6092_v7  ;;  %v6134_v12 = vpop.f32.mrf.mxu1 }
 0x4fd   :  { %v6094_v15 = vpop.f32.mrf.mxu0 }
 0x4fe   :  { %v6135_v58 = vpop.f32.mrf.mxu1 }
 0x507   :  { %v8147_v16 = vpop.eup %8146 }
 0x509   :  { %v8149_v17 = vpop.eup %8148 }
 0x50a   :  { %v7270_v18 = vpack.c.bf16 %v8149_v17, %v8147_v16 }
 0x50c   :  { %6457 = vst [vmem:[#allocation17 + $0x8] sm:$0xff] %v7270_v18 }
 0x537   :  { %v6171_v0 = vpop.f32.mrf.mxu0 }
 0x538   :  { %v6212_v31 = vpop.f32.mrf.mxu1  ;;  %v6172_v5 = vadd.f32 %v6171_v0, %v6131_v26 }
 0x539   :  { %v6173_v32 = vpop.f32.mrf.mxu0 }
 0x53a   :  { %v6214_v19 = vpop.f32.mrf.mxu1  ;;  %v6174_v39 = vadd.f32 %v6173_v32, %v6133_v34  ;;  %v6213_v42 = vadd.f32 %v6212_v31, %v6172_v5 }
 0x53b   :  { %v6175_v20 = vpop.f32.mrf.mxu0 }
 0x53c   :  { %v6216_v35 = vpop.f32.mrf.mxu1  ;;  %v6215_v46 = vadd.f32 %v6214_v19, %v6174_v39 }
 0x53d   :  { %v6176_v4 = vpop.f32.mrf.mxu0 }
 0x53e   :  { %v6217_v21 = vpop.f32.mrf.mxu1 }
 0x558   :  { %v7289_v40 = vpop.f32.mrf.mxu1 }
 0x55a   :  { %v7290_v59 = vpop.f32.mrf.mxu1 }
 0x55b   :  { %v7291_v51 = vadd.f32 %v7290_v59, %v7289_v40 }
 0x55c   :  { %v7292_v22 = vpop.f32.mrf.mxu1 }
 0x55d   :  { %v6295_v52 = vadd.f32 %v7291_v51, %v3463_v62 }
 0x55e   :  { %v7293_v23 = vpop.f32.mrf.mxu1 }
 0x577   :  { %v6253_v45 = vpop.f32.mrf.mxu0 }
 0x578   :  { %v6254_v47 = vadd.f32 %v6253_v45, %v6213_v42  ;;  %v7333_v48 = vpop.f32.mrf.mxu1 }
 0x579   :  { %v6255_v6 = vpop.f32.mrf.mxu0 }
 0x57a   :  { %v6256_v49 = vadd.f32 %v6255_v6, %v6215_v46  ;;  %v7334_v50 = vpop.f32.mrf.mxu1  ;;  %8150 = vtanh.f32 %v6254_v47 }
 0x57b   :  { %v6257_v53 = vpop.f32.mrf.mxu0  ;;  %v7335_v1 = vadd.f32 %v7334_v50, %v7333_v48 }
 0x57c   :  { %8152 = vtanh.f32 %v6256_v49  ;;  %v7336_v43 = vpop.f32.mrf.mxu1 }
 0x57d   :  { %v6258_v54 = vpop.f32.mrf.mxu0 }
 0x57e   :  { %v7337_v44 = vpop.f32.mrf.mxu1 }
 0x587   :  { %v8151_v55 = vpop.eup %8150 }
 0x589   :  { %v8153_v56 = vpop.eup %8152 }
 0x58a   :  { %v7271_v11 = vpack.c.bf16 %v8153_v56, %v8151_v55 }
 0x58c   :  { %6458 = vst [vmem:[#allocation17 + $0x10] sm:$0xff] %v7271_v11 }
 0x597   :  { %v7311_v30 = vpop.f32.mrf.mxu0 }
 0x599   :  { %v7312_v28 = vpop.f32.mrf.mxu0 }
 0x59a   :  { %v7313_v63 = vadd.f32 %v7312_v28, %v7311_v30 }
 0x59b   :  { %v7314_v57 = vpop.f32.mrf.mxu0 }
 0x59c   :  { %v6335_v10 = vadd.f32 %v7313_v63, %v6295_v52 }
 0x59d   :  { %v7315_v60 = vpop.f32.mrf.mxu0 }
 0x59e   :  { %v6375_v2 = vadd.f32 %v7335_v1, %v6335_v10 }
 0x5b7   :  { %v7355_v24 = vpop.f32.mrf.mxu0 }
 0x5b9   :  { %v7356_v27 = vpop.f32.mrf.mxu0 }
 0x5ba   :  { %v7357_v3 = vadd.f32 %v7356_v27, %v7355_v24 }
 0x5bb   :  { %v7358_v7 = vpop.f32.mrf.mxu0 }
 0x5bc   :  { %v6415_v8 = vadd.f32 %v7357_v3, %v6375_v2 }
 0x5bd   :  { %v7359_v38 = vpop.f32.mrf.mxu0 }
 0x5be   :  { %8154 = vtanh.f32 %v6415_v8 }
 0x5cb   :  { %v8155_v12 = vpop.eup %8154 }
 0x5cc   :  { %v7272_v15 = vpack.c.bf16 %v8155_v12, %v8155_v12 }
 0x5ce   :  { %6459 = vst [vmem:[#allocation17 + $0x18] sm:$0xf] %v7272_v15 }
 0x5cf   :  { %8348 = shalt.err (!%p8345_p7)
}
 0x5d0   :  { %6469 = dma.vmem_to_hbm [thread:$0]  %s6467_s8, 448, %s8685_s9, [#allocation4]  }
 0x5d1   :  { %8367 = dma.done.wait [#allocation4], 448  }
 0x5d2   :  { %8368 = vsyncadd [#allocation4], 4294966848 }
 0x5d3   :  { %6473 = vsyncpa [#allocation3], 1 }
 0x5d4   :  { %6474 = vsyncpa [#allocation6], 1 }
 0x5d5   :  { %6475 = vsyncpa [#allocation9], 1 }
 0x5d6   :  { %6476 = vsyncpa [#allocation12], 1 }
 0x5d7   :  { %6477 = vsyncpa [#allocation15], 1 }
 0x5d8   :  { %6478 = vsyncpa [#allocation4], 1 }

</bundles_post_ra>
